<compile_context>
chip_gen: v7x
topology: tpu7x:2x2x1
jax: 0.10.0
libtpu: 0.0.40
codegen_flags: <defaults>
</compile_context>

<pallas_src>
import jax
import jax.numpy as jnp
from jax import lax
from jax.experimental import pallas as pl
from jax.experimental.pallas import tpu as pltpu

KH = KW = 3  # 3x3 conv


def _relu_conv3x3_band_kernel(xa_ref, xb_ref, w_ref, b_ref, o_ref):
    # xa_ref: (1, TH*Wp, Cin) bf16  padded rows [i*TH, i*TH+TH), spatially flattened
    # xb_ref: (1, HB*Wp, Cin) bf16  halo rows   [i*TH+TH, i*TH+TH+HB)
    # w_ref : (9, Cin, Cout)  bf16  tap-major weights
    # b_ref : (1, Cout)       f32
    # o_ref : (1, TH, W, Cout) f32
    _, TH, W, Cout = o_ref.shape
    M = xa_ref.shape[1]          # TH * Wp
    Wp = M // TH                 # padded, 8-aligned width
    L = M + 2 * Wp               # length of each kw-shifted slab

    # Fused ReLU (relu commutes with the zero padding and with the bf16 cast).
    xa = jnp.maximum(xa_ref[0], 0.0)
    xb = jnp.maximum(xb_ref[0], 0.0)
    win = jnp.concatenate([xa, xb], axis=0)        # ((TH+HB)*Wp, Cin) bf16

    # Hoist the kw (column) shifts: only kw=1,2 are misaligned (one relayout each);
    # every slice taken below starts at a multiple of Wp (8-aligned) -> cheap views.
    slabs = [win[kw:kw + L, :] for kw in range(KW)]

    # 9 taps -> 9 back-to-back bf16 MXU matmuls, f32 accumulation.
    acc = None
    for kh in range(KH):
        base = kh * Wp                             # multiple of 8 -> aligned slice
        for kw in range(KW):
            p = jnp.dot(slabs[kw][base:base + M, :], w_ref[kh * KW + kw],
                        preferred_element_type=jnp.float32)
            acc = p if acc is None else acc + p

    # One-shot compaction Wp -> W (free reshape since Wp % 8 == 0), bias on the compact
    # tile only, single lane-dense store.
    out = acc.reshape(TH, Wp, Cout)[:, :W, :] + b_ref[...]
    o_ref[0] = out.astype(o_ref.dtype)


def _pick_tiles(H, W):
    """Row-band height TH, halo height HB, aligned padded width Wp."""
    Wp = ((W + 2) + 7) // 8 * 8                    # 8-aligned padded width
    best = None
    for t in (t for t in range(1, H + 1) if H % t == 0):
        if (t * Wp) % 16:                          # bf16 sublane packing
            continue
        # HB >= 3 (halo must cover the max tap offset 2*Wp+2), TH % HB == 0 so the
        # halo block index is an integer, and HB*Wp must be 16-aligned for bf16.
        hbs = [h for h in range(3, t + 1) if t % h == 0 and (h * Wp) % 16 == 0]
        if not hbs:
            continue
        hb = min(hbs)
        score = (abs(t - 28), -t, hb)              # prefer big bands (~28 rows)
        if best is None or score < best[0]:
            best = (score, t, hb)
    assert best is not None, f"no valid row tile for H={H}, W={W}"
    _, TH, HB = best
    return TH, HB, Wp


def relu_conv2d(x_nchw, w_oihw, b):
    """y = Conv2d(relu(x)), 3x3, stride 1, padding 1. NCHW in, NCHW out (f32)."""
    N, Cin, H, W = x_nchw.shape
    Cout = w_oihw.shape[0]
    TH, HB, Wp = _pick_tiles(H, W)
    n_bands = H // TH

    # Layout glue in plain JAX: NCHW -> NHWC, zero pad (1 top, HB-1 bottom so the halo
    # block is always in-bounds; 1 left, Wp-W-1 right for sublane alignment), flatten
    # the spatial dims, cast to bf16 (halves input DMA; MXU is bf16-native).
    x_nhwc = jnp.transpose(x_nchw, (0, 2, 3, 1))
    xp = jnp.pad(x_nhwc, ((0, 0), (1, HB - 1), (1, Wp - W - 1), (0, 0)))
    xflat = xp.reshape(N, (H + HB) * Wp, Cin).astype(jnp.bfloat16)
    w = jnp.transpose(w_oihw, (2, 3, 1, 0)).reshape(KH * KW, Cin, Cout)
    w = w.astype(jnp.bfloat16)
    b2 = b.reshape(1, Cout).astype(jnp.float32)

    out_nhwc = pl.pallas_call(
        _relu_conv3x3_band_kernel,
        out_shape=jax.ShapeDtypeStruct((N, H, W, Cout), jnp.float32),
        grid_spec=pltpu.PrefetchScalarGridSpec(
            num_scalar_prefetch=0,
            grid=(N, n_bands),
            in_specs=[
                # main band: padded rows [i*TH, i*TH+TH)
                pl.BlockSpec((1, TH * Wp, Cin), lambda n, i: (n, i, 0)),
                # halo block just below the band: padded rows [i*TH+TH, i*TH+TH+HB)
                pl.BlockSpec((1, HB * Wp, Cin),
                             lambda n, i: (n, (i + 1) * (TH // HB), 0)),
                # weights & bias: constant block index -> stay resident in VMEM
                pl.BlockSpec((KH * KW, Cin, Cout), lambda n, i: (0, 0, 0)),
                pl.BlockSpec((1, Cout), lambda n, i: (0, 0)),
            ],
            out_specs=pl.BlockSpec((1, TH, W, Cout), lambda n, i: (n, i, 0, 0)),
        ),
        compiler_params=pltpu.CompilerParams(
            dimension_semantics=("parallel", "parallel"),
            vmem_limit_bytes=32 * 1024 * 1024),
    )(xflat, xflat, w, b2)

    return jnp.transpose(out_nhwc, (0, 3, 1, 2))  # back to NCHW


if __name__ == "__main__":
    # Small shapes consistent with the module (original was 1x256x56x56):
    # batch=2, channels=128 (lane-aligned), spatial=16.
    N, C, H, W = 2, 128, 16, 16

    key = jax.random.PRNGKey(0)
    kx, kwt, kb = jax.random.split(key, 3)
    x = jax.random.normal(kx, (N, C, H, W), dtype=jnp.float32)
    fan_in = C * KH * KW
    bound = 1.0 / jnp.sqrt(fan_in)
    w_oihw = jax.random.uniform(kwt, (C, C, KH, KW), jnp.float32, -bound, bound)
    b = jax.random.uniform(kb, (C,), jnp.float32, -bound, bound)

    y = relu_conv2d(x, w_oihw, b)
    jax.block_until_ready(y)

    # Reference check against the full-f32 XLA conv.  Tolerance reflects the bf16
    # matmul operands (f32 accumulation preserved); observed error is ~5e-3 max.
    ref = lax.conv_general_dilated(
        jnp.maximum(x, 0.0), w_oihw, window_strides=(1, 1),
        padding=((1, 1), (1, 1)),
        dimension_numbers=("NCHW", "OIHW", "NCHW"),
    ) + b.reshape(1, C, 1, 1)
    assert y.shape == (N, C, H, W)
    assert jnp.allclose(y, ref, atol=2e-2, rtol=2e-2), \
        float(jnp.max(jnp.abs(y - ref)))

    print("KERNEL_OK")
</pallas_src>

<mosaic_0001>
module attributes {stable_mosaic.version = 11 : i64} {
  func.func @_relu_conv3x3_band_kernel(%arg0: i32, %arg1: i32, %arg2: memref<1x384x128xbf16, #tpu.memory_space<vmem>>, %arg3: memref<1x96x128xbf16, #tpu.memory_space<vmem>>, %arg4: memref<9x128x128xbf16, #tpu.memory_space<vmem>>, %arg5: memref<1x128xf32, #tpu.memory_space<vmem>>, %arg6: memref<1x16x16x128xf32, #tpu.memory_space<vmem>>) attributes {dimension_semantics = [#tpu.dimension_semantics<parallel>, #tpu.dimension_semantics<parallel>], iteration_bounds = array<i64: 2, 1>, scalar_prefetch = 0 : i64, scratch_operands = 0 : i64, tpu.core_type = #tpu.core_type<tc>, window_params = [{transform_indices = @transform_0, window_bounds = array<i64: 1, 384, 128>}, {transform_indices = @transform_1, window_bounds = array<i64: 1, 96, 128>}, {pipeline_mode = #tpu.pipeline_mode<synchronous>, transform_indices = @transform_2, window_bounds = array<i64: 9, 128, 128>}, {pipeline_mode = #tpu.pipeline_mode<synchronous>, transform_indices = @transform_3, window_bounds = array<i64: 1, 128>}, {transform_indices = @transform_4, window_bounds = array<i64: 1, 16, 16, 128>}]} {
    %c0 = arith.constant 0 : index
    %c0_0 = arith.constant 0 : index
    %c0_1 = arith.constant 0 : index
    %0 = vector.load %arg2[%c0, %c0_0, %c0_1] : memref<1x384x128xbf16, #tpu.memory_space<vmem>>, vector<1x384x128xbf16>
    %1 = vector.shape_cast %0 : vector<1x384x128xbf16> to vector<384x128xbf16>
    %cst = arith.constant 0.000000e+00 : bf16
    %2 = vector.broadcast %cst : bf16 to vector<384x128xbf16>
    %3 = arith.maximumf %1, %2 : vector<384x128xbf16>
    %c0_2 = arith.constant 0 : index
    %c0_3 = arith.constant 0 : index
    %c0_4 = arith.constant 0 : index
    %4 = vector.load %arg3[%c0_2, %c0_3, %c0_4] : memref<1x96x128xbf16, #tpu.memory_space<vmem>>, vector<1x96x128xbf16>
    %5 = vector.shape_cast %4 : vector<1x96x128xbf16> to vector<96x128xbf16>
    %cst_5 = arith.constant 0.000000e+00 : bf16
    %6 = vector.broadcast %cst_5 : bf16 to vector<96x128xbf16>
    %7 = arith.maximumf %5, %6 : vector<96x128xbf16>
    %8 = tpu.concatenate %3, %7 in 0 : vector<384x128xbf16>, vector<96x128xbf16> -> vector<480x128xbf16>
    %9 = vector.extract_strided_slice %8 {offsets = [0, 0], sizes = [432, 128], strides = [1, 1]} : vector<480x128xbf16> to vector<432x128xbf16>
    %10 = vector.extract_strided_slice %8 {offsets = [1, 0], sizes = [432, 128], strides = [1, 1]} : vector<480x128xbf16> to vector<432x128xbf16>
    %11 = vector.extract_strided_slice %8 {offsets = [2, 0], sizes = [432, 128], strides = [1, 1]} : vector<480x128xbf16> to vector<432x128xbf16>
    %12 = vector.extract_strided_slice %9 {offsets = [0, 0], sizes = [384, 128], strides = [1, 1]} : vector<432x128xbf16> to vector<384x128xbf16>
    %c0_6 = arith.constant 0 : index
    %c0_7 = arith.constant 0 : index
    %c0_8 = arith.constant 0 : index
    %13 = vector.load %arg4[%c0_6, %c0_7, %c0_8] : memref<9x128x128xbf16, #tpu.memory_space<vmem>>, vector<1x128x128xbf16>
    %14 = vector.shape_cast %13 : vector<1x128x128xbf16> to vector<128x128xbf16>
    %cst_9 = arith.constant dense<0.000000e+00> : vector<384x128xf32>
    %15 = tpu.matmul %12, %14, %cst_9 {dimension_numbers = #tpu.dot_dimension_numbers<[1], [0], [0], [1], [0, 0, 1, 1], [], []>} : vector<384x128xbf16>, vector<128x128xbf16>, vector<384x128xf32> -> vector<384x128xf32>
    %16 = vector.extract_strided_slice %10 {offsets = [0, 0], sizes = [384, 128], strides = [1, 1]} : vector<432x128xbf16> to vector<384x128xbf16>
    %c1 = arith.constant 1 : index
    %c0_10 = arith.constant 0 : index
    %c0_11 = arith.constant 0 : index
    %17 = vector.load %arg4[%c1, %c0_10, %c0_11] : memref<9x128x128xbf16, #tpu.memory_space<vmem>>, vector<1x128x128xbf16>
    %18 = vector.shape_cast %17 : vector<1x128x128xbf16> to vector<128x128xbf16>
    %cst_12 = arith.constant dense<0.000000e+00> : vector<384x128xf32>
    %19 = tpu.matmul %16, %18, %cst_12 {dimension_numbers = #tpu.dot_dimension_numbers<[1], [0], [0], [1], [0, 0, 1, 1], [], []>} : vector<384x128xbf16>, vector<128x128xbf16>, vector<384x128xf32> -> vector<384x128xf32>
    %20 = arith.addf %15, %19 : vector<384x128xf32>
    %21 = vector.extract_strided_slice %11 {offsets = [0, 0], sizes = [384, 128], strides = [1, 1]} : vector<432x128xbf16> to vector<384x128xbf16>
    %c2 = arith.constant 2 : index
    %c0_13 = arith.constant 0 : index
    %c0_14 = arith.constant 0 : index
    %22 = vector.load %arg4[%c2, %c0_13, %c0_14] : memref<9x128x128xbf16, #tpu.memory_space<vmem>>, vector<1x128x128xbf16>
    %23 = vector.shape_cast %22 : vector<1x128x128xbf16> to vector<128x128xbf16>
    %cst_15 = arith.constant dense<0.000000e+00> : vector<384x128xf32>
    %24 = tpu.matmul %21, %23, %cst_15 {dimension_numbers = #tpu.dot_dimension_numbers<[1], [0], [0], [1], [0, 0, 1, 1], [], []>} : vector<384x128xbf16>, vector<128x128xbf16>, vector<384x128xf32> -> vector<384x128xf32>
    %25 = arith.addf %20, %24 : vector<384x128xf32>
    %26 = vector.extract_strided_slice %9 {offsets = [24, 0], sizes = [384, 128], strides = [1, 1]} : vector<432x128xbf16> to vector<384x128xbf16>
    %c3 = arith.constant 3 : index
    %c0_16 = arith.constant 0 : index
    %c0_17 = arith.constant 0 : index
    %27 = vector.load %arg4[%c3, %c0_16, %c0_17] : memref<9x128x128xbf16, #tpu.memory_space<vmem>>, vector<1x128x128xbf16>
    %28 = vector.shape_cast %27 : vector<1x128x128xbf16> to vector<128x128xbf16>
    %cst_18 = arith.constant dense<0.000000e+00> : vector<384x128xf32>
    %29 = tpu.matmul %26, %28, %cst_18 {dimension_numbers = #tpu.dot_dimension_numbers<[1], [0], [0], [1], [0, 0, 1, 1], [], []>} : vector<384x128xbf16>, vector<128x128xbf16>, vector<384x128xf32> -> vector<384x128xf32>
    %30 = arith.addf %25, %29 : vector<384x128xf32>
    %31 = vector.extract_strided_slice %10 {offsets = [24, 0], sizes = [384, 128], strides = [1, 1]} : vector<432x128xbf16> to vector<384x128xbf16>
    %c4 = arith.constant 4 : index
    %c0_19 = arith.constant 0 : index
    %c0_20 = arith.constant 0 : index
    %32 = vector.load %arg4[%c4, %c0_19, %c0_20] : memref<9x128x128xbf16, #tpu.memory_space<vmem>>, vector<1x128x128xbf16>
    %33 = vector.shape_cast %32 : vector<1x128x128xbf16> to vector<128x128xbf16>
    %cst_21 = arith.constant dense<0.000000e+00> : vector<384x128xf32>
    %34 = tpu.matmul %31, %33, %cst_21 {dimension_numbers = #tpu.dot_dimension_numbers<[1], [0], [0], [1], [0, 0, 1, 1], [], []>} : vector<384x128xbf16>, vector<128x128xbf16>, vector<384x128xf32> -> vector<384x128xf32>
    %35 = arith.addf %30, %34 : vector<384x128xf32>
    %36 = vector.extract_strided_slice %11 {offsets = [24, 0], sizes = [384, 128], strides = [1, 1]} : vector<432x128xbf16> to vector<384x128xbf16>
    %c5 = arith.constant 5 : index
    %c0_22 = arith.constant 0 : index
    %c0_23 = arith.constant 0 : index
    %37 = vector.load %arg4[%c5, %c0_22, %c0_23] : memref<9x128x128xbf16, #tpu.memory_space<vmem>>, vector<1x128x128xbf16>
    %38 = vector.shape_cast %37 : vector<1x128x128xbf16> to vector<128x128xbf16>
    %cst_24 = arith.constant dense<0.000000e+00> : vector<384x128xf32>
    %39 = tpu.matmul %36, %38, %cst_24 {dimension_numbers = #tpu.dot_dimension_numbers<[1], [0], [0], [1], [0, 0, 1, 1], [], []>} : vector<384x128xbf16>, vector<128x128xbf16>, vector<384x128xf32> -> vector<384x128xf32>
    %40 = arith.addf %35, %39 : vector<384x128xf32>
    %41 = vector.extract_strided_slice %9 {offsets = [48, 0], sizes = [384, 128], strides = [1, 1]} : vector<432x128xbf16> to vector<384x128xbf16>
    %c6 = arith.constant 6 : index
    %c0_25 = arith.constant 0 : index
    %c0_26 = arith.constant 0 : index
    %42 = vector.load %arg4[%c6, %c0_25, %c0_26] : memref<9x128x128xbf16, #tpu.memory_space<vmem>>, vector<1x128x128xbf16>
    %43 = vector.shape_cast %42 : vector<1x128x128xbf16> to vector<128x128xbf16>
    %cst_27 = arith.constant dense<0.000000e+00> : vector<384x128xf32>
    %44 = tpu.matmul %41, %43, %cst_27 {dimension_numbers = #tpu.dot_dimension_numbers<[1], [0], [0], [1], [0, 0, 1, 1], [], []>} : vector<384x128xbf16>, vector<128x128xbf16>, vector<384x128xf32> -> vector<384x128xf32>
    %45 = arith.addf %40, %44 : vector<384x128xf32>
    %46 = vector.extract_strided_slice %10 {offsets = [48, 0], sizes = [384, 128], strides = [1, 1]} : vector<432x128xbf16> to vector<384x128xbf16>
    %c7 = arith.constant 7 : index
    %c0_28 = arith.constant 0 : index
    %c0_29 = arith.constant 0 : index
    %47 = vector.load %arg4[%c7, %c0_28, %c0_29] : memref<9x128x128xbf16, #tpu.memory_space<vmem>>, vector<1x128x128xbf16>
    %48 = vector.shape_cast %47 : vector<1x128x128xbf16> to vector<128x128xbf16>
    %cst_30 = arith.constant dense<0.000000e+00> : vector<384x128xf32>
    %49 = tpu.matmul %46, %48, %cst_30 {dimension_numbers = #tpu.dot_dimension_numbers<[1], [0], [0], [1], [0, 0, 1, 1], [], []>} : vector<384x128xbf16>, vector<128x128xbf16>, vector<384x128xf32> -> vector<384x128xf32>
    %50 = arith.addf %45, %49 : vector<384x128xf32>
    %51 = vector.extract_strided_slice %11 {offsets = [48, 0], sizes = [384, 128], strides = [1, 1]} : vector<432x128xbf16> to vector<384x128xbf16>
    %c8 = arith.constant 8 : index
    %c0_31 = arith.constant 0 : index
    %c0_32 = arith.constant 0 : index
    %52 = vector.load %arg4[%c8, %c0_31, %c0_32] : memref<9x128x128xbf16, #tpu.memory_space<vmem>>, vector<1x128x128xbf16>
    %53 = vector.shape_cast %52 : vector<1x128x128xbf16> to vector<128x128xbf16>
    %cst_33 = arith.constant dense<0.000000e+00> : vector<384x128xf32>
    %54 = tpu.matmul %51, %53, %cst_33 {dimension_numbers = #tpu.dot_dimension_numbers<[1], [0], [0], [1], [0, 0, 1, 1], [], []>} : vector<384x128xbf16>, vector<128x128xbf16>, vector<384x128xf32> -> vector<384x128xf32>
    %55 = arith.addf %50, %54 : vector<384x128xf32>
    %56 = vector.shape_cast %55 : vector<384x128xf32> to vector<16x24x128xf32>
    %57 = vector.extract_strided_slice %56 {offsets = [0, 0, 0], sizes = [16, 16, 128], strides = [1, 1, 1]} : vector<16x24x128xf32> to vector<16x16x128xf32>
    %c0_34 = arith.constant 0 : index
    %c0_35 = arith.constant 0 : index
    %58 = vector.load %arg5[%c0_34, %c0_35] : memref<1x128xf32, #tpu.memory_space<vmem>>, vector<1x128xf32>
    %59 = vector.shape_cast %58 : vector<1x128xf32> to vector<1x1x128xf32>
    %60 = vector.broadcast %59 : vector<1x1x128xf32> to vector<16x16x128xf32>
    %61 = arith.addf %57, %60 : vector<16x16x128xf32>
    %c0_36 = arith.constant 0 : index
    %c0_37 = arith.constant 0 : index
    %c0_38 = arith.constant 0 : index
    %c0_39 = arith.constant 0 : index
    %62 = vector.load %arg6[%c0_36, %c0_37, %c0_38, %c0_39] : memref<1x16x16x128xf32, #tpu.memory_space<vmem>>, vector<1x16x16x128xf32>
    %63 = vector.shape_cast %62 : vector<1x16x16x128xf32> to vector<16x16x128xf32>
    %64 = vector.shape_cast %61 : vector<16x16x128xf32> to vector<1x16x16x128xf32>
    tpu.vector_store %arg6[%c0_36, %c0_37, %c0_38, %c0_39], %64 {strides = array<i32>} : memref<1x16x16x128xf32, #tpu.memory_space<vmem>>, vector<1x16x16x128xf32>,
    return
  }
  func.func @transform_0(%arg0: i32, %arg1: i32) -> (i32, i32, i32) {
    %c0_i32 = arith.constant 0 : i32
    %c0_i32_0 = arith.constant 0 : i32
    return %arg0, %arg1, %c0_i32 : i32, i32, i32
  }
  func.func @transform_1(%arg0: i32, %arg1: i32) -> (i32, i32, i32) {
    %c1_i32 = arith.constant 1 : i32
    %0 = arith.addi %arg1, %c1_i32 : i32
    %c4_i32 = arith.constant 4 : i32
    %1 = arith.muli %0, %c4_i32 : i32
    %c0_i32 = arith.constant 0 : i32
    %c0_i32_0 = arith.constant 0 : i32
    return %arg0, %1, %c0_i32 : i32, i32, i32
  }
  func.func @transform_2(%arg0: i32, %arg1: i32) -> (i32, i32, i32) {
    %c0_i32 = arith.constant 0 : i32
    %c0_i32_0 = arith.constant 0 : i32
    %c0_i32_1 = arith.constant 0 : i32
    %c0_i32_2 = arith.constant 0 : i32
    return %c0_i32, %c0_i32_0, %c0_i32_1 : i32, i32, i32
  }
  func.func @transform_3(%arg0: i32, %arg1: i32) -> (i32, i32) {
    %c0_i32 = arith.constant 0 : i32
    %c0_i32_0 = arith.constant 0 : i32
    %c0_i32_1 = arith.constant 0 : i32
    return %c0_i32, %c0_i32_0 : i32, i32
  }
  func.func @transform_4(%arg0: i32, %arg1: i32) -> (i32, i32, i32, i32) {
    %c0_i32 = arith.constant 0 : i32
    %c0_i32_0 = arith.constant 0 : i32
    %c0_i32_1 = arith.constant 0 : i32
    return %arg0, %arg1, %c0_i32, %c0_i32_0 : i32, i32, i32, i32
  }
}

</mosaic_0001>

<bundles_post_ra>
// kernel: tpu_custom_call.1
= control target key start
LH: loop header
LB: loop body
LE: loop exit
PB: predicated region body
PF: predicated region fallthrough
CT: control target
= control target key end

     0   :  { %s7138_s0 = inlined_call_operand.hbm [shape: bf16[2,480,128], index: 0, kind: input, shape index: {}]   ;;  %s7139_s1 = inlined_call_operand.hbm [shape: bf16[2,480,128], index: 1, kind: input, shape index: {}]   ;;  %s7140_s2 = inlined_call_operand.hbm [shape: bf16[9,128,128], index: 2, kind: input, shape index: {}]   ;;  %s7141_s3 = inlined_call_operand.vmem [shape: f32[1,128], index: 3, kind: input, shape index: {}]   ;;  %s7142_s4 = inlined_call_operand.hbm [shape: f32[2,16,16,128], index: 4, kind: output, shape index: {}]  }
   0x1   :  { %7244 = sst [smem:[#allocation64_spill]] %s7138_s0 }
   0x2   :  { %7245 = sst [smem:[#allocation65_spill]] %s7140_s2 }
   0x3   :  { %9 = vsyncpa [#allocation3], 0 }
   0x4   :  { %11 = vsyncpa [#allocation3 + $0x1], 0 }
   0x5   :  { %12 = vsyncpa [#allocation6], 0 }
   0x6   :  { %14 = vsyncpa [#allocation6 + $0x1], 0 }
   0x7   :  { %15 = vsyncpa [#allocation4], 0 }
   0x8   :  { %17 = vsyncpa [#allocation4 + $0x1], 0  ;;  %s5468_s15 = smov 0   ;;  %s5470_s16 = smov 0  }
   0x9   :  { %s5472_s17 = smov 0   ;;  %s5474_s18 = smov 0  }
   0xa   :  { %s5476_s19 = smov 0   ;;  %s5478_s20 = smov 0  }
   0xb LB: > { %7246 = sst [smem:[#allocation13_spill]] %s5420_s17  ;;  %s5499_s21 = sadd.s32 4294967295, %s5432_s20   ;;  %s5432_s20 = sphi %s5478_s20, %s23_s20   ;;  %s5428_s19 = sphi %s5476_s19, %s7420_s19   ;;  %s5424_s18 = sphi %s5474_s18, %s7419_s18   ;;  %s5420_s17 = sphi %s5472_s17, %s7415_s17   ;;  %s5416_s16 = sphi %s5470_s16, %s7418_s16   ;;  %s5412_s15 = sphi %s5468_s15, %s7417_s15  }
   0xc   : > { %s4097_s22 = sadd.s32 4294967294, %s5432_s20   ;;  %p57_p0 = scmp.ne.s32.totalorder %s5416_s16, %s5412_s15 }
   0xd   : > { %p7143_p1 = scmp.eq.s32.totalorder %s5499_s21, 0  ;;  %p163_p3 = scmp.eq.s32.totalorder %s4097_s22, 1 }
   0xe   : > { %p4098_p5 = scmp.ge.s32.totalorder %s5432_s20, 1  ;;  %p170_p7 = scmp.lt.s32.totalorder %s5432_s20, 3 }
   0xf   : > { %p5508_p4 = por %p7143_p1, %p57_p0  ;;  %p5513_p6 = por %p163_p3, %p57_p0 }
  0x10   : > { %p5518_p8 = pnand %p4098_p5, %p170_p7  ;;  %s5434_s26 = smov [#allocation7]  }
  0x11   : > { %s7247_s23 = scalar_select %p5508_p4, 1, 0 }
  0x12   : > { %s7248_s24 = scalar_select %p5513_p6, 1, 0 }
  0x13   : > { %s7249_s25 = scalar_select %p5518_p8, 1, 0 }
  0x14   : > { %s182_s27 = sshll.u32 %s5434_s26, 4  ;;  %p5108_p9 = pneg %p5518_p8  ;;  %s183_s27 = int_to_ptr.vmem [resolvable:$true] %s182_s27 }
  0x15   : > { %s35_s29 = sadd.s32 1, %s5428_s19  ;;  %s7251_s2 = sld [smem:[#allocation65_spill]] }
  0x16   : > { %p5527_p11 = pnand %p5108_p9, %p7143_p1 }
  0x18   : > { %p5255_p13 = pneg %p5527_p11 }
  0x1b   : > { %s5253_s6 = scalar_lea.hbm %s7251_s2, 9216 }
  0x1c   : > { %p5254_p12 = scmp.ne.s32.totalorder %s7251_s2, %s5253_s6  ;;  %p5260_p5 = scmp.lt.u32.totalorder %s5253_s6, %s7251_s2 }
  0x1e   : > { %p5256_p0 = pnand %p5255_p13, %p5254_p12 }
  0x20   : > { %p5257_p3 = pneg %p5256_p0 }
  0x22   : > { %p5262_p7 = pnand %p5260_p5, %p5257_p3 }
  0x24   : > { %5265 = shalt.err (!%p5262_p7)
}
  0x25   : > { %s5266_s11 = scalar_lea.vmem %s183_s27, 9216  ;;  %p5274_p2 = scmp.lt.s32.totalorder %s183_s27, %s183_s27 }
  0x26   : > { %p5267_p9 = scmp.ne.s32.totalorder %s183_s27, %s5266_s11  ;;  %p5275_p6 = scmp.lt.s32.totalorder %s5266_s11, %s5266_s11 }
  0x28   : > { %p5269_p10 = pnand %p5267_p9, %p5255_p13  ;;  %p5276_p4 = por %p5275_p6, %p5274_p2 }
  0x2a   : > { %p5270_p1 = pneg %p5269_p10 }
  0x2c   : > { %p5277_p8 = pnand %p5276_p4, %p5270_p1 }
  0x2e   : > { %5280 = shalt.err (!%p5277_p8)
}
  0x2f   : > { %s7147_s12 = smov 64   ;;  %s5436_s13 = smov 4  }
  0x30   : > { %5111 = dma.hbm_to_vmem [thread:$0]  (!%p5527_p11), %s7251_s2, 9216, %s183_s27, [#allocation6], %s7147_s12, %s7147_s12, %s5436_s13  }
  0x31   : > { %p37_p1 = scmp.ge.s32.totalorder %s35_s29, 2  ;;  %s44_s26 = sadd.s32 1, %s5420_s17 }
  0x32   : > { %p51_p2 = scmp.ne.s32.totalorder %s5420_s17, %s5416_s16  ;;  %p52_p4 = scmp.eq.s32.totalorder %s5432_s20, 0 }
  0x33   : > { %s7422_s29 = smov (%p37_p1, %s35_s29), 0  ;;  %p7253_p8 = scmp.eq.s32.totalorder %s5499_s21, 1 }
  0x34   : > { %7252 = sst [smem:[#allocation14_spill]] %s7422_s29  ;;  %p53_p6 = por %p52_p4, %p51_p2 }
  0x35   : > { %p5559_p10 = por %p7253_p8, %p51_p2  ;;  %s39_s30 = ssub.s32 %s5428_s19, %s7422_s29 }
  0x36   : > { %p5124_p12 = scmp.lt.s32.totalorder %s5432_s20, 2  ;;  %p42_p13 = scmp.eq.s32.totalorder %s39_s30, 0 }
  0x37   : > { %s5567_s5 = sand.u32 1, %s5420_s17   ;;  %s7146_s7 = smul.u32 3840, %s5428_s19 }
  0x38   : > { %s5093_s27 = smul.u32 192, %s5567_s5  ;;  %p5574_p11 = pnand %p5124_p12, %p53_p6 }
  0x39   : > { %s5571_s6 = scalar_select %p42_p13, %s5420_s17, %s44_s26  }
  0x3a   : > { %s203_s8 = scalar_lea.vmem [#allocation2], %s5093_s27  ;;  %s7257_s0 = sld [smem:[#allocation64_spill]] }
  0x3b   : > { %7255 = sst [smem:[#allocation15_spill]] %s5571_s6  ;;  %s218_s9 = sshll.u32 %s203_s8, 4  ;;  %s5585_s9 = int_to_ptr.vmem [resolvable:$true] %s218_s9 }
  0x3c   : > { %s200_s30 = scalar_lea.sflag [#allocation3], %s5567_s5  ;;  %p5283_p3 = pneg %p5574_p11 }
  0x40   : > { %s5583_s22 = scalar_lea.hbm %s7257_s0, %s7146_s7  ;;  %s5286_s14 = scalar_lea.hbm %s7257_s0, 7680 }
  0x41   : > { %s5281_s27 = scalar_lea.hbm %s5583_s22, 3072  ;;  %p5287_p9 = scmp.lt.u32.totalorder %s5583_s22, %s7257_s0 }
  0x42   : > { %p5282_p0 = scmp.ne.s32.totalorder %s5583_s22, %s5281_s27  ;;  %p5288_p1 = scmp.lt.u32.totalorder %s5286_s14, %s5281_s27 }
  0x43   : > { %p5290_p4 = scmp.lt.u32.totalorder %s5281_s27, %s5583_s22 }
  0x44   : > { %p5284_p5 = pnand %p5283_p3, %p5282_p0  ;;  %p5289_p2 = por %p5288_p1, %p5287_p9 }
  0x46   : > { %p5285_p7 = pneg %p5284_p5  ;;  %p5291_p6 = por %p5290_p4, %p5289_p2 }
  0x48   : > { %p5292_p8 = pnand %p5291_p6, %p5285_p7 }
  0x4a   : > { %5295 = shalt.err (!%p5292_p8)
}
  0x4b   : > { %s5296_s26 = scalar_lea.vmem %s5585_s9, 3072  ;;  %s5437_s8 = smov [#allocation2]  }
  0x4c   : > { %p5297_p12 = scmp.ne.s32.totalorder %s5585_s9, %s5296_s26  ;;  %s5301_s11 = sshll.u32 %s5437_s8, 4  ;;  %s5302_s11 = int_to_ptr.vmem [resolvable:$false] %s5301_s11 }
  0x4d   : > { %s5303_s12 = scalar_lea.vmem %s5302_s11, 6144  ;;  %p5304_p5 = scmp.lt.s32.totalorder %s5585_s9, %s5302_s11 }
  0x4e   : > { %p5299_p13 = pnand %p5297_p12, %p5283_p3  ;;  %p5305_p9 = scmp.lt.s32.totalorder %s5303_s12, %s5296_s26 }
  0x50   : > { %p5300_p0 = pneg %p5299_p13  ;;  %p5306_p1 = por %p5305_p9, %p5304_p5 }
  0x52   : > { %p5307_p2 = pnand %p5306_p1, %p5300_p0 }
  0x54   : > { %5310 = shalt.err (!%p5307_p2)
}
  0x55   : > { %s7258_s7 = smov 64   ;;  %s5095_s27 = smul.u32 48, %s5567_s5 }
  0x56   : > { %5115 = dma.hbm_to_vmem [thread:$0]  (!%p5574_p11), %s5583_s22, 3072, %s5585_s9, %s200_s30, %s7258_s7, %s7258_s7, %s5436_s13  }
  0x57   : > { %s7259_s14 = smul.u32 3840, %s5428_s19  ;;  %s232_s0 = scalar_lea.vmem [#allocation5], %s5095_s27 }
  0x58   : > { %s243_s2 = sshll.u32 %s232_s0, 4  ;;  %s7260_s29 = sand.u32 1, %s5432_s20   ;;  %s5627_s2 = int_to_ptr.vmem [resolvable:$true] %s243_s2 }
  0x59   : > { %s4018_s11 = scalar_lea.hbm %s7139_s1, %s7259_s14  ;;  %s5631_s6 = scalar_lea.sflag [#allocation6], %s7260_s29 }
  0x5a   : > { %s5625_s12 = scalar_lea.hbm %s4018_s11, 3072  ;;  %s5341_s17 = scalar_lea.hbm %s4018_s11, 3840 }
  0x5b   : > { %p5312_p7 = scmp.ne.s32.totalorder %s5625_s12, %s5341_s17  ;;  %s5316_s22 = scalar_lea.hbm %s7139_s1, 7680 }
  0x5c   : > { %p5317_p8 = scmp.lt.u32.totalorder %s5625_s12, %s7139_s1  ;;  %p5318_p12 = scmp.lt.u32.totalorder %s5316_s22, %s5341_s17 }
  0x5d   : > { %p5314_p4 = pnand %p5312_p7, %p5283_p3  ;;  %p5320_p0 = scmp.lt.u32.totalorder %s5341_s17, %s5625_s12 }
  0x5e   : > { %p5319_p13 = por %p5318_p12, %p5317_p8 }
  0x5f   : > { %p5315_p6 = pneg %p5314_p4 }
  0x60   : > { %p5321_p5 = por %p5320_p0, %p5319_p13 }
  0x62   : > { %p5322_p9 = pnand %p5321_p5, %p5315_p6 }
  0x64   : > { %5325 = shalt.err (!%p5322_p9)
}
  0x65   : > { %s5326_s0 = scalar_lea.vmem %s5627_s2, 768  ;;  %s5438_s29 = smov [#allocation5]  }
  0x66   : > { %p5327_p1 = scmp.ne.s32.totalorder %s5627_s2, %s5326_s0  ;;  %s5331_s27 = sshll.u32 %s5438_s29, 4  ;;  %s5332_s27 = int_to_ptr.vmem [resolvable:$false] %s5331_s27 }
  0x67   : > { %s5333_s26 = scalar_lea.vmem %s5332_s27, 1536  ;;  %p5334_p4 = scmp.lt.s32.totalorder %s5627_s2, %s5332_s27 }
  0x68   : > { %p5329_p2 = pnand %p5327_p1, %p5283_p3  ;;  %p5335_p8 = scmp.lt.s32.totalorder %s5333_s26, %s5326_s0 }
  0x6a   : > { %p5330_p7 = pneg %p5329_p2  ;;  %p5336_p12 = por %p5335_p8, %p5334_p4 }
  0x6c   : > { %p5337_p13 = pnand %p5336_p12, %p5330_p7 }
  0x6e   : > { %5340 = shalt.err (!%p5337_p13)
}
  0x6f   : > { %5118 = dma.hbm_to_vmem [thread:$0]  (!%p5574_p11), %s5625_s12, 768, %s5627_s2, %s5631_s6, %s7258_s7, %s7258_s7, %s5436_s13  }
  0x70   : > { %p7261_p3 = scmp.ne.s32.totalorder %s7249_s25, 0 }
  0x72   : > { %255 = sbr.rel (%p7261_p3) target bundleno = 826 (0x33a), region = 36 }
  0x79   : > { %s5662_s17 = sand.u32 1, %s5416_s16   ;;  %p7262_p6 = scmp.ne.s32.totalorder %s7247_s23, 0 }
  0x7a   : > { %s5096_s8 = smul.u32 192, %s5662_s17  ;;  %s258_s11 = scalar_lea.sflag [#allocation3], %s5662_s17 }
  0x7c   : > { %s5666_s5 = scalar_lea.vmem [#allocation2], %s5096_s8 }
  0x7d   : > { %5395 = dma.done.wait (%p7262_p6), %s258_s11, 3072  }
  0x7e   : > { %5397 = vsyncadd (%p7262_p6), %s258_s11, 4294964224  ;;  %s266_s2 = sand.u32 1, %s5499_s21   ;;  %s5097_s25 = smul.u32 48, %s5662_s17 }
  0x7f   : > { %s267_s13 = scalar_lea.sflag [#allocation6], %s266_s2 }
  0x80   : > { %s5674_s6 = scalar_lea.vmem [#allocation5], %s5097_s25 }
  0x81   : > { %5399 = dma.done.wait (%p7262_p6), %s267_s13, 768  }
  0x82   : > { %5401 = vsyncadd (%p7262_p6), %s267_s13, 4294966528  ;;  %p7263_p11 = scmp.eq.s32.totalorder %s5499_s21, 0 }
  0x84   : > { %5403 = dma.done.wait (%p7263_p11), [#allocation6], 9216   ;;  %p7264_p0 = pmov %p7263_p11 }
  0x85   : > { %v5181_v0 = vld [vmem:[#allocation7 + $0x40] sm:$0xff]   ;;  %v5182_v1 = vld [vmem:[#allocation7 + $0x48] sm:$0xff]   ;;  %v5183_v2 = vld [vmem:[#allocation7 + $0x50] sm:$0xff]   ;;  %vm626_vm0 = vsmask.f32 7424  ;;  %v7185_v8 = vmov 0  }
  0x86   : > { %5405 = vsyncadd (%p7264_p0), [#allocation6], 4294958080  ;;  %4501 = vmatprep.subr.bf16.mxu0 %v5181_v0  ;;  %5077 = vmatprep.subr.bf16.mxu1 %v5181_v0  ;;  %v5184_v3 = vld [vmem:[#allocation7 + $0x58] sm:$0xff]   ;;  %v314_v4 = vld [vmem:[%s5666_s5] sm:$0xf]  ;;  %vm1378_vm1 = vcmask 1046528  }
  0x87   : > { %4502 = vmatpush3.bf16.msra.mxu0 %v5181_v0  ;;  %5085 = vmatpush3.bf16.msra.mxu1 %v5181_v0  ;;  %v315_v5 = vld [vmem:[%s5666_s5 + $0x4] sm:$0xf]  ;;  %v316_v6 = vld [vmem:[%s5666_s5 + $0x8] sm:$0xf]  ;;  %v317_v7 = vld [vmem:[%s5666_s5 + $0xc] sm:$0xf]  ;;  %v362_v9 = vmax.bf16 %v7185_v8, %v314_v4 }
  0x88   : > { %4503 = vmatprep.subr.bf16.mxu0 %v5182_v1  ;;  %5078 = vmatprep.subr.bf16.mxu1 %v5182_v1  ;;  %v363_v10 = vmax.bf16 %v7185_v8, %v315_v5  ;;  %v364_v11 = vmax.bf16 %v7185_v8, %v316_v6  ;;  %v338_v12 = vld [vmem:[%s5666_s5 + $0x60] sm:$0xf]  ;;  %v339_v13 = vld [vmem:[%s5666_s5 + $0x64] sm:$0xf]  ;;  %v365_v14 = vmax.bf16 %v7185_v8, %v317_v7  ;;  %v340_v15 = vld [vmem:[%s5666_s5 + $0x68] sm:$0xf] }
  0x89   : > { %v341_v16 = vld [vmem:[%s5666_s5 + $0x6c] sm:$0xf]  ;;  %v386_v17 = vmax.bf16 %v7185_v8, %v338_v12  ;;  %v387_v18 = vmax.bf16 %v7185_v8, %v339_v13  ;;  %v318_v19 = vld [vmem:[%s5666_s5 + $0x10] sm:$0xf]  ;;  %v5185_v20 = vld [vmem:[#allocation7 + $0x60] sm:$0xff]   ;;  %v388_v22 = vmax.bf16 %v7185_v8, %v340_v15  ;;  %vm1758_vm3 = vcmask 1043456  }
  0x8a   : > { %v5699_v21 = vcombine.low %v362_v9, %v363_v10  ;;  %v389_v23 = vmax.bf16 %v7185_v8, %v341_v16  ;;  %v319_v24 = vld [vmem:[%s5666_s5 + $0x14] sm:$0xf]  ;;  %v342_v25 = vld [vmem:[%s5666_s5 + $0x70] sm:$0xf]  ;;  %v5705_v26 = vcombine.low %v364_v11, %v365_v14  ;;  %v366_v28 = vmax.bf16 %v7185_v8, %v318_v19  ;;  %v5186_v42 = vld [vmem:[#allocation7 + $0x68] sm:$0xff]   ;;  %s4105_s21 = sshll.u32 %s5662_s17, 8 }
  0x8b   : > { %4504 = vmatpush3.bf16.msra.mxu0 %v5182_v1  ;;  %5086 = vmatpush3.bf16.msra.mxu1 %v5182_v1  ;;  %v5707_v27 = vcombine.low %v386_v17, %v387_v18  ;;  %v343_v29 = vld [vmem:[%s5666_s5 + $0x74] sm:$0xf]  ;;  %v367_v33 = vmax.bf16 %v7185_v8, %v319_v24  ;;  %v390_v41 = vmax.bf16 %v7185_v8, %v342_v25  ;;  %v320_v47 = vld [vmem:[%s5666_s5 + $0x18] sm:$0xf]  ;;  %v321_v51 = vld [vmem:[%s5666_s5 + $0x1c] sm:$0xf] }
  0x8c   : > { %4505 = vmatprep.subr.bf16.mxu0 %v5183_v2  ;;  %5079 = vmatprep.subr.bf16.mxu1 %v5183_v2  ;;  %v628_v30 = vshrl.u32 %v5699_v21, 16  ;;  %v630_v31 = vshll.u32 %v5699_v21, 16  ;;  %v5713_v32 = vcombine.low %v388_v22, %v389_v23  ;;  %v7175_v34 = vshll.u32 %v5705_v26, 16  ;;  %v344_v53 = vld [vmem:[%s5666_s5 + $0x78] sm:$0xf]  ;;  %s6989_s7 = scalar_lea.vmem [#allocation8], %s4105_s21 }
  0x8d   : > { %v7159_v35 = vshll.u32 %v5707_v27, 16  ;;  %v7160_v36 = vshrl.u32 %v5707_v27, 16  ;;  %v7182_v37 = vshrl.u32 %v5705_v26, 16  ;;  %v5721_v40 = vcombine.low %v366_v28, %v367_v33  ;;  %v345_v57 = vld [vmem:[%s5666_s5 + $0x7c] sm:$0xf]  ;;  %s4212_s12 = sshll.u32 %s5424_s18, 12 }
  0x8e   : > { %v632_v38 = vrot.slane %v630_v31, 1  ;;  %v7157_v39 = vshll.u32 %v5713_v32, 16  ;;  %v637_v43 = vrot.slane %v7175_v34, 1  ;;  %v391_v45 = vmax.bf16 %v7185_v8, %v343_v29  ;;  %v322_v58 = vld [vmem:[%s5666_s5 + $0x20] sm:$0xf]  ;;  %v5188_v17 = vld [vmem:[#allocation7 + $0x78] sm:$0xff]   ;;  %s7085_s14 = scalar_lea.hbm %s7142_s4, %s4212_s12 }
  0x8f   : > { %4506 = vmatpush3.bf16.msra.mxu0 %v5183_v2  ;;  %5087 = vmatpush3.bf16.msra.mxu1 %v5183_v2  ;;  %v5728_v44 = vrot.slane %v7159_v35, 1  ;;  %v7158_v46 = vshrl.u32 %v5713_v32, 16  ;;  %v7173_v50 = vshll.u32 %v5721_v40, 16  ;;  %v368_v52 = vmax.bf16 %v7185_v8, %v320_v47  ;;  %v323_v59 = vld [vmem:[%s5666_s5 + $0x24] sm:$0xf]  ;;  %v5187_v2 = vld [vmem:[#allocation7 + $0x70] sm:$0xff]  }
  0x90   : > { %4507 = vmatprep.subr.bf16.mxu0 %v5184_v3  ;;  %5080 = vmatprep.subr.bf16.mxu1 %v5184_v3  ;;  %v633_v48 = vor.u32 %v632_v38, %v628_v30  ;;  %v733_v49 = vrot.slane %v7157_v39, 1  ;;  %v5742_v55 = vcombine.low %v390_v41, %v391_v45  ;;  %v369_v56 = vmax.bf16 %v7185_v8, %v321_v51  ;;  %v346_v0 = vld [vmem:[%s5666_s5 + $0x80] sm:$0xf]  ;;  %v347_v1 = vld [vmem:[%s5666_s5 + $0x84] sm:$0xf]  ;;  %s3973_s9 = sshll.u32 %s6989_s7, 4  ;;  %s7087_s9 = int_to_ptr.vmem [resolvable:$true] %s3973_s9 }
  0x91   : > { %v729_v54 = vor.u32 %v7160_v36, %v5728_v44  ;;  %v641_v61 = vor.u32 %v7182_v37, %v637_v43  ;;  %v645_v62 = vrot.slane %v7173_v50, 1  ;;  %v7174_v63 = vshrl.u32 %v5721_v40, 16  ;;  %v324_v16 = vld [vmem:[%s5666_s5 + $0x28] sm:$0xf]  ;;  %v325_v23 = vld [vmem:[%s5666_s5 + $0x2c] sm:$0xf] }
  0x92   : > { %v638_v60 = vsel %vm626_vm0, %v633_v48, %v637_v43  ;;  %v7155_v4 = vshll.u32 %v5742_v55, 16  ;;  %v5760_v5 = vcombine.low %v368_v52, %v369_v56  ;;  %v392_v6 = vmax.bf16 %v7185_v8, %v344_v53  ;;  %v348_v30 = vld [vmem:[%s5666_s5 + $0x88] sm:$0xf]  ;;  %v349_v31 = vld [vmem:[%s5666_s5 + $0x8c] sm:$0xf]  ;;  %v5189_v47 = vld [vmem:[#allocation7] sm:$0xff]  }
  0x93   : > { %4508 = vmatpush3.bf16.msra.mxu0 %v5184_v3  ;;  %5088 = vmatpush3.bf16.msra.mxu1 %v5184_v3  ;;  %v5757_v3 = vsel %vm626_vm0, %v729_v54, %v733_v49  ;;  %v393_v7 = vmax.bf16 %v7185_v8, %v345_v57  ;;  %v7156_v10 = vshrl.u32 %v5742_v55, 16  ;;  %v370_v11 = vmax.bf16 %v7185_v8, %v322_v58  ;;  %v326_v43 = vld [vmem:[%s5666_s5 + $0x30] sm:$0xf]  ;;  %v327_v45 = vld [vmem:[%s5666_s5 + $0x34] sm:$0xf]  ;;  %v5190_v54 = vld [vmem:[#allocation7 + $0x80] sm:$0xff]  }
  0x94   : > { %4509 = vmatprep.subr.bf16.mxu0 %v5185_v20  ;;  %5081 = vmatprep.subr.bf16.mxu1 %v5185_v20  ;;  %7265 = vst [vmem:[#allocation16_spill] sm:$0xff] %v5757_v3  ;;  %v651_v9 = vshll.u32 %v5760_v5, 16  ;;  %v371_v12 = vmax.bf16 %v7185_v8, %v323_v59  ;;  %v394_v14 = vmax.bf16 %v7185_v8, %v346_v0  ;;  %v7189_v38 = vshrl.u32 %v5760_v5, 16  ;;  %v5191_v0 = vld [vmem:[#allocation7 + $0x8] sm:$0xff]   ;;  %v360_v34 = vld [vmem:[%s5666_s5 + $0xb8] sm:$0xf] }
  0x95   : > { %4517 = vmatprep.mubr.bf16.mxu0 %v638_v60  ;;  %4541 = vmatprep.mubr.bf16.mxu1 %v5757_v3  ;;  %v5769_v13 = vcombine.low %v392_v6, %v393_v7  ;;  %v395_v15 = vmax.bf16 %v7185_v8, %v347_v1  ;;  %v646_v18 = vsel %vm626_vm0, %v641_v61, %v645_v62  ;;  %v333_v39 = vld [vmem:[%s5666_s5 + $0x4c] sm:$0xf]  ;;  %vm2138_vm2 = vsmask.f32 3328  ;;  %s3957_s0 = scalar_lea.sflag [#allocation4], %s5662_s17  ;;  %s5342_s18 = scalar_lea.vmem %s7087_s9, 4096 }
  0x96   : > { %v737_v19 = vor.u32 %v7158_v46, %v733_v49  ;;  %v649_v22 = vor.u32 %v7174_v63, %v645_v62  ;;  %v653_v24 = vrot.slane %v651_v9, 1  ;;  %v5785_v28 = vcombine.low %v370_v11, %v371_v12  ;;  %v350_v11 = vld [vmem:[%s5666_s5 + $0x90] sm:$0xf]  ;;  %v351_v12 = vld [vmem:[%s5666_s5 + $0x94] sm:$0xf]  ;;  %v5200_v63 = vld [vmem:[#allocation7 + $0xa8] sm:$0xff]   ;;  %p5343_p5 = scmp.ne.s32.totalorder %s7087_s9, %s5342_s18 }
  0x97   : > { %4510 = vmatpush3.bf16.msra.mxu0 %v5185_v20  ;;  %5089 = vmatpush3.bf16.msra.mxu1 %v5185_v20  ;;  %v741_v20 = vrot.slane %v7155_v4, 1  ;;  %v7153_v25 = vshll.u32 %v5769_v13, 16  ;;  %v5787_v29 = vcombine.low %v394_v14, %v395_v15  ;;  %v7154_v41 = vshrl.u32 %v5769_v13, 16  ;;  %v356_v46 = vld [vmem:[%s5666_s5 + $0xa8] sm:$0xf]  ;;  %s5440_s29 = smov [#allocation8]  }
  0x98   : > { %4511 = vmatprep.subr.bf16.mxu0 %v5186_v42  ;;  %5082 = vmatprep.subr.bf16.mxu1 %v5186_v42  ;;  %v7171_v49 = vshll.u32 %v5785_v28, 16  ;;  %v373_v52 = vmax.bf16 %v7185_v8, %v325_v23  ;;  %v7172_v56 = vshrl.u32 %v5785_v28, 16  ;;  %v396_v57 = vmax.bf16 %v7185_v8, %v348_v30  ;;  %p5344_p9 = pnand %p5343_p5, %p5559_p10  ;;  %s5346_s27 = sshll.u32 %s5440_s29, 4  ;;  %s5347_s27 = int_to_ptr.vmem [resolvable:$false] %s5346_s27 }
  0x99   : > { %v745_v33 = vor.u32 %v7156_v10, %v741_v20  ;;  %v749_v48 = vrot.slane %v7153_v25, 1  ;;  %v7151_v51 = vshll.u32 %v5787_v29, 16  ;;  %v5804_v53 = vsel %vm626_vm0, %v737_v19, %v741_v20  ;;  %v328_v19 = vld [vmem:[%s5666_s5 + $0x38] sm:$0xf]  ;;  %v329_v20 = vld [vmem:[%s5666_s5 + $0x3c] sm:$0xf]  ;;  %p5349_p2 = scmp.lt.s32.totalorder %s7087_s9, %s5347_s27 }
  0x9a   : > { %7266 = vst [vmem:[#allocation17_spill] sm:$0xff] %v5804_v53  ;;  %v397_v58 = vmax.bf16 %v7185_v8, %v349_v31  ;;  %v654_v59 = vsel %vm626_vm0, %v649_v22, %v653_v24  ;;  %v661_v60 = vrot.slane %v7171_v49, 1  ;;  %v7152_v62 = vshrl.u32 %v5787_v29, 16  ;;  %v352_v22 = vld [vmem:[%s5666_s5 + $0x98] sm:$0xf]  ;;  %p5345_p1 = pneg %p5344_p9  ;;  %s5348_s26 = scalar_lea.vmem %s5347_s27, 8192 }
  0x9b   : > { %4512 = vmatpush3.bf16.msra.mxu0 %v5186_v42  ;;  %5090 = vmatpush3.bf16.msra.mxu1 %v5186_v42  ;;  %v372_v42 = vmax.bf16 %v7185_v8, %v324_v16  ;;  %v757_v61 = vrot.slane %v7151_v51, 1  ;;  %v374_v6 = vmax.bf16 %v7185_v8, %v326_v43  ;;  %v375_v7 = vmax.bf16 %v7185_v8, %v327_v45  ;;  %p5350_p7 = scmp.lt.s32.totalorder %s5348_s26, %s5342_s18 }
  0x9c   : > { %4513 = vmatprep.subr.bf16.mxu0 %v5187_v2  ;;  %5083 = vmatprep.subr.bf16.mxu1 %v5187_v2  ;;  %v5824_v14 = vsel %vm626_vm0, %v745_v33, %v749_v48  ;;  %v657_v15 = vor.u32 %v7189_v38, %v653_v24  ;;  %v753_v16 = vor.u32 %v7154_v41, %v749_v48  ;;  %v353_v33 = vld [vmem:[%s5666_s5 + $0x9c] sm:$0xf]  ;;  %vm2575_vm4 = vcmask 1042432  }
  0x9d   : > { %v5815_v1 = vcombine.low %v372_v42, %v373_v52  ;;  %7267 = vst [vmem:[#allocation18_spill] sm:$0xff] %v5824_v14  ;;  %v665_v23 = vor.u32 %v7172_v56, %v661_v60  ;;  %v5837_v31 = vcombine.low %v374_v6, %v375_v7  ;;  %v5192_v42 = vld [vmem:[#allocation7 + $0x88] sm:$0xff]   ;;  %v761_v24 = vor.u32 %v7152_v62, %v757_v61  ;;  %v5193_v52 = vld [vmem:[#allocation7 + $0x10] sm:$0xff]   ;;  %v330_v62 = vld [vmem:[%s5666_s5 + $0x40] sm:$0xf]  ;;  %p5351_p4 = por %p5350_p7, %p5349_p2 }
  0x9e   : > { %v398_v45 = vmax.bf16 %v7185_v8, %v350_v11  ;;  %v399_v48 = vmax.bf16 %v7185_v8, %v351_v12  ;;  %v376_v11 = vmax.bf16 %v7185_v8, %v328_v19  ;;  %v377_v12 = vmax.bf16 %v7185_v8, %v329_v20  ;;  %v331_v19 = vld [vmem:[%s5666_s5 + $0x44] sm:$0xf]  ;;  %v5199_v56 = vld [vmem:[#allocation7 + $0x28] sm:$0xff]  }
  0x9f   : > { %4514 = vmatpush3.bf16.msra.mxu0 %v5187_v2  ;;  %5091 = vmatpush3.bf16.msra.mxu1 %v5187_v2  ;;  %v5817_v2 = vcombine.low %v396_v57, %v397_v58  ;;  %v7166_v30 = vshll.u32 %v5815_v1, 16  ;;  %v7170_v43 = vshrl.u32 %v5815_v1, 16  ;;  %v5846_v57 = vld [vmem:[#allocation7 + $0x90] sm:$0xff]   ;;  %v7164_v7 = vshll.u32 %v5837_v31, 16  ;;  %p5352_p8 = pnand %p5351_p4, %p5345_p1 }
  0xa0   : > { %4515 = vmatprep.subr.bf16.mxu0 %v5188_v17  ;;  %5084 = vmatprep.subr.bf16.mxu1 %v5188_v17  ;;  %v400_v51 = vmax.bf16 %v7185_v8, %v352_v22  ;;  %v5860_v25 = vsel %vm626_vm0, %v657_v15, %v661_v60  ;;  %v5863_v41 = vsel %vm626_vm0, %v753_v16, %v757_v61  ;;  %v355_v15 = vld [vmem:[%s5666_s5 + $0xa4] sm:$0xf]  ;;  %v332_v16 = vld [vmem:[%s5666_s5 + $0x48] sm:$0xf] }
  0xa1   : > { %v669_v58 = vrot.slane %v7166_v30, 1  ;;  %7268 = vst [vmem:[#allocation19_spill] sm:$0xff] %v5863_v41  ;;  %v5874_v60 = vcombine.low %v376_v11, %v377_v12  ;;  %v401_v61 = vmax.bf16 %v7185_v8, %v353_v33  ;;  %v378_v4 = vmax.bf16 %v7185_v8, %v330_v62  ;;  %v5195_v11 = vld [vmem:[#allocation7 + $0x18] sm:$0xff]   ;;  %v335_v30 = vld [vmem:[%s5666_s5 + $0x54] sm:$0xf] }
  0xa2   : > { %v383_v50 = vmax.bf16 %v7185_v8, %v335_v30 }
  0xa3   : > { %4516 = vmatpush3.bf16.msra.mxu0 %v5188_v17  ;;  %5092 = vmatpush3.bf16.msra.mxu1 %v5188_v17  ;;  %v7162_v17 = vshll.u32 %v5817_v2, 16  ;;  %v5871_v20 = vsel %vm626_vm0, %v665_v23, %v669_v58  ;;  %v677_v23 = vrot.slane %v7164_v7, 1  ;;  %v7169_v12 = vshll.u32 %v5874_v60, 16 }
  0xa4   : > { %4565 = vmatprep.subr.bf16.mxu1 %v5189_v47  ;;  %4629 = vmatprep.subr.bf16.mxu0 %v5190_v54  ;;  %7269 = vst [vmem:[#allocation20_spill] sm:$0xff] %v5871_v20  ;;  %v5888_v33 = vcombine.low %v400_v51, %v401_v61  ;;  %v380_v51 = vmax.bf16 %v7185_v8, %v332_v16  ;;  %v357_v61 = vld [vmem:[%s5666_s5 + $0xac] sm:$0xf] }
  0xa5   : > { %v765_v6 = vrot.slane %v7162_v17, 1  ;;  %v404_v7 = vmax.bf16 %v7185_v8, %v356_v46  ;;  %v358_v46 = vld [vmem:[%s5666_s5 + $0xb0] sm:$0xf] }
  0xa6   : > { %4518 = vmatmul.mubr.bf16.vlgmr.msra.gmra.mrb[0].mxu0 %v646_v18  ;;  %4542 = vmatmul.mubr.bf16.vlgmr.msra.gmra.mrb[0].mxu1 %v5804_v53  ;;  %v5854_v18 = vcombine.low %v398_v45, %v399_v48  ;;  %v354_v45 = vld [vmem:[%s5666_s5 + $0xa0] sm:$0xf]  ;;  %v673_v48 = vor.u32 %v7170_v43, %v669_v58  ;;  %v403_v58 = vmax.bf16 %v7185_v8, %v355_v15  ;;  %v7168_v36 = vshll.u32 %v5888_v33, 16  ;;  %v359_v43 = vld [vmem:[%s5666_s5 + $0xb4] sm:$0xf] }
  0xa7   : > { %4566 = vmatpush3.bf16.msra.mxu1 %v5189_v47  ;;  %4630 = vmatpush3.bf16.msra.mxu0 %v5190_v54  ;;  %v7163_v47 = vshrl.u32 %v5817_v2, 16  ;;  %v7165_v54 = vshrl.u32 %v5837_v31, 16  ;;  %v5880_v22 = vsel %vm626_vm0, %v761_v24, %v765_v6  ;;  %v379_v24 = vmax.bf16 %v7185_v8, %v331_v19 }
  0xa8   : > { %4567 = vmatprep.subr.bf16.mxu1 %v5191_v0  ;;  %4521 = vmatprep.mubr.bf16.mxu0 %v654_v59  ;;  %v7161_v59 = vshll.u32 %v5854_v18, 16  ;;  %7270 = vst [vmem:[#allocation21_spill] sm:$0xff] %v5880_v22  ;;  %v7167_v10 = vshrl.u32 %v5854_v18, 16 }
  0xa9   : > { %4545 = vmatprep.mubr.bf16.mxu1 %v5824_v14  ;;  %4631 = vmatprep.subr.bf16.mxu0 %v5192_v42  ;;  %v769_v19 = vor.u32 %v7163_v47, %v765_v6  ;;  %v681_v35 = vor.u32 %v7165_v54, %v677_v23  ;;  %v5911_v15 = vcombine.low %v378_v4, %v379_v24  ;;  %v7178_v47 = vshrl.u32 %v5888_v33, 16  ;;  %v334_v54 = vld [vmem:[%s5666_s5 + $0x50] sm:$0xf]  ;;  %v5197_v24 = vld [vmem:[#allocation7 + $0x20] sm:$0xff]  }
  0xaa   : > { %v773_v62 = vrot.slane %v7161_v59, 1  ;;  %v7181_v59 = vshrl.u32 %v5874_v60, 16  ;;  %v381_v6 = vmax.bf16 %v7185_v8, %v333_v39  ;;  %v781_v39 = vrot.slane %v7168_v36, 1 }
  0xab   : > { %4568 = vmatpush3.bf16.msra.mxu1 %v5191_v0  ;;  %4632 = vmatpush3.bf16.msra.mxu0 %v5192_v42  ;;  %v5196_v0 = vld [vmem:[#allocation7 + $0x98] sm:$0xff]   ;;  %v402_v42 = vmax.bf16 %v7185_v8, %v354_v45  ;;  %v685_v45 = vrot.slane %v7169_v12, 1  ;;  %v7176_v4 = vshll.u32 %v5911_v15, 16  ;;  %v7180_v36 = vshrl.u32 %v5911_v15, 16 }
  0xac   : > { %4569 = vmatprep.subr.bf16.mxu1 %v5193_v52  ;;  %4633 = vmatprep.subr.bf16.mxu0 %v5846_v57  ;;  %v777_v17 = vor.u32 %v7167_v10, %v773_v62  ;;  %v5936_v10 = vsel %vm626_vm0, %v769_v19, %v773_v62  ;;  %v405_v12 = vmax.bf16 %v7185_v8, %v357_v61  ;;  %v336_v19 = vld [vmem:[%s5666_s5 + $0x58] sm:$0xf]  ;;  %v7312_v14 = vshrl.u32 %v5817_v2, 16 }
  0xad   : > { %v5913_v16 = vcombine.low %v402_v42, %v403_v58  ;;  %v5929_v42 = vcombine.low %v380_v51, %v381_v6  ;;  %v5933_v58 = vsel %vm626_vm0, %v673_v48, %v677_v23  ;;  %7272 = vst [vmem:[#allocation23_spill] sm:$0xff] %v5936_v10  ;;  %v5942_v51 = vsel %vm626_vm0, %v681_v35, %v685_v45  ;;  %v337_v6 = vld [vmem:[%s5666_s5 + $0x5c] sm:$0xf] }
  0xae   : > { %4522 = vmatmul.mubr.bf16.gmra.mrb[4].mxu0 %v5860_v25  ;;  %4546 = vmatmul.mubr.bf16.gmra.mrb[4].mxu1 %v5863_v41  ;;  %7271 = vst [vmem:[#allocation22_spill] sm:$0xff] %v5933_v58  ;;  %7273 = vst [vmem:[#allocation24_spill] sm:$0xff] %v5942_v51  ;;  %v689_v48 = vor.u32 %v7181_v59, %v685_v45  ;;  %v382_v62 = vmax.bf16 %v7185_v8, %v334_v54  ;;  %v693_v49 = vrot.slane %v7176_v4, 1  ;;  %v361_v45 = vld [vmem:[%s5666_s5 + $0xbc] sm:$0xf] }
  0xaf   : > { %4570 = vmatpush3.bf16.msra.mxu1 %v5193_v52  ;;  %4525 = vmatprep.mubr.bf16.mxu0 %v5871_v20  ;;  %v7177_v52 = vshll.u32 %v5913_v16, 16  ;;  %v7179_v23 = vshll.u32 %v5929_v42, 16  ;;  %v5952_v61 = vcombine.low %v404_v7, %v405_v12  ;;  %v406_v35 = vmax.bf16 %v7185_v8, %v358_v46 }
  0xb0   : > { %4549 = vmatprep.mubr.bf16.mxu1 %v5880_v22  ;;  %4634 = vmatpush3.bf16.msra.mxu0 %v5846_v57  ;;  %v5198_v57 = vld [vmem:[#allocation7 + $0xa0] sm:$0xff]   ;;  %v5959_v54 = vsel %vm626_vm0, %v777_v17, %v781_v39  ;;  %v7184_v30 = vshrl.u32 %v5913_v16, 16  ;;  %v697_v7 = vor.u32 %v7180_v36, %v693_v49  ;;  %v384_v46 = vmax.bf16 %v7185_v8, %v336_v19 }
  0xb1   : > { %4571 = vmatprep.subr.bf16.mxu1 %v5195_v11  ;;  %4635 = vmatprep.subr.bf16.mxu0 %v5196_v0  ;;  %7274 = vst [vmem:[#allocation25_spill] sm:$0xff] %v5959_v54  ;;  %v789_v4 = vrot.slane %v7177_v52, 1  ;;  %v701_v12 = vrot.slane %v7179_v23, 1  ;;  %v7183_v17 = vshll.u32 %v5952_v61, 16  ;;  %v410_v52 = vld [vmem:[%s5674_s6] sm:$0xf]  ;;  %v385_v23 = vmax.bf16 %v7185_v8, %v337_v6 }
  0xb2   : > { %v411_v36 = vld [vmem:[%s5674_s6 + $0x4] sm:$0xf]  ;;  %v408_v19 = vmax.bf16 %v7185_v8, %v360_v34  ;;  %v409_v59 = vmax.bf16 %v7185_v8, %v361_v45  ;;  %v5991_v37 = vsel %vm626_vm0, %v689_v48, %v693_v49  ;;  %v7190_v49 = vshrl.u32 %v5952_v61, 16 }
  0xb3   : > { %4572 = vmatpush3.bf16.msra.mxu1 %v5195_v11  ;;  %v785_v11 = vor.u32 %v7178_v47, %v781_v39  ;;  %v5974_v39 = vcombine.low %v382_v62, %v383_v50  ;;  %v797_v50 = vrot.slane %v7183_v17, 1  ;;  %v5201_v62 = vld [vmem:[#allocation7 + $0x30] sm:$0xff]   ;;  %7275 = vst [vmem:[#allocation26_spill] sm:$0xff] %v5991_v37  ;;  %v6002_v17 = vcombine.low %v384_v46, %v385_v23  ;;  %v5203_v46 = vld [vmem:[#allocation7 + $0x38] sm:$0xff]  }
  0xb4   : > { %4636 = vmatpush3.bf16.msra.mxu0 %v5196_v0  ;;  %4573 = vmatprep.subr.bf16.mxu1 %v5197_v24  ;;  %v407_v0 = vmax.bf16 %v7185_v8, %v359_v43  ;;  %v793_v43 = vor.u32 %v7184_v30, %v789_v4  ;;  %v5202_v6 = vld [vmem:[#allocation7 + $0xb0] sm:$0xff]   ;;  %v6004_v45 = vcombine.low %v408_v19, %v409_v59  ;;  %v5204_v19 = vld [vmem:[#allocation7 + $0xb8] sm:$0xff]   ;;  %v2202_v53 = vrot.slane %v7312_v14, 4 }
  0xb5   : > { %4637 = vmatprep.subr.bf16.mxu0 %v5198_v57  ;;  %v418_v48 = vmax.bf16 %v7185_v8, %v410_v52  ;;  %v7192_v30 = vshll.u32 %v6002_v17, 16  ;;  %v801_v52 = vor.u32 %v7190_v49, %v797_v50  ;;  %v1400_v14 = vrot.slane %v6002_v17, 1 }
  0xb6   : > { %4526 = vmatmul.mubr.bf16.gmra.mrb[8].mxu0 %v5933_v58  ;;  %4550 = vmatmul.mubr.bf16.gmra.mrb[8].mxu1 %v5936_v10  ;;  %v5980_v47 = vcombine.low %v406_v35, %v407_v0  ;;  %v5994_v35 = vsel %vm626_vm0, %v785_v11, %v789_v4  ;;  %v7187_v0 = vshll.u32 %v5974_v39, 16  ;;  %v7197_v4 = vshrl.u32 %v5974_v39, 16  ;;  %v5209_v10 = vld [vmem:[#allocation7 + $0xd0] sm:$0xff]  }
  0xb7   : > { %4529 = vmatprep.mubr.bf16.mxu0 %v5942_v51  ;;  %4553 = vmatprep.mubr.bf16.mxu1 %v5959_v54  ;;  %7276 = vst [vmem:[#allocation27_spill] sm:$0xff] %v5994_v35  ;;  %v419_v11 = vmax.bf16 %v7185_v8, %v411_v36  ;;  %v7194_v59 = vshll.u32 %v6004_v45, 16  ;;  %v6030_v8 = vld [vmem:[#allocation7 + $0xc0] sm:$0xff]   ;;  %v7195_v49 = vshrl.u32 %v6004_v45, 16 }
  0xb8   : > { %4574 = vmatpush3.bf16.msra.mxu1 %v5197_v24  ;;  %4638 = vmatpush3.bf16.msra.mxu0 %v5198_v57  ;;  %v5997_v24 = vsel %vm626_vm0, %v697_v7, %v701_v12  ;;  %v7198_v57 = vshrl.u32 %v5929_v42, 16  ;;  %v7188_v34 = vshll.u32 %v5980_v47, 16  ;;  %v6011_v7 = vsel %vm626_vm0, %v793_v43, %v797_v50  ;;  %v6040_v50 = vld [vmem:[#allocation7 + $0x100] sm:$0xff]  }
  0xb9   : > { %4575 = vmatprep.subr.bf16.mxu1 %v5199_v56  ;;  %7277 = vst [vmem:[#allocation28_spill] sm:$0xff] %v5997_v24  ;;  %4639 = vmatprep.subr.bf16.mxu0 %v5200_v63  ;;  %7278 = vst [vmem:[#allocation29_spill] sm:$0xff] %v6011_v7  ;;  %v7191_v23 = vshrl.u32 %v5980_v47, 16  ;;  %v709_v36 = vrot.slane %v7187_v0, 1  ;;  %v6028_v43 = vcombine.low %v418_v48, %v419_v11  ;;  %v7196_v48 = vshrl.u32 %v6002_v17, 16 }
  0xbb   : > { %v713_v0 = vor.u32 %v7197_v4, %v709_v36 }
  0xbc   : > { %4576 = vmatpush3.bf16.msra.mxu1 %v5199_v56  ;;  %4640 = vmatpush3.bf16.msra.mxu0 %v5200_v63  ;;  %v805_v63 = vrot.slane %v7188_v34, 1  ;;  %v705_v56 = vor.u32 %v7198_v57, %v701_v12  ;;  %v717_v34 = vrot.slane %v7192_v30, 1  ;;  %v813_v12 = vrot.slane %v7194_v59, 1 }
  0xbd   : > { %4577 = vmatprep.subr.bf16.mxu1 %v5201_v62  ;;  %4641 = vmatprep.subr.bf16.mxu0 %v5202_v6  ;;  %v7287_v59 = vshrl.u32 %v5705_v26, 16 }
  0xbe   : > { %4530 = vmatmul.mubr.bf16.gmra.mrb[12].mxu0 %v5991_v37  ;;  %4554 = vmatmul.mubr.bf16.gmra.mrb[12].mxu1 %v5994_v35  ;;  %v809_v38 = vor.u32 %v7191_v23, %v805_v63  ;;  %v6047_v11 = vsel %vm626_vm0, %v801_v52, %v805_v63  ;;  %v7193_v23 = vshll.u32 %v6028_v43, 16  ;;  %v6052_v30 = vsel %vm626_vm0, %v713_v0, %v717_v34 }
  0xbf   : > { %4533 = vmatprep.mubr.bf16.mxu0 %v5997_v24  ;;  %4557 = vmatprep.mubr.bf16.mxu1 %v6011_v7  ;;  %7280 = vst [vmem:[#allocation31_spill] sm:$0xff] %v6047_v11  ;;  %7281 = vst [vmem:[#allocation32_spill] sm:$0xff] %v6052_v30  ;;  %v721_v0 = vor.u32 %v7196_v48, %v717_v34  ;;  %v2147_v63 = vrot.slane %v651_v9, 5  ;;  %v7288_v48 = vshll.u32 %v5705_v26, 16  ;;  %v7289_v9 = vshrl.u32 %v5721_v40, 16 }
  0xc0   : > { %4578 = vmatpush3.bf16.msra.mxu1 %v5201_v62  ;;  %4642 = vmatpush3.bf16.msra.mxu0 %v5202_v6  ;;  %v6044_v62 = vsel %vm626_vm0, %v705_v56, %v709_v36  ;;  %v6055_v6 = vsel %vm626_vm0, %v809_v38, %v813_v12  ;;  %v817_v38 = vor.u32 %v7195_v49, %v813_v12  ;;  %v1380_v36 = vrot.slane %v5705_v26, 1 }
  0xc1   : > { %4579 = vmatprep.subr.bf16.mxu1 %v5203_v46  ;;  %4643 = vmatprep.subr.bf16.mxu0 %v5204_v19  ;;  %7279 = vst [vmem:[#allocation30_spill] sm:$0xff] %v6044_v62  ;;  %7282 = vst [vmem:[#allocation33_spill] sm:$0xff] %v6055_v6  ;;  %v7284_v56 = vshrl.u32 %v5760_v5, 16  ;;  %v6079_v34 = vsel %vm626_vm0, %v721_v0, %v5728_v44  ;;  %v2139_v49 = vrot.slane %v7287_v59, 4  ;;  %v2140_v4 = vrot.slane %v7288_v48, 5 }
  0xc2   : > { %7285 = vst [vmem:[#allocation35_spill] sm:$0xff] %v6079_v34  ;;  %v2142_v57 = vrot.slane %v7289_v9, 4  ;;  %v1382_v44 = vrot.slane %v5721_v40, 1  ;;  %v7290_v0 = vshll.u32 %v5721_v40, 16  ;;  %v7291_v48 = vshrl.u32 %v5785_v28, 16 }
  0xc3   : > { %v2146_v52 = vrot.slane %v7284_v56, 4  ;;  %v2141_v59 = vor.u32 %v2140_v4, %v2139_v49  ;;  %v7292_v9 = vshll.u32 %v5785_v28, 16  ;;  %v7295_v4 = vshrl.u32 %v5837_v31, 16 }
  0xc4   : > { %4580 = vmatpush3.bf16.msra.mxu1 %v5203_v46  ;;  %4644 = vmatpush3.bf16.msra.mxu0 %v5204_v19  ;;  %v6069_v46 = vrot.slane %v7193_v23, 1  ;;  %v1379_v19 = vrot.slane %v5699_v21, 1 }
  0xc5   : > { %4693 = vmatprep.subr.bf16.mxu1 %v6030_v8  ;;  %4757 = vmatprep.subr.bf16.mxu0 %v6040_v50  ;;  %v2148_v56 = vor.u32 %v2147_v63, %v2146_v52  ;;  %v7294_v63 = vshll.u32 %v5815_v1, 16 }
  0xc6   : > { %4534 = vmatmul.mubr.bf16.gmra.mrb[16].mxu0 %v6044_v62  ;;  %4558 = vmatmul.mubr.bf16.gmra.mrb[16].mxu1 %v6047_v11  ;;  %7283 = vst [vmem:[#allocation34_spill] sm:$0xff] %v6069_v46  ;;  %v6083_v12 = vsel %vm626_vm0, %v817_v38, %v6069_v46  ;;  %v1381_v23 = vsel %vm1378_vm1, %v1379_v19, %v1380_v36  ;;  %v2143_v38 = vrot.slane %v7290_v0, 5  ;;  %v2150_v19 = vrot.slane %v7291_v48, 4 }
  0xc7   : > { %4537 = vmatprep.mubr.bf16.mxu0 %v6052_v30  ;;  %4561 = vmatprep.mubr.bf16.mxu1 %v6055_v6  ;;  %7286 = vst [vmem:[#allocation36_spill] sm:$0xff] %v6083_v12  ;;  %v2151_v46 = vrot.slane %v7292_v9, 5  ;;  %v1384_v6 = vrot.slane %v5760_v5, 1  ;;  %v7293_v11 = vshrl.u32 %v5815_v1, 16  ;;  %v2155_v52 = vrot.slane %v7294_v63, 5 }
  0xc8   : > { %v1383_v0 = vsel %vm1378_vm1, %v1380_v36, %v1382_v44  ;;  %v7297_v9 = vshrl.u32 %v5874_v60, 16  ;;  %v7298_v63 = vshll.u32 %v5874_v60, 16 }
  0xc9   : > { %v2154_v7 = vrot.slane %v7293_v11, 4  ;;  %v2152_v35 = vor.u32 %v2151_v46, %v2150_v19  ;;  %v7296_v11 = vshll.u32 %v5837_v31, 16  ;;  %v1385_v48 = vsel %vm1378_vm1, %v1382_v44, %v1384_v6  ;;  %v5207_v19 = vld [vmem:[#allocation7 + $0xc8] sm:$0xff]  }
  0xca   : > { %v2163_v54 = vrot.slane %v7298_v63, 5  ;;  %v1386_v44 = vrot.slane %v5785_v28, 1 }
  0xcb   : > { %v2159_v46 = vrot.slane %v7296_v11, 5 }
  0xce   : > { %4538 = vmatmul.mubr.bf16.gmra.mrb[20].mxu0 %v6079_v34  ;;  %4562 = vmatmul.mubr.bf16.gmra.mrb[20].mxu1 %v6083_v12  ;;  %v2144_v12 = vor.u32 %v2143_v38, %v2142_v57  ;;  %v6117_v57 = vsel %vm2138_vm2, %v2148_v56, %v2152_v35  ;;  %v2156_v38 = vor.u32 %v2155_v52, %v2154_v7  ;;  %v7300_v52 = vshll.u32 %v5911_v15, 16  ;;  %v6218_v34 = vld [vmem:[#allocation7 + $0x180] sm:$0xff]  }
  0xcf   : > { %4581 = vmatprep.mubr.bf16.mxu1 %v5699_v21  ;;  %4645 = vmatprep.mubr.bf16.mxu0 %v1381_v23  ;;  %v2158_v23 = vrot.slane %v7295_v4, 4 }
  0xd0   : > { %v6108_v21 = vsel %vm2138_vm2, %v2141_v59, %v2144_v12  ;;  %v6111_v49 = vsel %vm2138_vm2, %v2144_v12, %v2148_v56  ;;  %v5208_v59 = vld [vmem:[#allocation7 + $0x108] sm:$0xff]   ;;  %v2162_v12 = vrot.slane %v7297_v9, 4  ;;  %v6127_v4 = vsel %vm2138_vm2, %v2152_v35, %v2156_v38  ;;  %v5210_v9 = vld [vmem:[#allocation7 + $0x110] sm:$0xff]  }
  0xd1   : > { %v2160_v36 = vor.u32 %v2159_v46, %v2158_v23  ;;  %v7299_v56 = vshrl.u32 %v5911_v15, 16  ;;  %v2167_v11 = vrot.slane %v7300_v52, 5  ;;  %v7301_v46 = vshrl.u32 %v5929_v42, 16 }
  0xd2   : > { %v2164_v22 = vor.u32 %v2163_v54, %v2162_v12 }
  0xd3   : > { %v2166_v7 = vrot.slane %v7299_v56, 4  ;;  %v6138_v35 = vsel %vm2138_vm2, %v2156_v38, %v2160_v36  ;;  %v2170_v63 = vrot.slane %v7301_v46, 4  ;;  %v7302_v56 = vshll.u32 %v5929_v42, 16 }
  0xd4   : > { %v6147_v54 = vsel %vm2138_vm2, %v2160_v36, %v2164_v22  ;;  %v7305_v46 = vshrl.u32 %v6002_v17, 16  ;;  %v6161_v36 = vsel %vm1378_vm1, %v1384_v6, %v1386_v44 }
  0xd5   : > { %v2168_v23 = vor.u32 %v2167_v11, %v2166_v7  ;;  %v2171_v52 = vrot.slane %v7302_v56, 5  ;;  %v7304_v7 = vshll.u32 %v5974_v39, 16  ;;  %v7306_v56 = vshll.u32 %v6002_v17, 16 }
  0xd6   : > { %4582 = vmatmul.mubr.bf16.vlgmr.msra.gmra.mrb[24].mxu1 %v5705_v26  ;;  %4646 = vmatmul.mubr.bf16.vlgmr.msra.gmra.mrb[24].mxu0 %v1383_v0  ;;  %v1388_v0 = vrot.slane %v5815_v1, 1 }
  0xd7   : > { %4694 = vmatpush3.bf16.msra.mxu1 %v6030_v8  ;;  %4758 = vmatpush3.bf16.msra.mxu0 %v6040_v50  ;;  %v7303_v8 = vshrl.u32 %v5974_v39, 16  ;;  %v6152_v38 = vsel %vm2138_vm2, %v2164_v22, %v2168_v23  ;;  %v2172_v12 = vor.u32 %v2171_v52, %v2170_v63  ;;  %v2175_v11 = vrot.slane %v7304_v7, 5  ;;  %v5211_v52 = vld [vmem:[#allocation7 + $0xd8] sm:$0xff]  }
  0xd8   : > { %4585 = vmatprep.mubr.bf16.mxu1 %v5721_v40  ;;  %4649 = vmatprep.mubr.bf16.mxu0 %v1385_v48  ;;  %v2178_v48 = vrot.slane %v7305_v46, 4  ;;  %v2179_v41 = vrot.slane %v7306_v56, 5  ;;  %v6167_v63 = vsel %vm1378_vm1, %v1386_v44, %v1388_v0  ;;  %v5212_v46 = vld [vmem:[#allocation7 + $0x118] sm:$0xff]   ;;  %v5214_v44 = vld [vmem:[#allocation7 + $0x120] sm:$0xff]  }
  0xd9   : > { %v2174_v50 = vrot.slane %v7303_v8, 4  ;;  %4695 = vmatprep.subr.bf16.mxu1 %v5207_v19  ;;  %4759 = vmatprep.subr.bf16.mxu0 %v5208_v59  ;;  %v6164_v8 = vsel %vm2138_vm2, %v2168_v23, %v2172_v12  ;;  %7307 = vst [vmem:[#allocation37_spill] sm:$0xff] %v6167_v63 }
  0xda   : > { %v6169_v7 = vor.u32 %v2179_v41, %v2178_v48  ;;  %v1392_v41 = vrot.slane %v5874_v60, 1  ;;  %v5218_v48 = vld [vmem:[#allocation7 + $0x130] sm:$0xff]  }
  0xdb   : > { %4696 = vmatpush3.bf16.msra.mxu1 %v5207_v19  ;;  %4760 = vmatpush3.bf16.msra.mxu0 %v5208_v59  ;;  %v2176_v22 = vor.u32 %v2175_v11, %v2174_v50  ;;  %v1390_v19 = vrot.slane %v5837_v31, 1  ;;  %v5213_v59 = vld [vmem:[#allocation7 + $0xe0] sm:$0xff]   ;;  %v5215_v50 = vld [vmem:[#allocation7 + $0xe8] sm:$0xff]  }
  0xdc   : > { %4697 = vmatprep.subr.bf16.mxu1 %v5209_v10  ;;  %4761 = vmatprep.subr.bf16.mxu0 %v5210_v9 }
  0xdd   : > { %v6172_v56 = vsel %vm2138_vm2, %v2172_v12, %v2176_v22  ;;  %v6178_v6 = vsel %vm2138_vm2, %v2176_v22, %v6169_v7  ;;  %v6185_v23 = vsel %vm1378_vm1, %v1388_v0, %v1390_v19  ;;  %v5216_v12 = vld [vmem:[#allocation7 + $0x128] sm:$0xff]   ;;  %v6188_v11 = vsel %vm1378_vm1, %v1390_v19, %v1392_v41  ;;  %v5217_v0 = vld [vmem:[#allocation7 + $0xf0] sm:$0xff]   ;;  %v5220_v19 = vld [vmem:[#allocation7 + $0x138] sm:$0xff]  }
  0xde   : > { %4586 = vmatmul.mubr.bf16.gmra.mrb[28].mxu1 %v5760_v5  ;;  %4650 = vmatmul.mubr.bf16.gmra.mrb[28].mxu0 %v6161_v36  ;;  %7308 = vst [vmem:[#allocation38_spill] sm:$0xff] %v6185_v23  ;;  %7309 = vst [vmem:[#allocation39_spill] sm:$0xff] %v6188_v11 }
  0xdf   : > { %4589 = vmatprep.mubr.bf16.mxu1 %v5785_v28  ;;  %4653 = vmatprep.mubr.bf16.mxu0 %v6167_v63  ;;  %v5244_v63 = vld [vmem:[#allocation7 + $0x218] sm:$0xff]  }
  0xe0   : > { %4698 = vmatpush3.bf16.msra.mxu1 %v5209_v10  ;;  %4762 = vmatpush3.bf16.msra.mxu0 %v5210_v9  ;;  %v1394_v10 = vrot.slane %v5911_v15, 1  ;;  %v1396_v9 = vrot.slane %v5929_v42, 1 }
  0xe1   : > { %4699 = vmatprep.subr.bf16.mxu1 %v5211_v52  ;;  %4763 = vmatprep.subr.bf16.mxu0 %v5212_v46 }
  0xe2   : > { %v6197_v22 = vsel %vm1378_vm1, %v1392_v41, %v1394_v10  ;;  %v1398_v41 = vrot.slane %v5974_v39, 1 }
  0xe3   : > { %7310 = vst [vmem:[#allocation40_spill] sm:$0xff] %v6197_v22 }
  0xe4   : > { %4700 = vmatpush3.bf16.msra.mxu1 %v5211_v52  ;;  %4764 = vmatpush3.bf16.msra.mxu0 %v5212_v46  ;;  %v6200_v52 = vsel %vm1378_vm1, %v1394_v10, %v1396_v9  ;;  %v5219_v46 = vld [vmem:[#allocation7 + $0xf8] sm:$0xff]   ;;  %v7315_v10 = vshll.u32 %v5854_v18, 16  ;;  %v6234_v37 = vsel %vm1378_vm1, %v1398_v41, %v1400_v14 }
  0xe5   : > { %4701 = vmatprep.subr.bf16.mxu1 %v5213_v59  ;;  %4765 = vmatprep.subr.bf16.mxu0 %v5214_v44  ;;  %7311 = vst [vmem:[#allocation41_spill] sm:$0xff] %v6200_v52  ;;  %7319 = vst [vmem:[#allocation43_spill] sm:$0xff] %v6234_v37 }
  0xe6   : > { %4590 = vmatmul.mubr.bf16.gmra.mrb[32].mxu1 %v5815_v1  ;;  %4654 = vmatmul.mubr.bf16.gmra.mrb[32].mxu0 %v6185_v23  ;;  %v2207_v3 = vrot.slane %v7315_v10, 5  ;;  %v6227_v10 = vsel %vm1378_vm1, %v1396_v9, %v1398_v41  ;;  %v7320_v9 = vshrl.u32 %v5913_v16, 16 }
  0xe7   : > { %4593 = vmatprep.mubr.bf16.mxu1 %v5837_v31  ;;  %4657 = vmatprep.mubr.bf16.mxu0 %v6188_v11  ;;  %7318 = vst [vmem:[#allocation42_spill] sm:$0xff] %v6227_v10 }
  0xe8   : > { %4702 = vmatpush3.bf16.msra.mxu1 %v5213_v59  ;;  %4766 = vmatpush3.bf16.msra.mxu0 %v5214_v44  ;;  %v7313_v59 = vshll.u32 %v5817_v2, 16 }
  0xe9   : > { %4703 = vmatprep.subr.bf16.mxu1 %v5215_v50  ;;  %4767 = vmatprep.subr.bf16.mxu0 %v5216_v12 }
  0xea   : > { %v2203_v44 = vrot.slane %v7313_v59, 5  ;;  %v6216_v59 = vld [vmem:[#allocation7 + $0x140] sm:$0xff]  }
  0xec   : > { %4704 = vmatpush3.bf16.msra.mxu1 %v5215_v50  ;;  %4768 = vmatpush3.bf16.msra.mxu0 %v5216_v12  ;;  %v7314_v50 = vshrl.u32 %v5854_v18, 16  ;;  %v6220_v30 = vor.u32 %v2203_v44, %v2202_v53  ;;  %v1402_v53 = vrot.slane %v5707_v27, 1  ;;  %v7323_v44 = vshll.u32 %v5952_v61, 16 }
  0xed   : > { %4705 = vmatprep.subr.bf16.mxu1 %v5217_v0  ;;  %4769 = vmatprep.subr.bf16.mxu0 %v5218_v48 }
  0xee   : > { %4594 = vmatmul.mubr.bf16.gmra.mrb[36].mxu1 %v5874_v60  ;;  %4658 = vmatmul.mubr.bf16.gmra.mrb[36].mxu0 %v6197_v22  ;;  %v2206_v12 = vrot.slane %v7314_v50, 4  ;;  %v7317_v50 = vshll.u32 %v5888_v33, 16  ;;  %v2219_v41 = vrot.slane %v7323_v44, 5  ;;  %v7329_v44 = vshll.u32 %v6004_v45, 16 }
  0xef   : > { %4597 = vmatprep.mubr.bf16.mxu1 %v5911_v15  ;;  %4661 = vmatprep.mubr.bf16.mxu0 %v6200_v52  ;;  %v7316_v52 = vshrl.u32 %v5888_v33, 16 }
  0xf0   : > { %4706 = vmatpush3.bf16.msra.mxu1 %v5217_v0  ;;  %4770 = vmatpush3.bf16.msra.mxu0 %v5218_v48  ;;  %v2208_v62 = vor.u32 %v2207_v3, %v2206_v12  ;;  %v2211_v22 = vrot.slane %v7317_v50, 5  ;;  %v6256_v50 = vsel %vm1378_vm1, %v1400_v14, %v1402_v53  ;;  %v1406_v14 = vrot.slane %v5742_v55, 1 }
  0xf1   : > { %4707 = vmatprep.subr.bf16.mxu1 %v5219_v46  ;;  %4771 = vmatprep.subr.bf16.mxu0 %v5220_v19  ;;  %v2210_v24 = vrot.slane %v7316_v52, 4  ;;  %v7321_v52 = vshll.u32 %v5913_v16, 16  ;;  %7324 = vst [vmem:[#allocation44_spill] sm:$0xff] %v6256_v50 }
  0xf2   : > { %v6231_v0 = vsel %vm2138_vm2, %v6220_v30, %v2208_v62 }
  0xf3   : > { %v2212_v48 = vor.u32 %v2211_v22, %v2210_v24  ;;  %v1404_v24 = vrot.slane %v5713_v32, 1  ;;  %v2214_v22 = vrot.slane %v7320_v9, 4 }
  0xf4   : > { %4708 = vmatpush3.bf16.msra.mxu1 %v5219_v46  ;;  %4772 = vmatpush3.bf16.msra.mxu0 %v5220_v19  ;;  %v2215_v46 = vrot.slane %v7321_v52, 5 }
  0xf5   : > { %4821 = vmatprep.subr.bf16.mxu1 %v6216_v59  ;;  %4885 = vmatprep.subr.bf16.mxu0 %v6218_v34  ;;  %v6239_v3 = vsel %vm2138_vm2, %v2208_v62, %v2212_v48  ;;  %v7322_v62 = vshrl.u32 %v5952_v61, 16 }
  0xf6   : > { %4598 = vmatmul.mubr.bf16.gmra.mrb[40].mxu1 %v5929_v42  ;;  %4662 = vmatmul.mubr.bf16.gmra.mrb[40].mxu0 %v6227_v10  ;;  %v2216_v12 = vor.u32 %v2215_v46, %v2214_v22  ;;  %v6259_v10 = vsel %vm1378_vm1, %v1402_v53, %v1404_v24  ;;  %v1408_v22 = vrot.slane %v5769_v13, 1  ;;  %v7326_v53 = vshrl.u32 %v5980_v47, 16 }
  0xf7   : > { %4601 = vmatprep.mubr.bf16.mxu1 %v5974_v39  ;;  %4665 = vmatprep.mubr.bf16.mxu0 %v6234_v37  ;;  %v2218_v19 = vrot.slane %v7322_v62, 4  ;;  %7325 = vst [vmem:[#allocation45_spill] sm:$0xff] %v6259_v10  ;;  %v7328_v62 = vshrl.u32 %v6004_v45, 16 }
  0xf8   : > { %v6262_v11 = vsel %vm2138_vm2, %v2212_v48, %v2216_v12  ;;  %v2222_v52 = vrot.slane %v7326_v53, 4  ;;  %v7327_v48 = vshll.u32 %v5980_v47, 16  ;;  %v6285_v51 = vsel %vm1378_vm1, %v1406_v14, %v1408_v22 }
  0xf9   : > { %v2220_v37 = vor.u32 %v2219_v41, %v2218_v19  ;;  %v2226_v19 = vrot.slane %v7328_v62, 4  ;;  %v2227_v41 = vrot.slane %v7329_v44, 5  ;;  %7331 = vst [vmem:[#allocation47_spill] sm:$0xff] %v6285_v51 }
  0xfa   : > { %v2223_v46 = vrot.slane %v7327_v48, 5  ;;  %v7226_v48 = vshrl.u32 %v6028_v43, 16 }
  0xfb   : > { %v6265_v9 = vsel %vm2138_vm2, %v2216_v12, %v2220_v37 }
  0xfc   : > { %v2224_v12 = vor.u32 %v2223_v46, %v2222_v52  ;;  %v7332_v52 = vshll.u32 %v6028_v43, 16 }
  0xfe   : > { %4602 = vmatmul.mubr.bf16.gmra.mrb[44].mxu1 %v6002_v17  ;;  %4666 = vmatmul.mubr.bf16.gmra.mrb[44].mxu0 %v6256_v50  ;;  %v6282_v50 = vsel %vm1378_vm1, %v1404_v24, %v1406_v14  ;;  %v6288_v23 = vsel %vm2138_vm2, %v2220_v37, %v2224_v12  ;;  %v1410_v24 = vrot.slane %v5787_v29, 1  ;;  %v1412_v14 = vrot.slane %v5817_v2, 1 }
  0xff   : > { %4605 = vmatprep.mubr.bf16.mxu1 %v5707_v27  ;;  %4669 = vmatprep.mubr.bf16.mxu0 %v6259_v10  ;;  %7330 = vst [vmem:[#allocation46_spill] sm:$0xff] %v6282_v50  ;;  %v2228_v10 = vor.u32 %v2227_v41, %v2226_v19  ;;  %v2232_v37 = vrot.slane %v7226_v48, 4  ;;  %v2233_v46 = vrot.slane %v7332_v52, 5  ;;  %v1420_v52 = vrot.slane %v5952_v61, 1 }
 0x100   : > { %v6307_v19 = vsel %vm1378_vm1, %v1408_v22, %v1410_v24  ;;  %v6310_v44 = vsel %vm1378_vm1, %v1410_v24, %v1412_v14  ;;  %v1416_v22 = vrot.slane %v5888_v33, 1  ;;  %v1424_v48 = vrot.slane %v6004_v45, 1 }
 0x101   : > { %v6291_v53 = vsel %vm2138_vm2, %v2224_v12, %v2228_v10  ;;  %v6304_v62 = vor.u32 %v2233_v46, %v2232_v37  ;;  %7333 = vst [vmem:[#allocation48_spill] sm:$0xff] %v6307_v19  ;;  %7334 = vst [vmem:[#allocation49_spill] sm:$0xff] %v6310_v44  ;;  %v1414_v12 = vrot.slane %v5854_v18, 1 }
 0x103   : > { %v6314_v41 = vsel %vm2138_vm2, %v2228_v10, %v6304_v62  ;;  %v6323_v37 = vsel %vm1378_vm1, %v1412_v14, %v1414_v12  ;;  %v6326_v24 = vsel %vm1378_vm1, %v1414_v12, %v1416_v22  ;;  %v1418_v10 = vrot.slane %v5913_v16, 1 }
 0x104   : > { %7335 = vst [vmem:[#allocation50_spill] sm:$0xff] %v6323_v37  ;;  %7336 = vst [vmem:[#allocation51_spill] sm:$0xff] %v6326_v24  ;;  %v1422_v12 = vrot.slane %v5980_v47, 1 }
 0x105   : > { %v6335_v46 = vsel %vm1378_vm1, %v1416_v22, %v1418_v10  ;;  %v6338_v14 = vsel %vm1378_vm1, %v1418_v10, %v1420_v52  ;;  %v7235_v10 = vrot.slane %v6028_v43, 1 }
 0x106   : > { %4606 = vmatmul.mubr.bf16.gmra.mrb[48].mxu1 %v5713_v32  ;;  %4670 = vmatmul.mubr.bf16.gmra.mrb[48].mxu0 %v6282_v50  ;;  %7337 = vst [vmem:[#allocation52_spill] sm:$0xff] %v6335_v46  ;;  %7338 = vst [vmem:[#allocation53_spill] sm:$0xff] %v6338_v14  ;;  %v6350_v22 = vsel %vm1378_vm1, %v1422_v12, %v1424_v48 }
 0x107   : > { %4609 = vmatprep.mubr.bf16.mxu1 %v5742_v55  ;;  %4673 = vmatprep.mubr.bf16.mxu0 %v6285_v51  ;;  %7340 = vst [vmem:[#allocation55_spill] sm:$0xff] %v6350_v22 }
 0x10e   : > { %4610 = vmatmul.mubr.bf16.gmra.mrb[52].mxu1 %v5769_v13  ;;  %4674 = vmatmul.mubr.bf16.gmra.mrb[52].mxu0 %v6307_v19  ;;  %v5223_v19 = vld [vmem:[#allocation7 + $0x148] sm:$0xff]  }
 0x10f   : > { %4613 = vmatprep.mubr.bf16.mxu1 %v5787_v29  ;;  %4677 = vmatprep.mubr.bf16.mxu0 %v6310_v44 }
 0x116   : > { %4614 = vmatmul.mubr.bf16.gmra.mrb[56].mxu1 %v5817_v2  ;;  %4678 = vmatmul.mubr.bf16.gmra.mrb[56].mxu0 %v6323_v37 }
 0x117   : > { %4617 = vmatprep.mubr.bf16.mxu1 %v5854_v18  ;;  %4681 = vmatprep.mubr.bf16.mxu0 %v6326_v24  ;;  %v6347_v24 = vsel %vm1378_vm1, %v1420_v52, %v1422_v12  ;;  %v6362_v52 = vsel %vm1378_vm1, %v1424_v48, %v7235_v10  ;;  %v5224_v48 = vld [vmem:[#allocation7 + $0x188] sm:$0xff]  }
 0x118   : > { %7339 = vst [vmem:[#allocation54_spill] sm:$0xff] %v6347_v24  ;;  %7341 = vst [vmem:[#allocation56_spill] sm:$0xff] %v6362_v52 }
 0x11e   : > { %4618 = vmatmul.mubr.bf16.gmra.mrb[60].mxu1 %v5888_v33  ;;  %4682 = vmatmul.mubr.bf16.gmra.mrb[60].mxu0 %v6335_v46  ;;  %v1760_v46 = vrot.slane %v5721_v40, 4 }
 0x11f   : > { %4621 = vmatprep.mubr.bf16.mxu1 %v5913_v16  ;;  %4685 = vmatprep.mubr.bf16.mxu0 %v6338_v14  ;;  %v1759_v14 = vrot.slane %v5705_v26, 4 }
 0x121   : > { %v1761_v12 = vsel %vm1758_vm3, %v1759_v14, %v1760_v46  ;;  %v1766_v14 = vrot.slane %v5815_v1, 4 }
 0x126   : > { %4622 = vmatmul.mubr.bf16.gmra.mrb[64].mxu1 %v5952_v61  ;;  %4686 = vmatmul.mubr.bf16.gmra.mrb[64].mxu0 %v6347_v24  ;;  %v1764_v24 = vrot.slane %v5785_v28, 4 }
 0x127   : > { %4625 = vmatprep.mubr.bf16.mxu1 %v5980_v47  ;;  %4689 = vmatprep.mubr.bf16.mxu0 %v6350_v22  ;;  %v1762_v22 = vrot.slane %v5760_v5, 4 }
 0x129   : > { %v1763_v37 = vsel %vm1758_vm3, %v1760_v46, %v1762_v22  ;;  %v1765_v44 = vsel %vm1758_vm3, %v1762_v22, %v1764_v24  ;;  %v5226_v46 = vld [vmem:[#allocation7 + $0x190] sm:$0xff]   ;;  %v1767_v22 = vsel %vm1758_vm3, %v1764_v24, %v1766_v14 }
 0x12e   : > { %4626 = vmatmul.mubr.bf16.gmra.mrb[68].mxu1 %v6004_v45  ;;  %4690 = vmatmul.mubr.bf16.gmra.mrb[68].mxu0 %v6362_v52 }
 0x12f   : > { %4709 = vmatprep.mubr.bf16.mxu1 %v1761_v12  ;;  %4773 = vmatprep.mubr.bf16.mxu0 %v6108_v21  ;;  %v1768_v21 = vrot.slane %v5837_v31, 4  ;;  %v5225_v12 = vld [vmem:[#allocation7 + $0x150] sm:$0xff]  }
 0x136   : > { %4710 = vmatmul.mubr.bf16.vlgmr.msra.gmra.mrb[72].mxu1 %v1763_v37  ;;  %4774 = vmatmul.mubr.bf16.vlgmr.msra.gmra.mrb[72].mxu0 %v6111_v49  ;;  %v1769_v49 = vsel %vm1758_vm3, %v1766_v14, %v1768_v21  ;;  %v5230_v37 = vld [vmem:[#allocation7 + $0x1a0] sm:$0xff]   ;;  %v1774_v14 = vrot.slane %v5929_v42, 4 }
 0x137   : > { %4822 = vmatpush3.bf16.msra.mxu1 %v6216_v59  ;;  %4886 = vmatpush3.bf16.msra.mxu0 %v6218_v34  ;;  %v5227_v34 = vld [vmem:[#allocation7 + $0x158] sm:$0xff]  }
 0x138   : > { %4713 = vmatprep.mubr.bf16.mxu1 %v1765_v44  ;;  %4777 = vmatprep.mubr.bf16.mxu0 %v6117_v57  ;;  %v5228_v59 = vld [vmem:[#allocation7 + $0x198] sm:$0xff]   ;;  %v1770_v57 = vrot.slane %v5874_v60, 4  ;;  %v1772_v44 = vrot.slane %v5911_v15, 4 }
 0x139   : > { %4823 = vmatprep.subr.bf16.mxu1 %v5223_v19  ;;  %4887 = vmatprep.subr.bf16.mxu0 %v5224_v48 }
 0x13a   : > { %v1771_v24 = vsel %vm1758_vm3, %v1768_v21, %v1770_v57  ;;  %v5233_v21 = vld [vmem:[#allocation7 + $0x170] sm:$0xff]  }
 0x13b   : > { %4824 = vmatpush3.bf16.msra.mxu1 %v5223_v19  ;;  %4888 = vmatpush3.bf16.msra.mxu0 %v5224_v48  ;;  %v5229_v19 = vld [vmem:[#allocation7 + $0x160] sm:$0xff]   ;;  %v1773_v48 = vsel %vm1758_vm3, %v1770_v57, %v1772_v44  ;;  %v5235_v57 = vld [vmem:[#allocation7 + $0x178] sm:$0xff]  }
 0x13c   : > { %4825 = vmatprep.subr.bf16.mxu1 %v5225_v12  ;;  %4889 = vmatprep.subr.bf16.mxu0 %v5226_v46 }
 0x13e   : > { %4714 = vmatmul.mubr.bf16.gmra.mrb[76].mxu1 %v1767_v22  ;;  %4778 = vmatmul.mubr.bf16.gmra.mrb[76].mxu0 %v6127_v4  ;;  %v5231_v4 = vld [vmem:[#allocation7 + $0x168] sm:$0xff]   ;;  %v1775_v22 = vsel %vm1758_vm3, %v1772_v44, %v1774_v14  ;;  %v1778_v44 = vrot.slane %v6002_v17, 4 }
 0x13f   : > { %4717 = vmatprep.mubr.bf16.mxu1 %v1769_v49  ;;  %4781 = vmatprep.mubr.bf16.mxu0 %v6138_v35  ;;  %v5232_v35 = vld [vmem:[#allocation7 + $0x1a8] sm:$0xff]  }
 0x140   : > { %4826 = vmatpush3.bf16.msra.mxu1 %v5225_v12  ;;  %4890 = vmatpush3.bf16.msra.mxu0 %v5226_v46  ;;  %v1776_v12 = vrot.slane %v5974_v39, 4  ;;  %v5234_v46 = vld [vmem:[#allocation7 + $0x1b0] sm:$0xff]  }
 0x141   : > { %4827 = vmatprep.subr.bf16.mxu1 %v5227_v34  ;;  %4891 = vmatprep.subr.bf16.mxu0 %v5228_v59 }
 0x142   : > { %v1777_v49 = vsel %vm1758_vm3, %v1774_v14, %v1776_v12 }
 0x144   : > { %4828 = vmatpush3.bf16.msra.mxu1 %v5227_v34  ;;  %4892 = vmatpush3.bf16.msra.mxu0 %v5228_v59  ;;  %v7342_v34 = vshrl.u32 %v5707_v27, 16  ;;  %v7343_v59 = vshll.u32 %v5707_v27, 16 }
 0x145   : > { %4829 = vmatprep.subr.bf16.mxu1 %v5229_v19  ;;  %4893 = vmatprep.subr.bf16.mxu0 %v5230_v37 }
 0x146   : > { %4718 = vmatmul.mubr.bf16.gmra.mrb[80].mxu1 %v1771_v24  ;;  %4782 = vmatmul.mubr.bf16.gmra.mrb[80].mxu0 %v6147_v54  ;;  %v2182_v54 = vrot.slane %v7342_v34, 4 }
 0x147   : > { %4721 = vmatprep.mubr.bf16.mxu1 %v1773_v48  ;;  %4785 = vmatprep.mubr.bf16.mxu0 %v6152_v38  ;;  %v2183_v38 = vrot.slane %v7343_v59, 5  ;;  %v6400_v48 = vld [vmem:[#allocation7 + $0x1c0] sm:$0xff]  }
 0x148   : > { %4830 = vmatpush3.bf16.msra.mxu1 %v5229_v19  ;;  %4894 = vmatpush3.bf16.msra.mxu0 %v5230_v37  ;;  %v5236_v19 = vld [vmem:[#allocation7 + $0x1b8] sm:$0xff]   ;;  %v1780_v37 = vrot.slane %v5707_v27, 4 }
 0x149   : > { %4831 = vmatprep.subr.bf16.mxu1 %v5231_v4  ;;  %4895 = vmatprep.subr.bf16.mxu0 %v5232_v35  ;;  %v2184_v24 = vor.u32 %v2183_v38, %v2182_v54  ;;  %v7347_v54 = vshll.u32 %v5742_v55, 16  ;;  %v1784_v38 = vrot.slane %v5742_v55, 4 }
 0x14b   : > { %v2191_v59 = vrot.slane %v7347_v54, 5  ;;  %v1788_v54 = vrot.slane %v5787_v29, 4 }
 0x14c   : > { %4832 = vmatpush3.bf16.msra.mxu1 %v5231_v4  ;;  %4896 = vmatpush3.bf16.msra.mxu0 %v5232_v35  ;;  %v6402_v4 = vld [vmem:[#allocation7 + $0x200] sm:$0xff]   ;;  %v1779_v35 = vsel %vm1758_vm3, %v1776_v12, %v1778_v44  ;;  %v1782_v12 = vrot.slane %v5713_v32, 4 }
 0x14d   : > { %4833 = vmatprep.subr.bf16.mxu1 %v5233_v21  ;;  %4897 = vmatprep.subr.bf16.mxu0 %v5234_v46 }
 0x14e   : > { %4722 = vmatmul.mubr.bf16.gmra.mrb[84].mxu1 %v1775_v22  ;;  %4786 = vmatmul.mubr.bf16.gmra.mrb[84].mxu0 %v6164_v8  ;;  %v7344_v8 = vshrl.u32 %v5713_v32, 16 }
 0x14f   : > { %4725 = vmatprep.mubr.bf16.mxu1 %v1777_v49  ;;  %4789 = vmatprep.mubr.bf16.mxu0 %v6172_v56  ;;  %v7345_v56 = vshll.u32 %v5713_v32, 16  ;;  %v1781_v49 = vsel %vm1758_vm3, %v1778_v44, %v1780_v37 }
 0x150   : > { %4834 = vmatpush3.bf16.msra.mxu1 %v5233_v21  ;;  %4898 = vmatpush3.bf16.msra.mxu0 %v5234_v46  ;;  %v2186_v14 = vrot.slane %v7344_v8, 4  ;;  %v2185_v21 = vsel %vm2138_vm2, %v6169_v7, %v2184_v24  ;;  %v7346_v46 = vshrl.u32 %v5742_v55, 16  ;;  %v1783_v8 = vsel %vm1758_vm3, %v1780_v37, %v1782_v12 }
 0x151   : > { %4835 = vmatprep.subr.bf16.mxu1 %v5235_v57  ;;  %4899 = vmatprep.subr.bf16.mxu0 %v5236_v19  ;;  %v2187_v22 = vrot.slane %v7345_v56, 5  ;;  %v1786_v37 = vrot.slane %v5769_v13, 4 }
 0x152   : > { %v2190_v34 = vrot.slane %v7346_v46, 4  ;;  %v7349_v46 = vshll.u32 %v5769_v13, 16 }
 0x153   : > { %v2188_v7 = vor.u32 %v2187_v22, %v2186_v14  ;;  %v7351_v22 = vshll.u32 %v5787_v29, 16 }
 0x154   : > { %4836 = vmatpush3.bf16.msra.mxu1 %v5235_v57  ;;  %4900 = vmatpush3.bf16.msra.mxu0 %v5236_v19  ;;  %v2192_v44 = vor.u32 %v2191_v59, %v2190_v34  ;;  %v7348_v19 = vshrl.u32 %v5769_v13, 16 }
 0x155   : > { %4949 = vmatprep.subr.bf16.mxu1 %v6400_v48  ;;  %5013 = vmatprep.subr.bf16.mxu0 %v6402_v4  ;;  %v2189_v57 = vsel %vm2138_vm2, %v2184_v24, %v2188_v7  ;;  %v2199_v34 = vrot.slane %v7351_v22, 5  ;;  %v413_v22 = vld [vmem:[%s5674_s6 + $0xc] sm:$0xf] }
 0x156   : > { %4726 = vmatmul.mubr.bf16.gmra.mrb[88].mxu1 %v1779_v35  ;;  %4790 = vmatmul.mubr.bf16.gmra.mrb[88].mxu0 %v6178_v6  ;;  %v2194_v56 = vrot.slane %v7348_v19, 4  ;;  %v2195_v35 = vrot.slane %v7349_v46, 5  ;;  %v1785_v6 = vsel %vm1758_vm3, %v1782_v12, %v1784_v38  ;;  %v1787_v12 = vsel %vm1758_vm3, %v1784_v38, %v1786_v37 }
 0x157   : > { %4729 = vmatprep.mubr.bf16.mxu1 %v1781_v49  ;;  %4793 = vmatprep.mubr.bf16.mxu0 %v2185_v21  ;;  %v2193_v49 = vsel %vm2138_vm2, %v2188_v7, %v2192_v44  ;;  %v7350_v21 = vshrl.u32 %v5787_v29, 16  ;;  %v1789_v19 = vsel %vm1758_vm3, %v1786_v37, %v1788_v54 }
 0x158   : > { %v2196_v24 = vor.u32 %v2195_v35, %v2194_v56  ;;  %v1794_v35 = vrot.slane %v5888_v33, 4 }
 0x159   : > { %v2198_v14 = vrot.slane %v7350_v21, 4 }
 0x15a   : > { %v2197_v7 = vsel %vm2138_vm2, %v2192_v44, %v2196_v24 }
 0x15b   : > { %v2200_v59 = vor.u32 %v2199_v34, %v2198_v14  ;;  %v412_v14 = vld [vmem:[%s5674_s6 + $0x8] sm:$0xf]  ;;  %v7352_v34 = vmov 0  }
 0x15c   : > { %v421_v37 = vmax.bf16 %v7352_v34, %v413_v22 }
 0x15d   : > { %v2201_v46 = vsel %vm2138_vm2, %v2196_v24, %v2200_v59  ;;  %v2205_v38 = vsel %vm2138_vm2, %v2200_v59, %v6220_v30  ;;  %v1798_v30 = vrot.slane %v5952_v61, 4  ;;  %v1800_v24 = vrot.slane %v5980_v47, 4 }
 0x15e   : > { %4730 = vmatmul.mubr.bf16.gmra.mrb[92].mxu1 %v1783_v8  ;;  %4794 = vmatmul.mubr.bf16.gmra.mrb[92].mxu0 %v2189_v57  ;;  %v1790_v8 = vrot.slane %v5817_v2, 4  ;;  %v1792_v57 = vrot.slane %v5854_v18, 4 }
 0x15f   : > { %4733 = vmatprep.mubr.bf16.mxu1 %v1785_v6  ;;  %4797 = vmatprep.mubr.bf16.mxu0 %v2193_v49  ;;  %v1796_v6 = vrot.slane %v5913_v16, 4 }
 0x160   : > { %v1791_v56 = vsel %vm1758_vm3, %v1788_v54, %v1790_v8  ;;  %v1793_v44 = vsel %vm1758_vm3, %v1790_v8, %v1792_v57  ;;  %v1795_v49 = vsel %vm1758_vm3, %v1792_v57, %v1794_v35 }
 0x161   : > { %v1797_v21 = vsel %vm1758_vm3, %v1794_v35, %v1796_v6 }
 0x166   : > { %4734 = vmatmul.mubr.bf16.gmra.mrb[96].mxu1 %v1787_v12  ;;  %4798 = vmatmul.mubr.bf16.gmra.mrb[96].mxu0 %v2197_v7 }
 0x167   : > { %4737 = vmatprep.mubr.bf16.mxu1 %v1789_v19  ;;  %4801 = vmatprep.mubr.bf16.mxu0 %v2201_v46 }
 0x16e   : > { %4738 = vmatmul.mubr.bf16.gmra.mrb[100].mxu1 %v1791_v56  ;;  %4802 = vmatmul.mubr.bf16.gmra.mrb[100].mxu0 %v2205_v38  ;;  %v1801_v56 = vsel %vm1758_vm3, %v1798_v30, %v1800_v24  ;;  %v1802_v38 = vrot.slane %v6004_v45, 4 }
 0x16f   : > { %4741 = vmatprep.mubr.bf16.mxu1 %v1793_v44  ;;  %4805 = vmatprep.mubr.bf16.mxu0 %v6231_v0  ;;  %v420_v0 = vmax.bf16 %v7352_v34, %v412_v14 }
 0x171   : > { %v6467_v46 = vcombine.low %v420_v0, %v421_v37 }
 0x173   : > { %v7236_v44 = vshrl.u32 %v6467_v46, 16  ;;  %v7238_v35 = vshll.u32 %v6467_v46, 16 }
 0x175   : > { %v2239_v0 = vrot.slane %v7236_v44, 4  ;;  %v2242_v37 = vrot.slane %v7238_v35, 5  ;;  %v2577_v44 = vrot.slane %v5721_v40, 5  ;;  %v2579_v40 = vrot.slane %v5760_v5, 5 }
 0x176   : > { %4742 = vmatmul.mubr.bf16.gmra.mrb[104].mxu1 %v1795_v49  ;;  %4806 = vmatmul.mubr.bf16.gmra.mrb[104].mxu0 %v6239_v3 }
 0x177   : > { %4745 = vmatprep.mubr.bf16.mxu1 %v1797_v21  ;;  %4809 = vmatprep.mubr.bf16.mxu0 %v6262_v11  ;;  %v1799_v11 = vsel %vm1758_vm3, %v1796_v6, %v1798_v30  ;;  %v1804_v6 = vrot.slane %v6028_v43, 4  ;;  %v2243_v10 = vor.u32 %v2242_v37, %v2239_v0 }
 0x179   : > { %v4519_v54 = vpop.f32.mrb[0].mxu0  ;;  %v4543_v59 = vpop.f32.mrb[0].mxu1 }
 0x17a   : > { %v6458_v12 = vpop.f32.mrb[1].mxu0  ;;  %v6460_v7 = vpop.f32.mrb[1].mxu1 }
 0x17b   : > { %v6462_v19 = vpop.f32.mrb[2].mxu0  ;;  %v6464_v3 = vpop.f32.mrb[2].mxu1 }
 0x17c   : > { %v6469_v8 = vpop.f32.mrb[3].mxu0  ;;  %v6471_v57 = vpop.f32.mrb[3].mxu1 }
 0x17e   : > { %4746 = vmatmul.mubr.bf16.gmra.mrb[108].mxu1 %v1799_v11  ;;  %4810 = vmatmul.mubr.bf16.gmra.mrb[108].mxu0 %v6265_v9  ;;  %v1805_v11 = vsel %vm1758_vm3, %v1802_v38, %v1804_v6 }
 0x17f   : > { %4749 = vmatprep.mubr.bf16.mxu1 %v1801_v56  ;;  %4813 = vmatprep.mubr.bf16.mxu0 %v6288_v23  ;;  %v1803_v23 = vsel %vm1758_vm3, %v1800_v24, %v1802_v38  ;;  %v1806_v56 = vrot.slane %v6467_v46, 4  ;;  %v2576_v24 = vrot.slane %v5705_v26, 5 }
 0x181   : > { %v6480_v49 = vpop.f32.mrb[4].mxu0  ;;  %v6482_v21 = vpop.f32.mrb[4].mxu1  ;;  %v2578_v26 = vsel %vm2575_vm4, %v2576_v24, %v2577_v44  ;;  %v2580_v24 = vsel %vm2575_vm4, %v2577_v44, %v2579_v40  ;;  %v2585_v44 = vrot.slane %v5837_v31, 5 }
 0x182   : > { %v6484_v14 = vpop.f32.mrb[5].mxu0  ;;  %v6486_v22 = vpop.f32.mrb[5].mxu1 }
 0x183   : > { %v6488_v9 = vpop.f32.mrb[6].mxu0  ;;  %v6490_v30 = vpop.f32.mrb[6].mxu1 }
 0x184   : > { %v947_v54 = vpop.f32.mrb[7].mxu0  ;;  %v1035_v59 = vpop.f32.mrb[7].mxu1 }
 0x186   : > { %4750 = vmatmul.mubr.bf16.gmra.mrb[112].mxu1 %v1803_v23  ;;  %4814 = vmatmul.mubr.bf16.gmra.mrb[112].mxu0 %v6291_v53  ;;  %v1807_v53 = vsel %vm1758_vm3, %v1804_v6, %v1806_v56  ;;  %v2581_v6 = vrot.slane %v5785_v28, 5 }
 0x187   : > { %4753 = vmatprep.mubr.bf16.mxu1 %v1805_v11  ;;  %4817 = vmatprep.mubr.bf16.mxu0 %v6314_v41  ;;  %v2244_v41 = vsel %vm2138_vm2, %v6304_v62, %v2243_v10 }
 0x189   : > { %v6503_v52 = vpop.f32.mrb[8].mxu0  ;;  %v6505_v35 = vpop.f32.mrb[8].mxu1 }
 0x18a   : > { %v959_v54 = vpop.f32.mrb[9].mxu0  ;;  %v1047_v38 = vpop.f32.mrb[9].mxu1 }
 0x18b   : > { %v4528_v23 = vpop.f32.mrb[10].mxu0  ;;  %v4552_v59 = vpop.f32.mrb[10].mxu1 }
 0x18c   : > { %v6510_v11 = vpop.f32.mrb[11].mxu0  ;;  %v6512_v0 = vpop.f32.mrb[11].mxu1 }
 0x18e   : > { %4754 = vmatmul.mubr.bf16.gmra.mrb[116].mxu1 %v1807_v53  ;;  %4818 = vmatmul.mubr.bf16.gmra.mrb[116].mxu0 %v2244_v41  ;;  %v5239_v53 = vld [vmem:[#allocation7 + $0x1c8] sm:$0xff]  }
 0x18f   : > { %4837 = vmatprep.mubr.bf16.mxu1 %v2578_v26  ;;  %4901 = vmatprep.mubr.bf16.mxu0 %v5760_v5  ;;  %v2582_v5 = vsel %vm2575_vm4, %v2579_v40, %v2581_v6  ;;  %v5240_v41 = vld [vmem:[#allocation7 + $0x208] sm:$0xff]   ;;  %v2583_v26 = vrot.slane %v5815_v1, 5 }
 0x191   : > { %v4531_v37 = vpop.f32.mrb[12].mxu0  ;;  %v4555_v54 = vpop.f32.mrb[12].mxu1  ;;  %v2586_v58 = vsel %vm2575_vm4, %v2583_v26, %v2585_v44 }
 0x192   : > { %v6518_v56 = vpop.f32.mrb[13].mxu0  ;;  %v6520_v62 = vpop.f32.mrb[13].mxu1  ;;  %v5241_v37 = vld [vmem:[#allocation7 + $0x1d0] sm:$0xff]  }
 0x193   : > { %v6522_v10 = vpop.f32.mrb[14].mxu0  ;;  %v6524_v38 = vpop.f32.mrb[14].mxu1  ;;  %v5242_v54 = vld [vmem:[#allocation7 + $0x210] sm:$0xff]  }
 0x194   : > { %7353 = vst [vmem:[#allocation57_spill] sm:$0xff] %v6524_v38  ;;  %v6527_v23 = vpop.f32.mrb[15].mxu0  ;;  %v6529_v59 = vpop.f32.mrb[15].mxu1 }
 0x195   : > { %7354 = vst [vmem:[#allocation58_spill] sm:$0xff] %v6529_v59 }
 0x196   : > { %4838 = vmatmul.mubr.bf16.vlgmr.msra.gmra.mrb[120].mxu1 %v2580_v24  ;;  %4902 = vmatmul.mubr.bf16.vlgmr.msra.gmra.mrb[120].mxu0 %v5785_v28 }
 0x197   : > { %4950 = vmatpush3.bf16.msra.mxu1 %v6400_v48  ;;  %5014 = vmatpush3.bf16.msra.mxu0 %v6402_v4 }
 0x198   : > { %4841 = vmatprep.mubr.bf16.mxu1 %v2582_v5  ;;  %4905 = vmatprep.mubr.bf16.mxu0 %v5815_v1  ;;  %v2584_v1 = vsel %vm2575_vm4, %v2581_v6, %v2583_v26  ;;  %v2589_v6 = vrot.slane %v5911_v15, 5  ;;  %v5246_v26 = vld [vmem:[#allocation7 + $0x220] sm:$0xff]  }
 0x199   : > { %v6538_v51 = vpop.f32.mrb[16].mxu0  ;;  %v6540_v40 = vpop.f32.mrb[16].mxu1  ;;  %4951 = vmatprep.subr.bf16.mxu1 %v5239_v53  ;;  %5015 = vmatprep.subr.bf16.mxu0 %v5240_v41 }
 0x19a   : > { %7355 = vst [vmem:[#allocation59_spill] sm:$0xff] %v6540_v40  ;;  %v6542_v28 = vpop.f32.mrb[17].mxu0  ;;  %v6544_v48 = vpop.f32.mrb[17].mxu1  ;;  %v5243_v40 = vld [vmem:[#allocation7 + $0x1d8] sm:$0xff]  }
 0x19b   : > { %7356 = vst [vmem:[#allocation60_spill] sm:$0xff] %v6544_v48  ;;  %v6546_v4 = vpop.f32.mrb[18].mxu0  ;;  %v6548_v24 = vpop.f32.mrb[18].mxu1  ;;  %4952 = vmatpush3.bf16.msra.mxu1 %v5239_v53  ;;  %5016 = vmatpush3.bf16.msra.mxu0 %v5240_v41  ;;  %v5245_v41 = vld [vmem:[#allocation7 + $0x1e0] sm:$0xff]  }
 0x19c   : > { %7357 = vst [vmem:[#allocation61_spill] sm:$0xff] %v6548_v24  ;;  %v991_v5 = vpop.f32.mrb[19].mxu0  ;;  %v1079_v50 = vpop.f32.mrb[19].mxu1  ;;  %4953 = vmatprep.subr.bf16.mxu1 %v5241_v37  ;;  %5017 = vmatprep.subr.bf16.mxu0 %v5242_v54  ;;  %v2587_v24 = vrot.slane %v5874_v60, 5 }
 0x19e   : > { %4842 = vmatmul.mubr.bf16.gmra.mrb[124].mxu1 %v2584_v1  ;;  %4906 = vmatmul.mubr.bf16.gmra.mrb[124].mxu0 %v5837_v31  ;;  %v2588_v48 = vsel %vm2575_vm4, %v2585_v44, %v2587_v24  ;;  %v2591_v44 = vrot.slane %v5929_v42, 5 }
 0x19f   : > { %4845 = vmatprep.mubr.bf16.mxu1 %v2586_v58  ;;  %4909 = vmatprep.mubr.bf16.mxu0 %v5874_v60 }
 0x1a0   : > { %4954 = vmatpush3.bf16.msra.mxu1 %v5241_v37  ;;  %5018 = vmatpush3.bf16.msra.mxu0 %v5242_v54  ;;  %v2590_v37 = vsel %vm2575_vm4, %v2587_v24, %v2589_v6  ;;  %v5247_v54 = vld [vmem:[#allocation7 + $0x1e8] sm:$0xff]  }
 0x1a1   : > { %v6556_v53 = vpop.f32.mrb[20].mxu0  ;;  %v6558_v50 = vpop.f32.mrb[20].mxu1  ;;  %4955 = vmatprep.subr.bf16.mxu1 %v5243_v40  ;;  %5019 = vmatprep.subr.bf16.mxu0 %v5244_v63 }
 0x1a2   : > { %7358 = vst [vmem:[#allocation62_spill] sm:$0xff] %v6558_v50  ;;  %v1003_v1 = vpop.f32.mrb[21].mxu0  ;;  %v1091_v5 = vpop.f32.mrb[21].mxu1  ;;  %v5248_v50 = vld [vmem:[#allocation7 + $0x228] sm:$0xff]  }
 0x1a3   : > { %v4540_v31 = vpop.f32.mrb[22].mxu0  ;;  %v4564_v58 = vpop.f32.mrb[22].mxu1  ;;  %v2593_v1 = vrot.slane %v5974_v39, 5 }
 0x1a4   : > { %v6561_v20 = vpop.f32.mrb[23].mxu0  ;;  %v6563_v60 = vpop.f32.mrb[23].mxu1  ;;  %4956 = vmatpush3.bf16.msra.mxu1 %v5243_v40  ;;  %5020 = vmatpush3.bf16.msra.mxu0 %v5244_v63  ;;  %v5249_v63 = vld [vmem:[#allocation7 + $0x1f0] sm:$0xff]  }
 0x1a5   : > { %7359 = vst [vmem:[#allocation63_spill] sm:$0xff] %v6563_v60  ;;  %4957 = vmatprep.subr.bf16.mxu1 %v5245_v41  ;;  %5021 = vmatprep.subr.bf16.mxu0 %v5246_v26  ;;  %v5250_v40 = vld [vmem:[#allocation7 + $0x230] sm:$0xff]   ;;  %v2592_v60 = vsel %vm2575_vm4, %v2589_v6, %v2591_v44  ;;  %v2595_v6 = vrot.slane %v6002_v17, 5 }
 0x1a6   : > { %4846 = vmatmul.mubr.bf16.gmra.mrb[128].mxu1 %v2588_v48  ;;  %4910 = vmatmul.mubr.bf16.gmra.mrb[128].mxu0 %v5911_v15 }
 0x1a7   : > { %4849 = vmatprep.mubr.bf16.mxu1 %v2590_v37  ;;  %4913 = vmatprep.mubr.bf16.mxu0 %v5929_v42 }
 0x1a8   : > { %4958 = vmatpush3.bf16.msra.mxu1 %v5245_v41  ;;  %5022 = vmatpush3.bf16.msra.mxu0 %v5246_v26  ;;  %v2594_v41 = vsel %vm2575_vm4, %v2591_v44, %v2593_v1 }
 0x1a9   : > { %v4583_v5 = vpop.f32.mrb[24].mxu1  ;;  %v4647_v24 = vpop.f32.mrb[24].mxu0  ;;  %4959 = vmatprep.subr.bf16.mxu1 %v5247_v54  ;;  %5023 = vmatprep.subr.bf16.mxu0 %v5248_v50 }
 0x1aa   : > { %v1186_v31 = vpop.f32.mrb[25].mxu1  ;;  %v1534_v58 = vpop.f32.mrb[25].mxu0  ;;  %v5251_v24 = vld [vmem:[#allocation7 + $0x1f8] sm:$0xff]  }
 0x1ab   : > { %v1187_v48 = vadd.f32 %v1186_v31, %v6458_v12  ;;  %v4584_v15 = vpop.f32.mrb[26].mxu1  ;;  %v4648_v37 = vpop.f32.mrb[26].mxu0  ;;  %v5252_v12 = vld [vmem:[#allocation7 + $0x238] sm:$0xff]  }
 0x1ac   : > { %v1197_v42 = vadd.f32 %v4584_v15, %v6462_v19  ;;  %v1189_v59 = vpop.f32.mrb[27].mxu1  ;;  %v1537_v38 = vpop.f32.mrb[27].mxu0  ;;  %4960 = vmatpush3.bf16.msra.mxu1 %v5247_v54  ;;  %5024 = vmatpush3.bf16.msra.mxu0 %v5248_v50  ;;  %v2597_v50 = vrot.slane %v5707_v27, 5 }
 0x1ad   : > { %v6574_v26 = vadd.f32 %v1534_v58, %v1187_v48  ;;  %v1190_v5 = vadd.f32 %v1189_v59, %v6469_v8  ;;  %4961 = vmatprep.subr.bf16.mxu1 %v5249_v63  ;;  %5025 = vmatprep.subr.bf16.mxu0 %v5250_v40  ;;  %v2596_v48 = vsel %vm2575_vm4, %v2593_v1, %v2595_v6 }
 0x1ae   : > { %v6577_v31 = vadd.f32 %v4648_v37, %v1197_v42  ;;  %4850 = vmatmul.mubr.bf16.gmra.mrb[132].mxu1 %v2592_v60  ;;  %4914 = vmatmul.mubr.bf16.gmra.mrb[132].mxu0 %v5974_v39  ;;  %v2598_v37 = vsel %vm2575_vm4, %v2595_v6, %v2597_v50 }
 0x1af   : > { %v6580_v19 = vadd.f32 %v1537_v38, %v1190_v5  ;;  %4853 = vmatprep.mubr.bf16.mxu1 %v2594_v41  ;;  %4917 = vmatprep.mubr.bf16.mxu0 %v6002_v17 }
 0x1b0   : > { %4962 = vmatpush3.bf16.msra.mxu1 %v5249_v63  ;;  %5026 = vmatpush3.bf16.msra.mxu0 %v5250_v40 }
 0x1b1   : > { %v4587_v8 = vpop.f32.mrb[28].mxu1  ;;  %v4651_v59 = vpop.f32.mrb[28].mxu0  ;;  %4963 = vmatprep.subr.bf16.mxu1 %v5251_v24  ;;  %5027 = vmatprep.subr.bf16.mxu0 %v5252_v12 }
 0x1b2   : > { %v1209_v54 = vadd.f32 %v4587_v8, %v6480_v49  ;;  %v1201_v60 = vpop.f32.mrb[29].mxu1  ;;  %v1549_v44 = vpop.f32.mrb[29].mxu0 }
 0x1b3   : > { %v1202_v39 = vadd.f32 %v1201_v60, %v6484_v14  ;;  %v4588_v38 = vpop.f32.mrb[30].mxu1  ;;  %v4652_v58 = vpop.f32.mrb[30].mxu0  ;;  %v2599_v14 = vrot.slane %v5713_v32, 5 }
 0x1b4   : > { %v6588_v15 = vadd.f32 %v4651_v59, %v1209_v54  ;;  %v1212_v17 = vadd.f32 %v4588_v38, %v6488_v9  ;;  %v1204_v63 = vpop.f32.mrb[31].mxu1  ;;  %v1552_v40 = vpop.f32.mrb[31].mxu0  ;;  %4964 = vmatpush3.bf16.msra.mxu1 %v5251_v24  ;;  %5028 = vmatpush3.bf16.msra.mxu0 %v5252_v12  ;;  %v2601_v9 = vrot.slane %v5742_v55, 5 }
 0x1b5   : > { %v6592_v42 = vadd.f32 %v1549_v44, %v1202_v39  ;;  %v2600_v59 = vsel %vm2575_vm4, %v2597_v50, %v2599_v14  ;;  %v2605_v50 = vrot.slane %v5787_v29, 5 }
 0x1b6   : > { %v6594_v49 = vadd.f32 %v4652_v58, %v1212_v17  ;;  %4854 = vmatmul.mubr.bf16.gmra.mrb[136].mxu1 %v2596_v48  ;;  %4918 = vmatmul.mubr.bf16.gmra.mrb[136].mxu0 %v5707_v27  ;;  %v2602_v44 = vsel %vm2575_vm4, %v2599_v14, %v2601_v9 }
 0x1b7   : > { %4857 = vmatprep.mubr.bf16.mxu1 %v2598_v37  ;;  %4921 = vmatprep.mubr.bf16.mxu0 %v5713_v32 }
 0x1b9   : > { %v4591_v1 = vpop.f32.mrb[32].mxu1  ;;  %v4655_v41 = vpop.f32.mrb[32].mxu0 }
 0x1ba   : > { %v1224_v5 = vadd.f32 %v4591_v1, %v6503_v52  ;;  %v1216_v24 = vpop.f32.mrb[33].mxu1  ;;  %v1564_v12 = vpop.f32.mrb[33].mxu0  ;;  %v2603_v52 = vrot.slane %v5769_v13, 5 }
 0x1bb   : > { %v4592_v6 = vpop.f32.mrb[34].mxu1  ;;  %v4656_v8 = vpop.f32.mrb[34].mxu0 }
 0x1bc   : > { %v6602_v54 = vadd.f32 %v4655_v41, %v1224_v5  ;;  %v1218_v27 = vpop.f32.mrb[35].mxu1  ;;  %v1566_v60 = vpop.f32.mrb[35].mxu0  ;;  %v2604_v37 = vsel %vm2575_vm4, %v2601_v9, %v2603_v52  ;;  %v2606_v41 = vsel %vm2575_vm4, %v2603_v52, %v2605_v50  ;;  %v2609_v9 = vrot.slane %v5854_v18, 5 }
 0x1bd   : > { %v1219_v32 = vadd.f32 %v1218_v27, %v6510_v11 }
 0x1be   : > { %4858 = vmatmul.mubr.bf16.gmra.mrb[140].mxu1 %v2600_v59  ;;  %4922 = vmatmul.mubr.bf16.gmra.mrb[140].mxu0 %v5742_v55 }
 0x1bf   : > { %v6607_v39 = vadd.f32 %v1566_v60, %v1219_v32  ;;  %4861 = vmatprep.mubr.bf16.mxu1 %v2602_v44  ;;  %4925 = vmatprep.mubr.bf16.mxu0 %v5769_v13 }
 0x1c1   : > { %v4595_v38 = vpop.f32.mrb[36].mxu1  ;;  %v4659_v58 = vpop.f32.mrb[36].mxu0 }
 0x1c2   : > { %v1230_v48 = vpop.f32.mrb[37].mxu1  ;;  %v1578_v17 = vpop.f32.mrb[37].mxu0 }
 0x1c3   : > { %v1231_v63 = vadd.f32 %v1230_v48, %v6518_v56  ;;  %v4596_v40 = vpop.f32.mrb[38].mxu1  ;;  %v4660_v11 = vpop.f32.mrb[38].mxu0 }
 0x1c4   : > { %v1241_v55 = vadd.f32 %v4596_v40, %v6522_v10  ;;  %v1233_v14 = vpop.f32.mrb[39].mxu1  ;;  %v1581_v1 = vpop.f32.mrb[39].mxu0  ;;  %v2607_v10 = vrot.slane %v5817_v2, 5 }
 0x1c5   : > { %v6616_v5 = vadd.f32 %v1578_v17, %v1231_v63  ;;  %v1234_v13 = vadd.f32 %v1233_v14, %v6527_v23 }
 0x1c6   : > { %v6619_v24 = vadd.f32 %v4660_v11, %v1241_v55  ;;  %4862 = vmatmul.mubr.bf16.gmra.mrb[144].mxu1 %v2604_v37  ;;  %4926 = vmatmul.mubr.bf16.gmra.mrb[144].mxu0 %v5787_v29  ;;  %v2608_v29 = vsel %vm2575_vm4, %v2605_v50, %v2607_v10  ;;  %v2610_v58 = vsel %vm2575_vm4, %v2607_v10, %v2609_v9 }
 0x1c7   : > { %v6622_v56 = vadd.f32 %v1581_v1, %v1234_v13  ;;  %4865 = vmatprep.mubr.bf16.mxu1 %v2606_v41  ;;  %4929 = vmatprep.mubr.bf16.mxu0 %v5817_v2 }
 0x1c9   : > { %v4599_v12 = vpop.f32.mrb[40].mxu1  ;;  %v4663_v6 = vpop.f32.mrb[40].mxu0 }
 0x1ca   : > { %v1253_v8 = vadd.f32 %v4599_v12, %v6538_v51  ;;  %v1245_v59 = vpop.f32.mrb[41].mxu1  ;;  %v1593_v23 = vpop.f32.mrb[41].mxu0  ;;  %v2611_v51 = vrot.slane %v5888_v33, 5 }
 0x1cb   : > { %v1246_v27 = vadd.f32 %v1245_v59, %v6542_v28  ;;  %v4600_v60 = vpop.f32.mrb[42].mxu1  ;;  %v4664_v44 = vpop.f32.mrb[42].mxu0  ;;  %v2613_v28 = vrot.slane %v5913_v16, 5 }
 0x1cc   : > { %v6630_v32 = vadd.f32 %v4663_v6, %v1253_v8  ;;  %v1256_v52 = vadd.f32 %v4600_v60, %v6546_v4  ;;  %v1248_v38 = vpop.f32.mrb[43].mxu1  ;;  %v1596_v2 = vpop.f32.mrb[43].mxu0  ;;  %v2612_v14 = vsel %vm2575_vm4, %v2609_v9, %v2611_v51  ;;  %v2617_v9 = vrot.slane %v5980_v47, 5 }
 0x1cd   : > { %v6634_v48 = vadd.f32 %v1593_v23, %v1246_v27  ;;  %v2614_v13 = vsel %vm2575_vm4, %v2611_v51, %v2613_v28 }
 0x1ce   : > { %v6636_v17 = vadd.f32 %v4664_v44, %v1256_v52  ;;  %4866 = vmatmul.mubr.bf16.gmra.mrb[148].mxu1 %v2608_v29  ;;  %4930 = vmatmul.mubr.bf16.gmra.mrb[148].mxu0 %v5854_v18 }
 0x1cf   : > { %4869 = vmatprep.mubr.bf16.mxu1 %v2610_v58  ;;  %4933 = vmatprep.mubr.bf16.mxu0 %v5888_v33  ;;  %v2621_v58 = vrot.slane %v6028_v43, 5 }
 0x1d1   : > { %v4603_v50 = vpop.f32.mrb[44].mxu1  ;;  %v4667_v4 = vpop.f32.mrb[44].mxu0 }
 0x1d2   : > { %v1268_v63 = vadd.f32 %v4603_v50, %v6556_v53  ;;  %v1260_v40 = vpop.f32.mrb[45].mxu1  ;;  %v1608_v11 = vpop.f32.mrb[45].mxu0  ;;  %v2615_v53 = vrot.slane %v5952_v61, 5 }
 0x1d3   : > { %v4604_v37 = vpop.f32.mrb[46].mxu1  ;;  %v4668_v55 = vpop.f32.mrb[46].mxu0 }
 0x1d4   : > { %v6644_v1 = vadd.f32 %v4667_v4, %v1268_v63  ;;  %v1262_v18 = vpop.f32.mrb[47].mxu1  ;;  %v1610_v41 = vpop.f32.mrb[47].mxu0  ;;  %v2616_v60 = vsel %vm2575_vm4, %v2613_v28, %v2615_v53  ;;  %v2618_v52 = vsel %vm2575_vm4, %v2615_v53, %v2617_v9  ;;  %v414_v37 = vld [vmem:[%s5674_s6 + $0x10] sm:$0xf]  ;;  %v415_v55 = vld [vmem:[%s5674_s6 + $0x14] sm:$0xf] }
 0x1d5   : > { %v1263_v33 = vadd.f32 %v1262_v18, %v6561_v20  ;;  %v423_v53 = vmax.bf16 %v7352_v34, %v415_v55 }
 0x1d6   : > { %4870 = vmatmul.mubr.bf16.gmra.mrb[152].mxu1 %v2612_v14  ;;  %4934 = vmatmul.mubr.bf16.gmra.mrb[152].mxu0 %v5913_v16 }
 0x1d7   : > { %v6649_v10 = vadd.f32 %v1610_v41, %v1263_v33  ;;  %4873 = vmatprep.mubr.bf16.mxu1 %v2614_v13  ;;  %4937 = vmatprep.mubr.bf16.mxu0 %v5952_v61 }
 0x1d9   : > { %v4607_v12 = vpop.f32.mrb[48].mxu1  ;;  %v4671_v6 = vpop.f32.mrb[48].mxu0 }
 0x1da   : > { %v1274_v8 = vpop.f32.mrb[49].mxu1  ;;  %v1622_v59 = vpop.f32.mrb[49].mxu0 }
 0x1db   : > { %v1275_v23 = vadd.f32 %v1274_v8, %v6460_v7  ;;  %v4608_v27 = vpop.f32.mrb[50].mxu1  ;;  %v4672_v20 = vpop.f32.mrb[50].mxu0 }
 0x1dc   : > { %v1285_v16 = vadd.f32 %v4608_v27, %v6464_v3  ;;  %v1277_v44 = vpop.f32.mrb[51].mxu1  ;;  %v1625_v29 = vpop.f32.mrb[51].mxu0  ;;  %v2619_v3 = vrot.slane %v6004_v45, 5 }
 0x1dd   : > { %v6658_v38 = vadd.f32 %v1622_v59, %v1275_v23  ;;  %v1278_v61 = vadd.f32 %v1277_v44, %v6471_v57 }
 0x1de   : > { %v6661_v2 = vadd.f32 %v4672_v20, %v1285_v16  ;;  %4874 = vmatmul.mubr.bf16.gmra.mrb[156].mxu1 %v2616_v60  ;;  %4938 = vmatmul.mubr.bf16.gmra.mrb[156].mxu0 %v5980_v47  ;;  %v2620_v11 = vsel %vm2575_vm4, %v2617_v9, %v2619_v3  ;;  %v2622_v13 = vsel %vm2575_vm4, %v2619_v3, %v2621_v58 }
 0x1df   : > { %v6664_v7 = vadd.f32 %v1625_v29, %v1278_v61  ;;  %4877 = vmatprep.mubr.bf16.mxu1 %v2618_v52  ;;  %4941 = vmatprep.mubr.bf16.mxu0 %v6004_v45 }
 0x1e1   : > { %v4611_v51 = vpop.f32.mrb[52].mxu1  ;;  %v4675_v28 = vpop.f32.mrb[52].mxu0 }
 0x1e2   : > { %v1297_v57 = vadd.f32 %v4611_v51, %v6482_v21  ;;  %v1289_v50 = vpop.f32.mrb[53].mxu1  ;;  %v1637_v4 = vpop.f32.mrb[53].mxu0 }
 0x1e3   : > { %v1290_v63 = vadd.f32 %v1289_v50, %v6486_v22  ;;  %v4612_v40 = vpop.f32.mrb[54].mxu1  ;;  %v4676_v47 = vpop.f32.mrb[54].mxu0  ;;  %v422_v22 = vmax.bf16 %v7352_v34, %v414_v37 }
 0x1e4   : > { %v6674_v14 = vadd.f32 %v4675_v28, %v1297_v57  ;;  %v1300_v45 = vadd.f32 %v4612_v40, %v6490_v30  ;;  %v1292_v18 = vpop.f32.mrb[55].mxu1  ;;  %v1640_v41 = vpop.f32.mrb[55].mxu0  ;;  %v2623_v30 = vrot.slane %v6467_v46, 5 }
 0x1e5   : > { %v6678_v33 = vadd.f32 %v1637_v4, %v1290_v63  ;;  %v6688_v23 = vcombine.low %v422_v22, %v423_v53  ;;  %v7360_v4 = vld [vmem:[#allocation57_spill] sm:$0xff]  ;;  %v7364_v18 = vld [vmem:[#allocation22_spill] sm:$0xff]  ;;  %v7366_v22 = vld [vmem:[#allocation59_spill] sm:$0xff] }
 0x1e6   : > { %v6680_v21 = vadd.f32 %v4676_v47, %v1300_v45  ;;  %4878 = vmatmul.mubr.bf16.gmra.mrb[160].mxu1 %v2620_v11  ;;  %4942 = vmatmul.mubr.bf16.gmra.mrb[160].mxu0 %v6028_v43  ;;  %v2624_v60 = vsel %vm2575_vm4, %v2621_v58, %v2623_v30  ;;  %v7361_v11 = vld [vmem:[#allocation58_spill] sm:$0xff] }
 0x1e7   : > { %4881 = vmatprep.mubr.bf16.mxu1 %v2622_v13  ;;  %4945 = vmatprep.mubr.bf16.mxu0 %v6467_v46 }
 0x1e9   : > { %v4615_v9 = vpop.f32.mrb[56].mxu1  ;;  %v4679_v12 = vpop.f32.mrb[56].mxu0 }
 0x1ea   : > { %v1312_v6 = vadd.f32 %v4615_v9, %v6505_v35  ;;  %v1304_v8 = vpop.f32.mrb[57].mxu1  ;;  %v1652_v59 = vpop.f32.mrb[57].mxu0 }
 0x1eb   : > { %v4616_v27 = vpop.f32.mrb[58].mxu1  ;;  %v4680_v20 = vpop.f32.mrb[58].mxu0 }
 0x1ec   : > { %v6691_v16 = vadd.f32 %v4679_v12, %v1312_v6  ;;  %v1306_v44 = vpop.f32.mrb[59].mxu1  ;;  %v1654_v29 = vpop.f32.mrb[59].mxu0  ;;  %v7367_v12 = vld [vmem:[#allocation60_spill] sm:$0xff]  ;;  %v7368_v20 = vld [vmem:[#allocation61_spill] sm:$0xff] }
 0x1ed   : > { %v1307_v52 = vadd.f32 %v1306_v44, %v6512_v0 }
 0x1ee   : > { %4882 = vmatmul.mubr.bf16.gmra.mrb[164].mxu1 %v2624_v60  ;;  %4946 = vmatmul.mubr.bf16.gmra.mrb[164].mxu0 %v6688_v23 }
 0x1ef   : > { %v6695_v61 = vadd.f32 %v1654_v29, %v1307_v52  ;;  %4965 = vmatprep.mubr.bf16.mxu1 %v5860_v25  ;;  %5029 = vmatprep.mubr.bf16.mxu0 %v6161_v36  ;;  %v7362_v25 = vld [vmem:[#allocation20_spill] sm:$0xff]  ;;  %v7363_v36 = vld [vmem:[#allocation37_spill] sm:$0xff] }
 0x1f1   : > { %v4619_v35 = vpop.f32.mrb[60].mxu1  ;;  %v4683_v3 = vpop.f32.mrb[60].mxu0 }
 0x1f2   : > { %v1318_v51 = vpop.f32.mrb[61].mxu1  ;;  %v1666_v28 = vpop.f32.mrb[61].mxu0  ;;  %v7369_v3 = vld [vmem:[#allocation24_spill] sm:$0xff] }
 0x1f3   : > { %v1319_v58 = vadd.f32 %v1318_v51, %v6520_v62  ;;  %v4620_v57 = vpop.f32.mrb[62].mxu1  ;;  %v4684_v50 = vpop.f32.mrb[62].mxu0  ;;  %v7365_v62 = vld [vmem:[#allocation38_spill] sm:$0xff]  ;;  %v7370_v51 = vld [vmem:[#allocation39_spill] sm:$0xff] }
 0x1f4   : > { %v1329_v63 = vadd.f32 %v4620_v57, %v7360_v4  ;;  %v1321_v0 = vpop.f32.mrb[63].mxu1  ;;  %v1669_v40 = vpop.f32.mrb[63].mxu0  ;;  %v7373_v4 = vld [vmem:[#allocation62_spill] sm:$0xff] }
 0x1f5   : > { %v6701_v47 = vadd.f32 %v1666_v28, %v1319_v58  ;;  %v1322_v37 = vadd.f32 %v1321_v0, %v7361_v11  ;;  %v7371_v28 = vld [vmem:[#allocation26_spill] sm:$0xff]  ;;  %v7372_v58 = vld [vmem:[#allocation40_spill] sm:$0xff] }
 0x1f6   : > { %v6704_v55 = vadd.f32 %v4684_v50, %v1329_v63  ;;  %4966 = vmatmul.mubr.bf16.vlgmr.msra.gmra.mrb[168].mxu1 %v7362_v25  ;;  %5030 = vmatmul.mubr.bf16.vlgmr.msra.gmra.mrb[168].mxu0 %v7363_v36 }
 0x1f7   : > { %v6708_v45 = vadd.f32 %v1669_v40, %v1322_v37  ;;  %4969 = vmatprep.mubr.bf16.mxu1 %v7364_v18  ;;  %5033 = vmatprep.mubr.bf16.mxu0 %v7365_v62  ;;  %v7374_v62 = vld [vmem:[#allocation63_spill] sm:$0xff] }
 0x1f9   : > { %v4623_v41 = vpop.f32.mrb[64].mxu1  ;;  %v4687_v13 = vpop.f32.mrb[64].mxu0 }
 0x1fa   : > { %v1341_v53 = vadd.f32 %v4623_v41, %v7366_v22  ;;  %v1333_v30 = vpop.f32.mrb[65].mxu1  ;;  %v1681_v9 = vpop.f32.mrb[65].mxu0  ;;  %v7376_v22 = vld [vmem:[#allocation41_spill] sm:$0xff] }
 0x1fb   : > { %v1334_v6 = vadd.f32 %v1333_v30, %v7367_v12  ;;  %v4624_v8 = vpop.f32.mrb[66].mxu1  ;;  %v4688_v59 = vpop.f32.mrb[66].mxu0  ;;  %v7377_v30 = vld [vmem:[#allocation30_spill] sm:$0xff] }
 0x1fc   : > { %v6714_v27 = vadd.f32 %v4687_v13, %v1341_v53  ;;  %v1344_v60 = vadd.f32 %v4624_v8, %v7368_v20  ;;  %v1336_v44 = vpop.f32.mrb[67].mxu1  ;;  %v1684_v29 = vpop.f32.mrb[67].mxu0  ;;  %v7375_v13 = vld [vmem:[#allocation28_spill] sm:$0xff] }
 0x1fd   : > { %v6717_v52 = vadd.f32 %v1681_v9, %v1334_v6  ;;  %v7378_v9 = vld [vmem:[#allocation42_spill] sm:$0xff] }
 0x1fe   : > { %v6719_v35 = vadd.f32 %v4688_v59, %v1344_v60  ;;  %4970 = vmatmul.mubr.bf16.gmra.mrb[172].mxu1 %v7369_v3  ;;  %5034 = vmatmul.mubr.bf16.gmra.mrb[172].mxu0 %v7370_v51 }
 0x1ff   : > { %4973 = vmatprep.mubr.bf16.mxu1 %v7371_v28  ;;  %5037 = vmatprep.mubr.bf16.mxu0 %v7372_v58 }
 0x201   : > { %v4627_v57 = vpop.f32.mrb[68].mxu1  ;;  %v4691_v50 = vpop.f32.mrb[68].mxu0 }
 0x202   : > { %v1356_v63 = vadd.f32 %v4627_v57, %v7373_v4  ;;  %v1348_v0 = vpop.f32.mrb[69].mxu1  ;;  %v1696_v40 = vpop.f32.mrb[69].mxu0  ;;  %v7380_v4 = vld [vmem:[#allocation43_spill] sm:$0xff] }
 0x203   : > { %v4628_v11 = vpop.f32.mrb[70].mxu1  ;;  %v4692_v37 = vpop.f32.mrb[70].mxu0  ;;  %v7381_v0 = vld [vmem:[#allocation35_spill] sm:$0xff] }
 0x204   : > { %v6726_v25 = vadd.f32 %v4691_v50, %v1356_v63  ;;  %v1350_v36 = vpop.f32.mrb[71].mxu1  ;;  %v1698_v18 = vpop.f32.mrb[71].mxu0  ;;  %v7379_v50 = vld [vmem:[#allocation32_spill] sm:$0xff] }
 0x205   : > { %v1351_v41 = vadd.f32 %v1350_v36, %v7374_v62 }
 0x206   : > { %4974 = vmatmul.mubr.bf16.gmra.mrb[176].mxu1 %v7375_v13  ;;  %5038 = vmatmul.mubr.bf16.gmra.mrb[176].mxu0 %v7376_v22 }
 0x207   : > { %v6731_v53 = vadd.f32 %v1698_v18, %v1351_v41  ;;  %4977 = vmatprep.mubr.bf16.mxu1 %v7377_v30  ;;  %5041 = vmatprep.mubr.bf16.mxu0 %v7378_v9 }
 0x209   : > { %v4711_v12 = vpop.f32.mrb[72].mxu1  ;;  %v4775_v6 = vpop.f32.mrb[72].mxu0 }
 0x20a   : > { %v1914_v8 = vpop.f32.mrb[73].mxu1  ;;  %v2351_v59 = vpop.f32.mrb[73].mxu0  ;;  %v7383_v6 = vld [vmem:[#allocation16_spill] sm:$0xff] }
 0x20b   : > { %v2089_v20 = vadd.f32 %v1914_v8, %v6574_v26  ;;  %v4712_v60 = vpop.f32.mrb[74].mxu1  ;;  %v4776_v44 = vpop.f32.mrb[74].mxu0  ;;  %v7382_v26 = vld [vmem:[#allocation44_spill] sm:$0xff]  ;;  %v7384_v8 = vld [vmem:[#allocation45_spill] sm:$0xff] }
 0x20c   : > { %v2091_v29 = vadd.f32 %v4712_v60, %v6577_v31  ;;  %v1917_v3 = vpop.f32.mrb[75].mxu1  ;;  %v2354_v51 = vpop.f32.mrb[75].mxu0 }
 0x20d   : > { %v6737_v28 = vadd.f32 %v2351_v59, %v2089_v20  ;;  %v2090_v58 = vadd.f32 %v1917_v3, %v6580_v19  ;;  %v7386_v59 = vld [vmem:[#allocation46_spill] sm:$0xff] }
 0x20e   : > { %v6740_v57 = vadd.f32 %v4776_v44, %v2091_v29  ;;  %4978 = vmatmul.mubr.bf16.gmra.mrb[180].mxu1 %v7379_v50  ;;  %5042 = vmatmul.mubr.bf16.gmra.mrb[180].mxu0 %v7380_v4 }
 0x20f   : > { %v6744_v63 = vadd.f32 %v2354_v51, %v2090_v58  ;;  %4981 = vmatprep.mubr.bf16.mxu1 %v7381_v0  ;;  %5045 = vmatprep.mubr.bf16.mxu0 %v7382_v26  ;;  %v7387_v0 = vld [vmem:[#allocation18_spill] sm:$0xff]  ;;  %v7388_v26 = vld [vmem:[#allocation47_spill] sm:$0xff] }
 0x211   : > { %v4715_v40 = vpop.f32.mrb[76].mxu1  ;;  %v4779_v31 = vpop.f32.mrb[76].mxu0 }
 0x212   : > { %v2093_v11 = vadd.f32 %v4715_v40, %v6588_v15  ;;  %v1929_v37 = vpop.f32.mrb[77].mxu1  ;;  %v2366_v36 = vpop.f32.mrb[77].mxu0  ;;  %v7385_v15 = vld [vmem:[#allocation17_spill] sm:$0xff] }
 0x213   : > { %v2092_v19 = vadd.f32 %v1929_v37, %v6592_v42  ;;  %v4716_v18 = vpop.f32.mrb[78].mxu1  ;;  %v4780_v62 = vpop.f32.mrb[78].mxu0 }
 0x214   : > { %v6750_v41 = vadd.f32 %v4779_v31, %v2093_v11  ;;  %v2094_v13 = vadd.f32 %v4716_v18, %v6594_v49  ;;  %v1932_v22 = vpop.f32.mrb[79].mxu1  ;;  %v2369_v30 = vpop.f32.mrb[79].mxu0  ;;  %v7389_v31 = vld [vmem:[#allocation19_spill] sm:$0xff]  ;;  %v7390_v11 = vld [vmem:[#allocation48_spill] sm:$0xff] }
 0x215   : > { %v6753_v9 = vadd.f32 %v2366_v36, %v2092_v19 }
 0x216   : > { %v6755_v12 = vadd.f32 %v4780_v62, %v2094_v13  ;;  %4982 = vmatmul.mubr.bf16.gmra.mrb[184].mxu1 %v7383_v6  ;;  %5046 = vmatmul.mubr.bf16.gmra.mrb[184].mxu0 %v7384_v8 }
 0x217   : > { %4985 = vmatprep.mubr.bf16.mxu1 %v7385_v15  ;;  %5049 = vmatprep.mubr.bf16.mxu0 %v7386_v59  ;;  %v7391_v59 = vld [vmem:[#allocation21_spill] sm:$0xff] }
 0x219   : > { %v4719_v42 = vpop.f32.mrb[80].mxu1  ;;  %v4783_v20 = vpop.f32.mrb[80].mxu0 }
 0x21a   : > { %v2096_v60 = vadd.f32 %v4719_v42, %v6602_v54  ;;  %v1944_v44 = vpop.f32.mrb[81].mxu1  ;;  %v2381_v49 = vpop.f32.mrb[81].mxu0  ;;  %v7392_v42 = vld [vmem:[#allocation49_spill] sm:$0xff] }
 0x21b   : > { %v4720_v29 = vpop.f32.mrb[82].mxu1  ;;  %v4784_v3 = vpop.f32.mrb[82].mxu0 }
 0x21c   : > { %v6762_v51 = vadd.f32 %v4783_v20, %v2096_v60  ;;  %v1946_v58 = vpop.f32.mrb[83].mxu1  ;;  %v2383_v50 = vpop.f32.mrb[83].mxu0  ;;  %v7393_v60 = vld [vmem:[#allocation23_spill] sm:$0xff] }
 0x21d   : > { %v2095_v4 = vadd.f32 %v1946_v58, %v6607_v39 }
 0x21e   : > { %4986 = vmatmul.mubr.bf16.gmra.mrb[188].mxu1 %v7387_v0  ;;  %5050 = vmatmul.mubr.bf16.gmra.mrb[188].mxu0 %v7388_v26 }
 0x21f   : > { %v6767_v40 = vadd.f32 %v2383_v50, %v2095_v4  ;;  %4989 = vmatprep.mubr.bf16.mxu1 %v7389_v31  ;;  %5053 = vmatprep.mubr.bf16.mxu0 %v7390_v11 }
 0x221   : > { %v4723_v54 = vpop.f32.mrb[84].mxu1  ;;  %v4787_v37 = vpop.f32.mrb[84].mxu0 }
 0x222   : > { %v1958_v36 = vpop.f32.mrb[85].mxu1  ;;  %v2395_v19 = vpop.f32.mrb[85].mxu0  ;;  %v7395_v37 = vld [vmem:[#allocation25_spill] sm:$0xff] }
 0x223   : > { %v2097_v18 = vadd.f32 %v1958_v36, %v6616_v5  ;;  %v4724_v62 = vpop.f32.mrb[86].mxu1  ;;  %v4788_v13 = vpop.f32.mrb[86].mxu0  ;;  %v7394_v5 = vld [vmem:[#allocation50_spill] sm:$0xff]  ;;  %v7396_v36 = vld [vmem:[#allocation51_spill] sm:$0xff] }
 0x224   : > { %v2099_v39 = vadd.f32 %v4724_v62, %v6619_v24  ;;  %v1961_v22 = vpop.f32.mrb[87].mxu1  ;;  %v2398_v30 = vpop.f32.mrb[87].mxu0 }
 0x225   : > { %v6773_v6 = vadd.f32 %v2395_v19, %v2097_v18  ;;  %v2098_v8 = vadd.f32 %v1961_v22, %v6622_v56  ;;  %v7398_v19 = vld [vmem:[#allocation52_spill] sm:$0xff] }
 0x226   : > { %v6776_v15 = vadd.f32 %v4788_v13, %v2099_v39  ;;  %4990 = vmatmul.mubr.bf16.gmra.mrb[192].mxu1 %v7391_v59  ;;  %5054 = vmatmul.mubr.bf16.gmra.mrb[192].mxu0 %v7392_v42 }
 0x227   : > { %v6780_v20 = vadd.f32 %v2398_v30, %v2098_v8  ;;  %4993 = vmatprep.mubr.bf16.mxu1 %v7393_v60  ;;  %5057 = vmatprep.mubr.bf16.mxu0 %v7394_v5  ;;  %v7399_v60 = vld [vmem:[#allocation29_spill] sm:$0xff] }
 0x228   : > { %v7400_v5 = vld [vmem:[#allocation53_spill] sm:$0xff] }
 0x229   : > { %v4727_v44 = vpop.f32.mrb[88].mxu1  ;;  %v4791_v24 = vpop.f32.mrb[88].mxu0 }
 0x22a   : > { %v2101_v49 = vadd.f32 %v4727_v44, %v6630_v32  ;;  %v1973_v29 = vpop.f32.mrb[89].mxu1  ;;  %v2410_v3 = vpop.f32.mrb[89].mxu0  ;;  %v7397_v32 = vld [vmem:[#allocation27_spill] sm:$0xff] }
 0x22b   : > { %v2100_v56 = vadd.f32 %v1973_v29, %v6634_v48  ;;  %v4728_v58 = vpop.f32.mrb[90].mxu1  ;;  %v4792_v50 = vpop.f32.mrb[90].mxu0  ;;  %v417_v29 = vld [vmem:[%s5674_s6 + $0x1c] sm:$0xf] }
 0x22c   : > { %v6786_v4 = vadd.f32 %v4791_v24, %v2101_v49  ;;  %v2102_v0 = vadd.f32 %v4728_v58, %v6636_v17  ;;  %v1976_v26 = vpop.f32.mrb[91].mxu1  ;;  %v2413_v31 = vpop.f32.mrb[91].mxu0  ;;  %v7401_v24 = vld [vmem:[#allocation31_spill] sm:$0xff]  ;;  %v7402_v49 = vld [vmem:[#allocation54_spill] sm:$0xff] }
 0x22d   : > { %v6789_v11 = vadd.f32 %v2410_v3, %v2100_v56 }
 0x22e   : > { %v6791_v54 = vadd.f32 %v4792_v50, %v2102_v0  ;;  %4994 = vmatmul.mubr.bf16.gmra.mrb[196].mxu1 %v7395_v37  ;;  %5058 = vmatmul.mubr.bf16.gmra.mrb[196].mxu0 %v7396_v36  ;;  %v425_v37 = vmax.bf16 %v7352_v34, %v417_v29  ;;  %v3589_v29 = vrot.slane %v6688_v23, 1 }
 0x22f   : > { %4997 = vmatprep.mubr.bf16.mxu1 %v7397_v32  ;;  %5061 = vmatprep.mubr.bf16.mxu0 %v7398_v19 }
 0x231   : > { %v4731_v48 = vpop.f32.mrb[92].mxu1  ;;  %v4795_v18 = vpop.f32.mrb[92].mxu0 }
 0x232   : > { %v2104_v17 = vadd.f32 %v4731_v48, %v6644_v1  ;;  %v1988_v62 = vpop.f32.mrb[93].mxu1  ;;  %v2425_v13 = vpop.f32.mrb[93].mxu0  ;;  %v416_v1 = vld [vmem:[%s5674_s6 + $0x18] sm:$0xf]  ;;  %v3266_v48 = vshll.u32 %v6688_v23, 16 }
 0x233   : > { %v4732_v39 = vpop.f32.mrb[94].mxu1  ;;  %v4796_v22 = vpop.f32.mrb[94].mxu0  ;;  %v424_v31 = vmax.bf16 %v7352_v34, %v416_v1  ;;  %v7403_v13 = vld [vmem:[#allocation33_spill] sm:$0xff] }
 0x234   : > { %v6798_v30 = vadd.f32 %v4795_v18, %v2104_v17  ;;  %v1990_v8 = vpop.f32.mrb[95].mxu1  ;;  %v2427_v59 = vpop.f32.mrb[95].mxu0  ;;  %v7405_v39 = vld [vmem:[#allocation34_spill] sm:$0xff]  ;;  %v7406_v22 = vshrl.u32 %v6028_v43, 16  ;;  %v3268_v1 = vrot.slane %v3266_v48, 1 }
 0x235   : > { %v2103_v42 = vadd.f32 %v1990_v8, %v6649_v10 }
 0x236   : > { %4998 = vmatmul.mubr.bf16.gmra.mrb[200].mxu1 %v7399_v60  ;;  %5062 = vmatmul.mubr.bf16.gmra.mrb[200].mxu0 %v7400_v5  ;;  %v3261_v34 = vor.u32 %v7406_v22, %v7405_v39  ;;  %v7409_v60 = vld [vmem:[#allocation56_spill] sm:$0xff]  ;;  %v4133_v5 = vcombine.low %v424_v31, %v425_v37  ;;  %v7411_v31 = vrot.slane %v6028_v43, 1  ;;  %v3270_v37 = vshrl.u32 %v6688_v23, 16 }
 0x237   : > { %v6803_v44 = vadd.f32 %v2427_v59, %v2103_v42  ;;  %5001 = vmatprep.mubr.bf16.mxu1 %v7401_v24  ;;  %5065 = vmatprep.mubr.bf16.mxu0 %v7402_v49  ;;  %v7408_v42 = vld [vmem:[#allocation36_spill] sm:$0xff]  ;;  %v7410_v24 = vshrl.u32 %v6467_v46, 16 }
 0x238   : > { %v3272_v43 = vor.u32 %v3270_v37, %v3268_v1 }
 0x239   : > { %v4735_v3 = vpop.f32.mrb[96].mxu1  ;;  %v4799_v56 = vpop.f32.mrb[96].mxu0 }
 0x23a   : > { %v2002_v58 = vpop.f32.mrb[97].mxu1  ;;  %v2439_v50 = vpop.f32.mrb[97].mxu0 }
 0x23b   : > { %v2105_v0 = vadd.f32 %v2002_v58, %v6658_v38  ;;  %v4736_v26 = vpop.f32.mrb[98].mxu1  ;;  %v4800_v10 = vpop.f32.mrb[98].mxu0  ;;  %v7404_v38 = vld [vmem:[#allocation55_spill] sm:$0xff] }
 0x23c   : > { %v2107_v36 = vadd.f32 %v4736_v26, %v6661_v2  ;;  %v2005_v32 = vpop.f32.mrb[99].mxu1  ;;  %v2442_v19 = vpop.f32.mrb[99].mxu0  ;;  %v7407_v2 = vshll.u32 %v6467_v46, 16 }
 0x23d   : > { %v6814_v18 = vadd.f32 %v2439_v50, %v2105_v0  ;;  %v2106_v17 = vadd.f32 %v2005_v32, %v6664_v7  ;;  %v3587_v7 = vrot.slane %v6467_v46, 1 }
 0x23e   : > { %v6817_v62 = vadd.f32 %v4800_v10, %v2107_v36  ;;  %5002 = vmatmul.mubr.bf16.gmra.mrb[204].mxu1 %v7403_v13  ;;  %5066 = vmatmul.mubr.bf16.gmra.mrb[204].mxu0 %v7404_v38  ;;  %v3262_v8 = vrot.slane %v7407_v2, 1 }
 0x23f   : > { %v6826_v59 = vadd.f32 %v2442_v19, %v2106_v17  ;;  %5005 = vmatprep.mubr.bf16.mxu1 %v7408_v42  ;;  %5069 = vmatprep.mubr.bf16.mxu0 %v7409_v60  ;;  %v3588_v46 = vsel %vm1378_vm1, %v7411_v31, %v3587_v7  ;;  %v3274_v19 = vshll.u32 %v4133_v5, 16  ;;  %v3590_v39 = vsel %vm1378_vm1, %v3587_v7, %v3589_v29 }
 0x240   : > { %v3264_v49 = vor.u32 %v3262_v8, %v7410_v24  ;;  %v3263_v26 = vsel %vm626_vm0, %v3261_v34, %v3262_v8  ;;  %v3591_v34 = vrot.slane %v4133_v5, 1 }
 0x241   : > { %v4739_v3 = vpop.f32.mrb[100].mxu1  ;;  %v4803_v56 = vpop.f32.mrb[100].mxu0  ;;  %v3276_v23 = vrot.slane %v3274_v19, 1 }
 0x242   : > { %v2109_v58 = vadd.f32 %v4739_v3, %v6674_v14  ;;  %v2017_v50 = vpop.f32.mrb[101].mxu1  ;;  %v2454_v0 = vpop.f32.mrb[101].mxu0  ;;  %v3269_v38 = vsel %vm626_vm0, %v3264_v49, %v3268_v1  ;;  %v3592_v3 = vsel %vm1378_vm1, %v3589_v29, %v3591_v34 }
 0x243   : > { %v2108_v10 = vadd.f32 %v2017_v50, %v6678_v33  ;;  %v4740_v36 = vpop.f32.mrb[102].mxu1  ;;  %v4804_v32 = vpop.f32.mrb[102].mxu0  ;;  %v3277_v7 = vsel %vm626_vm0, %v3272_v43, %v3276_v23 }
 0x244   : > { %v6841_v48 = vadd.f32 %v4803_v56, %v2109_v58  ;;  %v2110_v17 = vadd.f32 %v4740_v36, %v6680_v21  ;;  %v2020_v14 = vpop.f32.mrb[103].mxu1  ;;  %v2457_v13 = vpop.f32.mrb[103].mxu0 }
 0x245   : > { %v6846_v33 = vadd.f32 %v2454_v0, %v2108_v10 }
 0x246   : > { %v6848_v22 = vadd.f32 %v4804_v32, %v2110_v17  ;;  %5006 = vmatmul.mubr.bf16.gmra.mrb[208].mxu1 %v3263_v26  ;;  %5070 = vmatmul.mubr.bf16.gmra.mrb[208].mxu0 %v3588_v46 }
 0x247   : > { %5009 = vmatprep.mubr.bf16.mxu1 %v3269_v38  ;;  %5073 = vmatprep.mubr.bf16.mxu0 %v3590_v39 }
 0x249   : > { %v4743_v2 = vpop.f32.mrb[104].mxu1  ;;  %v4807_v8 = vpop.f32.mrb[104].mxu0 }
 0x24a   : > { %v2112_v21 = vadd.f32 %v4743_v2, %v6691_v16  ;;  %v2032_v42 = vpop.f32.mrb[105].mxu1  ;;  %v2469_v60 = vpop.f32.mrb[105].mxu0 }
 0x24b   : > { %v4744_v24 = vpop.f32.mrb[106].mxu1  ;;  %v4808_v49 = vpop.f32.mrb[106].mxu0 }
 0x24c   : > { %v6853_v56 = vadd.f32 %v4807_v8, %v2112_v21  ;;  %v2034_v58 = vpop.f32.mrb[107].mxu1  ;;  %v2471_v50 = vpop.f32.mrb[107].mxu0 }
 0x24d   : > { %v2111_v1 = vadd.f32 %v2034_v58, %v6695_v61 }
 0x24e   : > { %5010 = vmatmul.mubr.bf16.gmra.mrb[212].mxu1 %v3277_v7  ;;  %5074 = vmatmul.mubr.bf16.gmra.mrb[212].mxu0 %v3592_v3 }
 0x24f   : > { %v6856_v5 = vadd.f32 %v2471_v50, %v2111_v1 }
 0x251   : > { %v4747_v0 = vpop.f32.mrb[108].mxu1  ;;  %v4811_v16 = vpop.f32.mrb[108].mxu0 }
 0x252   : > { %v2046_v26 = vpop.f32.mrb[109].mxu1  ;;  %v2483_v10 = vpop.f32.mrb[109].mxu0 }
 0x253   : > { %v2113_v36 = vadd.f32 %v2046_v26, %v6701_v47  ;;  %v4748_v32 = vpop.f32.mrb[110].mxu1  ;;  %v4812_v31 = vpop.f32.mrb[110].mxu0 }
 0x254   : > { %v2115_v29 = vadd.f32 %v4748_v32, %v6704_v55  ;;  %v2049_v46 = vpop.f32.mrb[111].mxu1  ;;  %v2486_v37 = vpop.f32.mrb[111].mxu0 }
 0x255   : > { %v6860_v19 = vadd.f32 %v2483_v10, %v2113_v36  ;;  %v2114_v61 = vadd.f32 %v2049_v46, %v6708_v45 }
 0x256   : > { %v6863_v17 = vadd.f32 %v4812_v31, %v2115_v29 }
 0x257   : > { %v6865_v14 = vadd.f32 %v2486_v37, %v2114_v61 }
 0x259   : > { %v4751_v13 = vpop.f32.mrb[112].mxu1  ;;  %v4815_v38 = vpop.f32.mrb[112].mxu0 }
 0x25a   : > { %v2117_v39 = vadd.f32 %v4751_v13, %v6714_v27  ;;  %v2061_v43 = vpop.f32.mrb[113].mxu1  ;;  %v2498_v47 = vpop.f32.mrb[113].mxu0 }
 0x25b   : > { %v2116_v23 = vadd.f32 %v2061_v43, %v6717_v52  ;;  %v4752_v34 = vpop.f32.mrb[114].mxu1  ;;  %v4816_v55 = vpop.f32.mrb[114].mxu0 }
 0x25c   : > { %v6869_v2 = vadd.f32 %v4815_v38, %v2117_v39  ;;  %v2118_v8 = vadd.f32 %v4752_v34, %v6719_v35  ;;  %v2064_v21 = vpop.f32.mrb[115].mxu1  ;;  %v2501_v45 = vpop.f32.mrb[115].mxu0 }
 0x25d   : > { %v6872_v42 = vadd.f32 %v2498_v47, %v2116_v23 }
 0x25e   : > { %v6874_v60 = vadd.f32 %v4816_v55, %v2118_v8 }
 0x261   : > { %v4755_v24 = vpop.f32.mrb[116].mxu1  ;;  %v4819_v49 = vpop.f32.mrb[116].mxu0 }
 0x262   : > { %v2120_v27 = vadd.f32 %v4755_v24, %v6726_v25  ;;  %v2076_v7 = vpop.f32.mrb[117].mxu1  ;;  %v2513_v3 = vpop.f32.mrb[117].mxu0 }
 0x263   : > { %v4756_v58 = vpop.f32.mrb[118].mxu1  ;;  %v4820_v52 = vpop.f32.mrb[118].mxu0 }
 0x264   : > { %v6877_v50 = vadd.f32 %v4819_v49, %v2120_v27  ;;  %v2078_v1 = vpop.f32.mrb[119].mxu1  ;;  %v2515_v0 = vpop.f32.mrb[119].mxu0 }
 0x265   : > { %v2119_v35 = vadd.f32 %v2078_v1, %v6731_v53 }
 0x267   : > { %v6880_v16 = vadd.f32 %v2515_v0, %v2119_v35 }
 0x269   : > { %v4839_v26 = vpop.f32.mrb[120].mxu1  ;;  %v4903_v10 = vpop.f32.mrb[120].mxu0 }
 0x26a   : > { %v2731_v36 = vpop.f32.mrb[121].mxu1  ;;  %v3037_v32 = vpop.f32.mrb[121].mxu0 }
 0x26b   : > { %v2906_v31 = vadd.f32 %v2731_v36, %v6737_v28  ;;  %v4840_v29 = vpop.f32.mrb[122].mxu1  ;;  %v4904_v25 = vpop.f32.mrb[122].mxu0 }
 0x26c   : > { %v2908_v46 = vadd.f32 %v4840_v29, %v6740_v57  ;;  %v2734_v37 = vpop.f32.mrb[123].mxu1  ;;  %v3040_v61 = vpop.f32.mrb[123].mxu0 }
 0x26d   : > { %v6884_v13 = vadd.f32 %v3037_v32, %v2906_v31  ;;  %v2907_v38 = vadd.f32 %v2734_v37, %v6744_v63 }
 0x26e   : > { %v6887_v39 = vadd.f32 %v4904_v25, %v2908_v46 }
 0x26f   : > { %v6889_v53 = vadd.f32 %v3040_v61, %v2907_v38 }
 0x271   : > { %v4843_v43 = vpop.f32.mrb[124].mxu1  ;;  %v4907_v47 = vpop.f32.mrb[124].mxu0 }
 0x272   : > { %v2910_v23 = vadd.f32 %v4843_v43, %v6750_v41  ;;  %v2746_v34 = vpop.f32.mrb[125].mxu1  ;;  %v3052_v28 = vpop.f32.mrb[125].mxu0 }
 0x273   : > { %v2909_v55 = vadd.f32 %v2746_v34, %v6753_v9  ;;  %v4844_v8 = vpop.f32.mrb[126].mxu1  ;;  %v4908_v57 = vpop.f32.mrb[126].mxu0 }
 0x274   : > { %v6893_v21 = vadd.f32 %v4907_v47, %v2910_v23  ;;  %v2911_v45 = vadd.f32 %v4844_v8, %v6755_v12  ;;  %v2749_v24 = vpop.f32.mrb[127].mxu1  ;;  %v3055_v63 = vpop.f32.mrb[127].mxu0 }
 0x275   : > { %v6896_v49 = vadd.f32 %v3052_v28, %v2909_v55 }
 0x276   : > { %v6898_v27 = vadd.f32 %v4908_v57, %v2911_v45 }
 0x279   : > { %v4847_v7 = vpop.f32.mrb[128].mxu1  ;;  %v4911_v3 = vpop.f32.mrb[128].mxu0 }
 0x27a   : > { %v2913_v41 = vadd.f32 %v4847_v7, %v6762_v51  ;;  %v2761_v58 = vpop.f32.mrb[129].mxu1  ;;  %v3067_v52 = vpop.f32.mrb[129].mxu0 }
 0x27b   : > { %v4848_v1 = vpop.f32.mrb[130].mxu1  ;;  %v4912_v9 = vpop.f32.mrb[130].mxu0 }
 0x27c   : > { %v6901_v0 = vadd.f32 %v4911_v3, %v2913_v41  ;;  %v2763_v35 = vpop.f32.mrb[131].mxu1  ;;  %v3069_v26 = vpop.f32.mrb[131].mxu0 }
 0x27d   : > { %v2912_v12 = vadd.f32 %v2763_v35, %v6767_v40 }
 0x27f   : > { %v6904_v10 = vadd.f32 %v3069_v26, %v2912_v12 }
 0x281   : > { %v4851_v36 = vpop.f32.mrb[132].mxu1  ;;  %v4915_v32 = vpop.f32.mrb[132].mxu0 }
 0x282   : > { %v2775_v31 = vpop.f32.mrb[133].mxu1  ;;  %v3081_v29 = vpop.f32.mrb[133].mxu0 }
 0x283   : > { %v2914_v25 = vadd.f32 %v2775_v31, %v6773_v6  ;;  %v4852_v46 = vpop.f32.mrb[134].mxu1  ;;  %v4916_v51 = vpop.f32.mrb[134].mxu0 }
 0x284   : > { %v2916_v37 = vadd.f32 %v4852_v46, %v6776_v15  ;;  %v2778_v61 = vpop.f32.mrb[135].mxu1  ;;  %v3084_v38 = vpop.f32.mrb[135].mxu0 }
 0x285   : > { %v6908_v43 = vadd.f32 %v3081_v29, %v2914_v25  ;;  %v2915_v47 = vadd.f32 %v2778_v61, %v6780_v20 }
 0x286   : > { %v6911_v23 = vadd.f32 %v4916_v51, %v2916_v37 }
 0x287   : > { %v6913_v40 = vadd.f32 %v3084_v38, %v2915_v47 }
 0x289   : > { %v4855_v34 = vpop.f32.mrb[136].mxu1  ;;  %v4919_v28 = vpop.f32.mrb[136].mxu0 }
 0x28a   : > { %v2918_v55 = vadd.f32 %v4855_v34, %v6786_v4  ;;  %v2790_v8 = vpop.f32.mrb[137].mxu1  ;;  %v3096_v6 = vpop.f32.mrb[137].mxu0 }
 0x28b   : > { %v2917_v57 = vadd.f32 %v2790_v8, %v6789_v11  ;;  %v4856_v45 = vpop.f32.mrb[138].mxu1  ;;  %v4920_v15 = vpop.f32.mrb[138].mxu0 }
 0x28c   : > { %v6917_v24 = vadd.f32 %v4919_v28, %v2918_v55  ;;  %v2919_v63 = vadd.f32 %v4856_v45, %v6791_v54  ;;  %v2793_v7 = vpop.f32.mrb[139].mxu1  ;;  %v3099_v20 = vpop.f32.mrb[139].mxu0 }
 0x28d   : > { %v6920_v3 = vadd.f32 %v3096_v6, %v2917_v57 }
 0x28e   : > { %v6922_v41 = vadd.f32 %v4920_v15, %v2919_v63 }
 0x291   : > { %v4859_v58 = vpop.f32.mrb[140].mxu1  ;;  %v4923_v52 = vpop.f32.mrb[140].mxu0 }
 0x292   : > { %v2921_v4 = vadd.f32 %v4859_v58, %v6798_v30  ;;  %v2805_v1 = vpop.f32.mrb[141].mxu1  ;;  %v3111_v9 = vpop.f32.mrb[141].mxu0 }
 0x293   : > { %v4860_v35 = vpop.f32.mrb[142].mxu1  ;;  %v4924_v11 = vpop.f32.mrb[142].mxu0 }
 0x294   : > { %v6925_v26 = vadd.f32 %v4923_v52, %v2921_v4  ;;  %v2807_v12 = vpop.f32.mrb[143].mxu1  ;;  %v3113_v36 = vpop.f32.mrb[143].mxu0 }
 0x295   : > { %v2920_v54 = vadd.f32 %v2807_v12, %v6803_v44 }
 0x297   : > { %v6928_v32 = vadd.f32 %v3113_v36, %v2920_v54 }
 0x299   : > { %v4863_v31 = vpop.f32.mrb[144].mxu1  ;;  %v4927_v29 = vpop.f32.mrb[144].mxu0 }
 0x29a   : > { %v2819_v25 = vpop.f32.mrb[145].mxu1  ;;  %v3125_v46 = vpop.f32.mrb[145].mxu0 }
 0x29b   : > { %v2922_v51 = vadd.f32 %v2819_v25, %v6814_v18  ;;  %v4864_v37 = vpop.f32.mrb[146].mxu1  ;;  %v4928_v30 = vpop.f32.mrb[146].mxu0 }
 0x29c   : > { %v2924_v61 = vadd.f32 %v4864_v37, %v6817_v62  ;;  %v2822_v38 = vpop.f32.mrb[147].mxu1  ;;  %v3128_v47 = vpop.f32.mrb[147].mxu0 }
 0x29d   : > { %v6932_v34 = vadd.f32 %v3125_v46, %v2922_v51  ;;  %v2923_v28 = vadd.f32 %v2822_v38, %v6826_v59 }
 0x29e   : > { %v6935_v55 = vadd.f32 %v4928_v30, %v2924_v61 }
 0x29f   : > { %v6937_v44 = vadd.f32 %v3128_v47, %v2923_v28 }
 0x2a1   : > { %v4867_v8 = vpop.f32.mrb[148].mxu1  ;;  %v4931_v6 = vpop.f32.mrb[148].mxu0 }
 0x2a2   : > { %v2926_v57 = vadd.f32 %v4867_v8, %v6841_v48  ;;  %v2834_v45 = vpop.f32.mrb[149].mxu1  ;;  %v3140_v18 = vpop.f32.mrb[149].mxu0 }
 0x2a3   : > { %v2925_v15 = vadd.f32 %v2834_v45, %v6846_v33  ;;  %v4868_v63 = vpop.f32.mrb[150].mxu1  ;;  %v4932_v62 = vpop.f32.mrb[150].mxu0 }
 0x2a4   : > { %v6941_v7 = vadd.f32 %v4931_v6, %v2926_v57  ;;  %v2927_v20 = vadd.f32 %v4868_v63, %v6848_v22  ;;  %v2837_v58 = vpop.f32.mrb[151].mxu1  ;;  %v3143_v59 = vpop.f32.mrb[151].mxu0 }
 0x2a5   : > { %v6944_v52 = vadd.f32 %v3140_v18, %v2925_v15 }
 0x2a6   : > { %v6946_v4 = vadd.f32 %v4932_v62, %v2927_v20 }
 0x2a9   : > { %v4871_v1 = vpop.f32.mrb[152].mxu1  ;;  %v4935_v9 = vpop.f32.mrb[152].mxu0 }
 0x2aa   : > { %v2929_v48 = vadd.f32 %v4871_v1, %v6853_v56  ;;  %v2849_v35 = vpop.f32.mrb[153].mxu1  ;;  %v3155_v11 = vpop.f32.mrb[153].mxu0 }
 0x2ab   : > { %v4872_v12 = vpop.f32.mrb[154].mxu1  ;;  %v4936_v33 = vpop.f32.mrb[154].mxu0 }
 0x2ac   : > { %v6949_v36 = vadd.f32 %v4935_v9, %v2929_v48  ;;  %v2851_v54 = vpop.f32.mrb[155].mxu1  ;;  %v3157_v31 = vpop.f32.mrb[155].mxu0 }
 0x2ad   : > { %v2928_v22 = vadd.f32 %v2851_v54, %v6856_v5 }
 0x2af   : > { %v6952_v29 = vadd.f32 %v3157_v31, %v2928_v22 }
 0x2b1   : > { %v4875_v25 = vpop.f32.mrb[156].mxu1  ;;  %v4939_v46 = vpop.f32.mrb[156].mxu0 }
 0x2b2   : > { %v2863_v51 = vpop.f32.mrb[157].mxu1  ;;  %v3169_v37 = vpop.f32.mrb[157].mxu0 }
 0x2b3   : > { %v2930_v30 = vadd.f32 %v2863_v51, %v6860_v19  ;;  %v4876_v61 = vpop.f32.mrb[158].mxu1  ;;  %v4940_v56 = vpop.f32.mrb[158].mxu0 }
 0x2b4   : > { %v2932_v38 = vadd.f32 %v4876_v61, %v6863_v17  ;;  %v2866_v47 = vpop.f32.mrb[159].mxu1  ;;  %v3172_v28 = vpop.f32.mrb[159].mxu0 }
 0x2b5   : > { %v6956_v8 = vadd.f32 %v3169_v37, %v2930_v30  ;;  %v2931_v6 = vadd.f32 %v2866_v47, %v6865_v14  ;;  %v6983_v47 = vld [vmem:[%s7141_s3] ss:$0 sm:$0xff] }
 0x2b6   : > { %v6959_v57 = vadd.f32 %v4940_v56, %v2932_v38 }
 0x2b7   : > { %v6961_v5 = vadd.f32 %v3172_v28, %v2931_v6 }
 0x2b9   : > { %v4879_v45 = vpop.f32.mrb[160].mxu1  ;;  %v4943_v18 = vpop.f32.mrb[160].mxu0 }
 0x2ba   : > { %v2934_v15 = vadd.f32 %v4879_v45, %v6869_v2  ;;  %v2878_v63 = vpop.f32.mrb[161].mxu1  ;;  %v3184_v19 = vpop.f32.mrb[161].mxu0 }
 0x2bb   : > { %v2933_v62 = vadd.f32 %v2878_v63, %v6872_v42  ;;  %v4880_v20 = vpop.f32.mrb[162].mxu1  ;;  %v4944_v17 = vpop.f32.mrb[162].mxu0 }
 0x2bc   : > { %v6965_v58 = vadd.f32 %v4943_v18, %v2934_v15  ;;  %v2935_v59 = vadd.f32 %v4880_v20, %v6874_v60  ;;  %v2881_v1 = vpop.f32.mrb[163].mxu1  ;;  %v3187_v14 = vpop.f32.mrb[163].mxu0 }
 0x2bd   : > { %v6968_v9 = vadd.f32 %v3184_v19, %v2933_v62 }
 0x2be   : > { %v6970_v48 = vadd.f32 %v4944_v17, %v2935_v59 }
 0x2c1   : > { %v4883_v35 = vpop.f32.mrb[164].mxu1  ;;  %v4947_v11 = vpop.f32.mrb[164].mxu0 }
 0x2c2   : > { %v2937_v2 = vadd.f32 %v4883_v35, %v6877_v50  ;;  %v2893_v12 = vpop.f32.mrb[165].mxu1  ;;  %v3199_v33 = vpop.f32.mrb[165].mxu0 }
 0x2c3   : > { %v4884_v42 = vpop.f32.mrb[166].mxu1  ;;  %v4948_v54 = vpop.f32.mrb[166].mxu0 }
 0x2c4   : > { %v6973_v31 = vadd.f32 %v4947_v11, %v2937_v2  ;;  %v2895_v22 = vpop.f32.mrb[167].mxu1  ;;  %v3201_v25 = vpop.f32.mrb[167].mxu0 }
 0x2c5   : > { %v2936_v60 = vadd.f32 %v2895_v22, %v6880_v16 }
 0x2c7   : > { %v6976_v46 = vadd.f32 %v3201_v25, %v2936_v60 }
 0x2c9   : > { %v4967_v51 = vpop.f32.mrb[168].mxu1  ;;  %v5031_v37 = vpop.f32.mrb[168].mxu0 }
 0x2ca   : > { %v3363_v30 = vpop.f32.mrb[169].mxu1  ;;  %v3678_v61 = vpop.f32.mrb[169].mxu0 }
 0x2cb   : > { %v3538_v56 = vadd.f32 %v3363_v30, %v6884_v13  ;;  %v4968_v50 = vpop.f32.mrb[170].mxu1  ;;  %v5032_v38 = vpop.f32.mrb[170].mxu0 }
 0x2cc   : > { %v3540_v28 = vadd.f32 %v4968_v50, %v6887_v39  ;;  %v3366_v6 = vpop.f32.mrb[171].mxu1  ;;  %v3681_v16 = vpop.f32.mrb[171].mxu0 }
 0x2cd   : > { %v3853_v45 = vadd.f32 %v3678_v61, %v3538_v56  ;;  %v3539_v18 = vadd.f32 %v3366_v6, %v6889_v53 }
 0x2ce   : > { %v3855_v15 = vadd.f32 %v5032_v38, %v3540_v28 }
 0x2cf   : > { %v3892_v63 = vadd.f32 %v6983_v47, %v3853_v45  ;;  %v3854_v19 = vadd.f32 %v3681_v16, %v3539_v18 }
 0x2d0   : > { %v3894_v13 = vadd.f32 %v6983_v47, %v3855_v15 }
 0x2d1   : > { %3924 = vst [vmem:[%s6989_s7] sm:$0xff] %v3892_v63  ;;  %v3893_v62 = vadd.f32 %v6983_v47, %v3854_v19  ;;  %v4971_v39 = vpop.f32.mrb[172].mxu1  ;;  %v5035_v20 = vpop.f32.mrb[172].mxu0 }
 0x2d2   : > { %3926 = vst [vmem:[%s6989_s7 + $0x10] sm:$0xff] %v3894_v13  ;;  %v3542_v53 = vadd.f32 %v4971_v39, %v6893_v21  ;;  %v3378_v17 = vpop.f32.mrb[173].mxu1  ;;  %v3693_v59 = vpop.f32.mrb[173].mxu0 }
 0x2d3   : > { %3925 = vst [vmem:[%s6989_s7 + $0x8] sm:$0xff] %v3893_v62  ;;  %v3541_v1 = vadd.f32 %v3378_v17, %v6896_v49  ;;  %v4972_v14 = vpop.f32.mrb[174].mxu1  ;;  %v5036_v35 = vpop.f32.mrb[174].mxu0 }
 0x2d4   : > { %v3857_v11 = vadd.f32 %v5035_v20, %v3542_v53  ;;  %v3543_v2 = vadd.f32 %v4972_v14, %v6898_v27  ;;  %v3381_v12 = vpop.f32.mrb[175].mxu1  ;;  %v3696_v33 = vpop.f32.mrb[175].mxu0 }
 0x2d5   : > { %v3856_v42 = vadd.f32 %v3693_v59, %v3541_v1 }
 0x2d6   : > { %v3896_v54 = vadd.f32 %v6983_v47, %v3857_v11  ;;  %v3858_v22 = vadd.f32 %v5036_v35, %v3543_v2 }
 0x2d7   : > { %v3895_v21 = vadd.f32 %v6983_v47, %v3856_v42 }
 0x2d8   : > { %3928 = vst [vmem:[%s6989_s7 + $0x20] sm:$0xff] %v3896_v54  ;;  %v3897_v25 = vadd.f32 %v6983_v47, %v3858_v22 }
 0x2d9   : > { %3927 = vst [vmem:[%s6989_s7 + $0x18] sm:$0xff] %v3895_v21  ;;  %v4975_v49 = vpop.f32.mrb[176].mxu1  ;;  %v5039_v60 = vpop.f32.mrb[176].mxu0 }
 0x2da   : > { %3929 = vst [vmem:[%s6989_s7 + $0x28] sm:$0xff] %v3897_v25  ;;  %v3545_v51 = vadd.f32 %v4975_v49, %v6901_v0  ;;  %v3393_v37 = vpop.f32.mrb[177].mxu1  ;;  %v3708_v27 = vpop.f32.mrb[177].mxu0 }
 0x2db   : > { %v4976_v30 = vpop.f32.mrb[178].mxu1  ;;  %v5040_v61 = vpop.f32.mrb[178].mxu0 }
 0x2dc   : > { %v3860_v56 = vadd.f32 %v5039_v60, %v3545_v51  ;;  %v3395_v50 = vpop.f32.mrb[179].mxu1  ;;  %v3710_v38 = vpop.f32.mrb[179].mxu0 }
 0x2dd   : > { %v3544_v28 = vadd.f32 %v3395_v50, %v6904_v10 }
 0x2de   : > { %v3899_v6 = vadd.f32 %v6983_v47, %v3860_v56 }
 0x2df   : > { %v3859_v16 = vadd.f32 %v3710_v38, %v3544_v28 }
 0x2e0   : > { %3931 = vst [vmem:[%s6989_s7 + $0x38] sm:$0xff] %v3899_v6 }
 0x2e1   : > { %v3898_v45 = vadd.f32 %v6983_v47, %v3859_v16  ;;  %v4979_v18 = vpop.f32.mrb[180].mxu1  ;;  %v5043_v15 = vpop.f32.mrb[180].mxu0 }
 0x2e2   : > { %v3407_v0 = vpop.f32.mrb[181].mxu1  ;;  %v3722_v63 = vpop.f32.mrb[181].mxu0 }
 0x2e3   : > { %3930 = vst [vmem:[%s6989_s7 + $0x30] sm:$0xff] %v3898_v45  ;;  %v3546_v19 = vadd.f32 %v3407_v0, %v6908_v43  ;;  %v4980_v13 = vpop.f32.mrb[182].mxu1  ;;  %v5044_v62 = vpop.f32.mrb[182].mxu0 }
 0x2e4   : > { %v3548_v39 = vadd.f32 %v4980_v13, %v6911_v23  ;;  %v3410_v10 = vpop.f32.mrb[183].mxu1  ;;  %v3725_v20 = vpop.f32.mrb[183].mxu0 }
 0x2e5   : > { %v3861_v53 = vadd.f32 %v3722_v63, %v3546_v19  ;;  %v3547_v17 = vadd.f32 %v3410_v10, %v6913_v40 }
 0x2e6   : > { %v3863_v59 = vadd.f32 %v5044_v62, %v3548_v39 }
 0x2e7   : > { %v3900_v1 = vadd.f32 %v6983_v47, %v3861_v53  ;;  %v3862_v14 = vadd.f32 %v3725_v20, %v3547_v17 }
 0x2e8   : > { %v3902_v35 = vadd.f32 %v6983_v47, %v3863_v59 }
 0x2e9   : > { %3932 = vst [vmem:[%s6989_s7 + $0x40] sm:$0xff] %v3900_v1  ;;  %v3901_v43 = vadd.f32 %v6983_v47, %v3862_v14  ;;  %v4983_v11 = vpop.f32.mrb[184].mxu1  ;;  %v5047_v2 = vpop.f32.mrb[184].mxu0 }
 0x2ea   : > { %3934 = vst [vmem:[%s6989_s7 + $0x50] sm:$0xff] %v3902_v35  ;;  %v3550_v23 = vadd.f32 %v4983_v11, %v6917_v24  ;;  %v3422_v12 = vpop.f32.mrb[185].mxu1  ;;  %v3737_v33 = vpop.f32.mrb[185].mxu0 }
 0x2eb   : > { %3933 = vst [vmem:[%s6989_s7 + $0x48] sm:$0xff] %v3901_v43  ;;  %v3549_v40 = vadd.f32 %v3422_v12, %v6920_v3  ;;  %v4984_v42 = vpop.f32.mrb[186].mxu1  ;;  %v5048_v54 = vpop.f32.mrb[186].mxu0 }
 0x2ec   : > { %v3865_v22 = vadd.f32 %v5047_v2, %v3550_v23  ;;  %v3551_v21 = vadd.f32 %v4984_v42, %v6922_v41  ;;  %v3425_v25 = vpop.f32.mrb[187].mxu1  ;;  %v3740_v49 = vpop.f32.mrb[187].mxu0 }
 0x2ed   : > { %v3864_v60 = vadd.f32 %v3737_v33, %v3549_v40 }
 0x2ee   : > { %v3904_v51 = vadd.f32 %v6983_v47, %v3865_v22  ;;  %v3866_v37 = vadd.f32 %v5048_v54, %v3551_v21 }
 0x2ef   : > { %v3903_v24 = vadd.f32 %v6983_v47, %v3864_v60 }
 0x2f0   : > { %3936 = vst [vmem:[%s6989_s7 + $0x60] sm:$0xff] %v3904_v51  ;;  %v3905_v27 = vadd.f32 %v6983_v47, %v3866_v37 }
 0x2f1   : > { %3935 = vst [vmem:[%s6989_s7 + $0x58] sm:$0xff] %v3903_v24  ;;  %v4987_v3 = vpop.f32.mrb[188].mxu1  ;;  %v5051_v30 = vpop.f32.mrb[188].mxu0 }
 0x2f2   : > { %3937 = vst [vmem:[%s6989_s7 + $0x68] sm:$0xff] %v3905_v27  ;;  %v3553_v61 = vadd.f32 %v4987_v3, %v6925_v26  ;;  %v3437_v56 = vpop.f32.mrb[189].mxu1  ;;  %v3752_v41 = vpop.f32.mrb[189].mxu0 }
 0x2f3   : > { %v4988_v50 = vpop.f32.mrb[190].mxu1  ;;  %v5052_v38 = vpop.f32.mrb[190].mxu0 }
 0x2f4   : > { %v3868_v28 = vadd.f32 %v5051_v30, %v3553_v61  ;;  %v3439_v6 = vpop.f32.mrb[191].mxu1  ;;  %v3754_v16 = vpop.f32.mrb[191].mxu0 }
 0x2f5   : > { %v3552_v45 = vadd.f32 %v3439_v6, %v6928_v32 }
 0x2f6   : > { %v3907_v18 = vadd.f32 %v6983_v47, %v3868_v28 }
 0x2f7   : > { %v3867_v15 = vadd.f32 %v3754_v16, %v3552_v45 }
 0x2f8   : > { %3939 = vst [vmem:[%s6989_s7 + $0x78] sm:$0xff] %v3907_v18 }
 0x2f9   : > { %v3906_v0 = vadd.f32 %v6983_v47, %v3867_v15  ;;  %v4991_v63 = vpop.f32.mrb[192].mxu1  ;;  %v5055_v19 = vpop.f32.mrb[192].mxu0 }
 0x2fa   : > { %v3451_v26 = vpop.f32.mrb[193].mxu1  ;;  %v3766_v13 = vpop.f32.mrb[193].mxu0 }
 0x2fb   : > { %3938 = vst [vmem:[%s6989_s7 + $0x70] sm:$0xff] %v3906_v0  ;;  %v3554_v62 = vadd.f32 %v3451_v26, %v6932_v34  ;;  %v4992_v39 = vpop.f32.mrb[194].mxu1  ;;  %v5056_v10 = vpop.f32.mrb[194].mxu0 }
 0x2fc   : > { %v3556_v20 = vadd.f32 %v4992_v39, %v6935_v55  ;;  %v3454_v32 = vpop.f32.mrb[195].mxu1  ;;  %v3769_v53 = vpop.f32.mrb[195].mxu0 }
 0x2fd   : > { %v3869_v17 = vadd.f32 %v3766_v13, %v3554_v62  ;;  %v3555_v59 = vadd.f32 %v3454_v32, %v6937_v44 }
 0x2fe   : > { %v3871_v1 = vadd.f32 %v5056_v10, %v3556_v20 }
 0x2ff   : > { %v3908_v14 = vadd.f32 %v6983_v47, %v3869_v17  ;;  %v3870_v35 = vadd.f32 %v3769_v53, %v3555_v59 }
 0x300   : > { %v3910_v43 = vadd.f32 %v6983_v47, %v3871_v1 }
 0x301   : > { %3940 = vst [vmem:[%s6989_s7 + $0x80] sm:$0xff] %v3908_v14  ;;  %v3909_v34 = vadd.f32 %v6983_v47, %v3870_v35  ;;  %v4995_v11 = vpop.f32.mrb[196].mxu1  ;;  %v5059_v2 = vpop.f32.mrb[196].mxu0 }
 0x302   : > { %3942 = vst [vmem:[%s6989_s7 + $0x90] sm:$0xff] %v3910_v43  ;;  %v3558_v55 = vadd.f32 %v4995_v11, %v6941_v7  ;;  %v3466_v23 = vpop.f32.mrb[197].mxu1  ;;  %v3781_v12 = vpop.f32.mrb[197].mxu0 }
 0x303   : > { %3941 = vst [vmem:[%s6989_s7 + $0x88] sm:$0xff] %v3909_v34  ;;  %v3557_v44 = vadd.f32 %v3466_v23, %v6944_v52  ;;  %v4996_v33 = vpop.f32.mrb[198].mxu1  ;;  %v5060_v40 = vpop.f32.mrb[198].mxu0 }
 0x304   : > { %v3873_v42 = vadd.f32 %v5059_v2, %v3558_v55  ;;  %v3559_v54 = vadd.f32 %v4996_v33, %v6946_v4  ;;  %v3469_v22 = vpop.f32.mrb[199].mxu1  ;;  %v3784_v21 = vpop.f32.mrb[199].mxu0 }
 0x305   : > { %v3872_v25 = vadd.f32 %v3781_v12, %v3557_v44 }
 0x306   : > { %v3912_v49 = vadd.f32 %v6983_v47, %v3873_v42  ;;  %v3874_v60 = vadd.f32 %v5060_v40, %v3559_v54 }
 0x307   : > { %v3911_v7 = vadd.f32 %v6983_v47, %v3872_v25 }
 0x308   : > { %3944 = vst [vmem:[%s6989_s7 + $0xa0] sm:$0xff] %v3912_v49  ;;  %v3913_v51 = vadd.f32 %v6983_v47, %v3874_v60 }
 0x309   : > { %3943 = vst [vmem:[%s6989_s7 + $0x98] sm:$0xff] %v3911_v7  ;;  %v4999_v52 = vpop.f32.mrb[200].mxu1  ;;  %v5063_v37 = vpop.f32.mrb[200].mxu0 }
 0x30a   : > { %3945 = vst [vmem:[%s6989_s7 + $0xa8] sm:$0xff] %v3913_v51  ;;  %v3561_v24 = vadd.f32 %v4999_v52, %v6949_v36  ;;  %v3481_v27 = vpop.f32.mrb[201].mxu1  ;;  %v3796_v4 = vpop.f32.mrb[201].mxu0 }
 0x30b   : > { %v5000_v3 = vpop.f32.mrb[202].mxu1  ;;  %v5064_v30 = vpop.f32.mrb[202].mxu0 }
 0x30c   : > { %v3876_v61 = vadd.f32 %v5063_v37, %v3561_v24  ;;  %v3483_v56 = vpop.f32.mrb[203].mxu1  ;;  %v3798_v41 = vpop.f32.mrb[203].mxu0 }
 0x30d   : > { %v3560_v50 = vadd.f32 %v3483_v56, %v6952_v29 }
 0x30e   : > { %v3915_v38 = vadd.f32 %v6983_v47, %v3876_v61 }
 0x30f   : > { %v3875_v28 = vadd.f32 %v3798_v41, %v3560_v50 }
 0x310   : > { %3947 = vst [vmem:[%s6989_s7 + $0xb8] sm:$0xff] %v3915_v38 }
 0x311   : > { %v3914_v6 = vadd.f32 %v6983_v47, %v3875_v28  ;;  %v5003_v16 = vpop.f32.mrb[204].mxu1  ;;  %v5067_v45 = vpop.f32.mrb[204].mxu0 }
 0x312   : > { %v3495_v36 = vpop.f32.mrb[205].mxu1  ;;  %v3810_v18 = vpop.f32.mrb[205].mxu0 }
 0x313   : > { %3946 = vst [vmem:[%s6989_s7 + $0xb0] sm:$0xff] %v3914_v6  ;;  %v3562_v15 = vadd.f32 %v3495_v36, %v6956_v8  ;;  %v5004_v0 = vpop.f32.mrb[206].mxu1  ;;  %v5068_v63 = vpop.f32.mrb[206].mxu0 }
 0x314   : > { %v3564_v19 = vadd.f32 %v5004_v0, %v6959_v57  ;;  %v3498_v29 = vpop.f32.mrb[207].mxu1  ;;  %v3813_v26 = vpop.f32.mrb[207].mxu0 }
 0x315   : > { %v3877_v13 = vadd.f32 %v3810_v18, %v3562_v15  ;;  %v3563_v62 = vadd.f32 %v3498_v29, %v6961_v5 }
 0x316   : > { %v3879_v39 = vadd.f32 %v5068_v63, %v3564_v19 }
 0x317   : > { %v3916_v10 = vadd.f32 %v6983_v47, %v3877_v13  ;;  %v3878_v20 = vadd.f32 %v3813_v26, %v3563_v62 }
 0x318   : > { %v3918_v32 = vadd.f32 %v6983_v47, %v3879_v39 }
 0x319   : > { %3948 = vst [vmem:[%s6989_s7 + $0xc0] sm:$0xff] %v3916_v10  ;;  %v3917_v8 = vadd.f32 %v6983_v47, %v3878_v20  ;;  %v5007_v53 = vpop.f32.mrb[208].mxu1  ;;  %v5071_v17 = vpop.f32.mrb[208].mxu0 }
 0x31a   : > { %3950 = vst [vmem:[%s6989_s7 + $0xd0] sm:$0xff] %v3918_v32  ;;  %v3566_v57 = vadd.f32 %v5007_v53, %v6965_v58  ;;  %v3510_v59 = vpop.f32.mrb[209].mxu1  ;;  %v3825_v1 = vpop.f32.mrb[209].mxu0 }
 0x31b   : > { %3949 = vst [vmem:[%s6989_s7 + $0xc8] sm:$0xff] %v3917_v8  ;;  %v3565_v5 = vadd.f32 %v3510_v59, %v6968_v9  ;;  %v5008_v14 = vpop.f32.mrb[210].mxu1  ;;  %v5072_v35 = vpop.f32.mrb[210].mxu0 }
 0x31c   : > { %v3881_v43 = vadd.f32 %v5071_v17, %v3566_v57  ;;  %v3567_v34 = vadd.f32 %v5008_v14, %v6970_v48  ;;  %v3513_v11 = vpop.f32.mrb[211].mxu1  ;;  %v3828_v2 = vpop.f32.mrb[211].mxu0 }
 0x31d   : > { %v3880_v55 = vadd.f32 %v3825_v1, %v3565_v5 }
 0x31e   : > { %v3920_v23 = vadd.f32 %v6983_v47, %v3881_v43  ;;  %v3882_v12 = vadd.f32 %v5072_v35, %v3567_v34 }
 0x31f   : > { %v3919_v58 = vadd.f32 %v6983_v47, %v3880_v55 }
 0x320   : > { %3952 = vst [vmem:[%s6989_s7 + $0xe0] sm:$0xff] %v3920_v23  ;;  %v3921_v44 = vadd.f32 %v6983_v47, %v3882_v12 }
 0x321   : > { %3951 = vst [vmem:[%s6989_s7 + $0xd8] sm:$0xff] %v3919_v58  ;;  %v5011_v9 = vpop.f32.mrb[212].mxu1  ;;  %v5075_v33 = vpop.f32.mrb[212].mxu0 }
 0x322   : > { %3953 = vst [vmem:[%s6989_s7 + $0xe8] sm:$0xff] %v3921_v44  ;;  %v3569_v48 = vadd.f32 %v5011_v9, %v6973_v31  ;;  %v3525_v40 = vpop.f32.mrb[213].mxu1  ;;  %v3840_v42 = vpop.f32.mrb[213].mxu0 }
 0x323   : > { %v5012_v54 = vpop.f32.mrb[214].mxu1  ;;  %v5076_v22 = vpop.f32.mrb[214].mxu0 }
 0x324   : > { %v3884_v21 = vadd.f32 %v5075_v33, %v3569_v48  ;;  %v3527_v25 = vpop.f32.mrb[215].mxu1  ;;  %v3842_v49 = vpop.f32.mrb[215].mxu0 }
 0x325   : > { %v3568_v60 = vadd.f32 %v3527_v25, %v6976_v46 }
 0x326   : > { %v3923_v7 = vadd.f32 %v6983_v47, %v3884_v21 }
 0x327   : > { %v3883_v51 = vadd.f32 %v3842_v49, %v3568_v60 }
 0x328   : > { %3955 = vst [vmem:[%s6989_s7 + $0xf8] sm:$0xff] %v3923_v7 }
 0x329   : > { %v3922_v31 = vadd.f32 %v6983_v47, %v3883_v51 }
 0x32b   : > { %3954 = vst [vmem:[%s6989_s7 + $0xf0] sm:$0xff] %v3922_v31 }
 0x32c   : > { %5355 = shalt.err (!%p5352_p8)
}
 0x32d   : > { %s5356_s8 = scalar_lea.hbm %s7085_s14, 4096  ;;  %s5360_s2 = scalar_lea.hbm %s7142_s4, 8192 }
 0x32e   : > { %p5357_p12 = scmp.ne.s32.totalorder %s7085_s14, %s5356_s8  ;;  %p5361_p6 = scmp.lt.u32.totalorder %s7085_s14, %s7142_s4 }
 0x32f   : > { %p5362_p11 = scmp.lt.u32.totalorder %s5360_s2, %s5356_s8  ;;  %p5364_p5 = scmp.lt.u32.totalorder %s5356_s8, %s7085_s14 }
 0x330   : > { %p5358_p13 = pnand %p5357_p12, %p5559_p10 }
 0x331   : > { %p5363_p0 = por %p5362_p11, %p5361_p6 }
 0x332   : > { %p5359_p3 = pneg %p5358_p13 }
 0x333   : > { %p5365_p9 = por %p5364_p5, %p5363_p0 }
 0x335   : > { %p5366_p1 = pnand %p5365_p9, %p5359_p3 }
 0x337   : > { %5369 = shalt.err (!%p5366_p1)
}
 0x338   : > { %s5441_s6 = smov 128   ;;  %s5442_s21 = smov 8  }
 0x339   : > { %5106 = dma.vmem_to_hbm [thread:$0]  (%p5559_p10), %s7087_s9, 4096, %s7085_s14, %s3957_s0, %s5441_s6, %s5441_s6, %s5442_s21  }
 0x33a PF: > { %s3988_s23 = sand.u32 1, %s5412_s15   ;;  %p7412_p2 = scmp.ne.s32.totalorder %s7248_s24, 0 }
 0x33b   : > { %p7413_p7 = scmp.ge.s32.totalorder %s5432_s20, 2  ;;  %s3989_s10 = scalar_lea.sflag [#allocation4], %s3988_s23 }
 0x33d   : > { %p5120_p4 = pnand %p7413_p7, %p7412_p2 }
 0x33f   : > { %5407 = dma.done.wait (!%p5120_p4), %s3989_s10, 4096  }
 0x340   : > { %5409 = vsyncadd (!%p5120_p4), %s3989_s10, 4294963200  ;;  %s23_s20 = sadd.s32 1, %s5432_s20   ;;  %s7414_s7 = sld [smem:[#allocation13_spill]] }
 0x341   : > { %p20_p8 = scmp.ge.s32.totalorder %s23_s20, 4   ;;  %s7415_s17 = sld [smem:[#allocation15_spill]] }
 0x342   : > { %s7416_s28 = sld [smem:[#allocation14_spill]]  ;;  %s7417_s15 = smov %s5416_s16 }
 0x343   : > { %s7419_s18 = smov %s5428_s19  ;;  %22 = sbr.rel (!%p20_p8) target bundleno = 11 (0xb), region = 106 }
 0x346   : > { %s7418_s16 = smov %s7414_s7 }
 0x348   : > { %s7420_s19 = smov %s7416_s28 }
 0x34a   :  { %3994 = vsyncpa [#allocation3], 1 }
 0x34b   :  { %3996 = vsyncpa [#allocation3 + $0x1], 1 }
 0x34c   :  { %3997 = vsyncpa [#allocation6], 1 }
 0x34d   :  { %3999 = vsyncpa [#allocation6 + $0x1], 1 }
 0x34e   :  { %4000 = vsyncpa [#allocation4], 1 }
 0x34f   :  { %4002 = vsyncpa [#allocation4 + $0x1], 1 }

</bundles_post_ra>
